<compile_context>
chip_gen: v7x
topology: tpu7x:2x2x1
jax: 0.10.0
libtpu: 0.0.40
codegen_flags: <defaults>
</compile_context>

<pallas_src>
import functools

import jax
import jax.numpy as jnp
from jax.experimental import pallas as pl
from jax.experimental.pallas import tpu as pltpu


_HID = 64        # hidden width of both decoders in this config
_FEAT_IN = 16    # packed input lanes: [x(3) | v(3) | h(8) | 1 | pad(1)]


# ----------------------------------------------------------------------------
# LoTD-style multi-level dense grid encoding (plain JAX glue, 1 gather / level)
# ----------------------------------------------------------------------------
def lotd_encode(x, grids):
    """x: (N, 3) normalized coords in [-1, 1].  grids: list of (R, R, R, F) arrays."""
    feats = []
    for g in grids:
        R = g.shape[0]
        F = g.shape[-1]
        gf = g.reshape(R * R * R, F)

        u = (x * 0.5 + 0.5) * (R - 1)                         # (N, 3) in [0, R-1]
        u = jnp.clip(u, 0.0, float(R - 1))
        i0 = jnp.clip(jnp.floor(u), 0.0, float(R - 2)).astype(jnp.int32)   # (N, 3)
        w = jnp.clip(u - i0.astype(u.dtype), 0.0, 1.0)        # (N, 3) in [0, 1]

        corner = jnp.arange(8, dtype=jnp.int32)               # (8,)
        dx = (corner >> 2) & 1
        dy = (corner >> 1) & 1
        dz = corner & 1
        offs = dx * (R * R) + dy * R + dz                     # (8,)
        base = i0[:, 0] * (R * R) + i0[:, 1] * R + i0[:, 2]   # (N,)
        idx = base[:, None] + offs[None, :]                   # (N, 8)

        corners = jnp.take(gf, idx, axis=0)                   # (N, 8, F) -- one gather
        wx, wy, wz = w[:, 0:1], w[:, 1:2], w[:, 2:3]          # (N, 1) each
        cw = (jnp.where(dx[None, :] == 1, wx, 1.0 - wx)
              * jnp.where(dy[None, :] == 1, wy, 1.0 - wy)
              * jnp.where(dz[None, :] == 1, wz, 1.0 - wz))    # (N, 8)
        feats.append((corners * cw[:, :, None]).sum(axis=1))  # (N, F)
    return jnp.concatenate(feats, axis=-1)                    # (N, L*F) f32


# ----------------------------------------------------------------------------
# Fused Pallas kernel: density MLP + radiance MLP (3 bf16 MXU passes per tile)
# ----------------------------------------------------------------------------
def nerf_decoder_kernel(feat_ref, w1_ref, w2_ref, b2_ref, w3_ref, b3_ref, out_ref):
    """Fused decoders on one row tile.

    feat lanes: [x(3) | v(3) | h(8) | 1 | 0]                (bf16, 16 lanes)
    stage 1:    lanes [0:64) radiance hidden-1, [64:128) density hidden
    stage 2:    lane 0 = sigma (identity), lanes [64:128) radiance hidden-2, rest zero
    stage 3:    rgb head only; packed output (4 lanes) = [sigma, r, g, b]
    """
    f32 = jnp.float32
    bf16 = jnp.bfloat16

    feat = feat_ref[...]                                       # (T, 16) bf16

    # ---- stage 1: fused first layers of both decoders (bias folded via the 1-lane) ----
    z1 = jnp.dot(feat, w1_ref[...], preferred_element_type=f32)
    z1 = jnp.maximum(z1, 0.0).astype(bf16)                     # (T, 128) bf16

    # ---- stage 2: block-diagonal blkdiag(wd2 -> lane 0, wr2 -> lanes 64:128) ----
    z2 = jnp.dot(z1, w2_ref[...], preferred_element_type=f32) + b2_ref[...]   # (T, 128) f32
    lane = jax.lax.broadcasted_iota(jnp.int32, z2.shape, 1)
    z2 = jnp.where(lane == 0, z2, jnp.maximum(z2, 0.0))        # keep sigma un-activated
    sigma = z2[:, 0:1]                                         # (T, 1) f32, exact pass-through

    # ---- stage 3: bf16 rgb head, packed straight into the 4-lane output ----
    rgb4 = (jnp.dot(z2.astype(bf16), w3_ref[...], preferred_element_type=f32)
            + b3_ref[...])                                     # (T, 4) f32
    lane4 = jax.lax.broadcasted_iota(jnp.int32, rgb4.shape, 1)
    out_ref[...] = jnp.where(lane4 == 0, sigma, jax.nn.sigmoid(rgb4))


# ----------------------------------------------------------------------------
# Wrapper: pack inputs, pick a tiling that divides the padded size, run kernel
# ----------------------------------------------------------------------------
def _round_up(x, m):
    return ((x + m - 1) // m) * m


def _choose_tiling(n, tile_n):
    """Pad n only to a multiple of 256 and pick a tile that divides it exactly."""
    n_pad = _round_up(max(n, 1), 256)
    steps = -(-n_pad // tile_n)
    if steps == 1 and n_pad >= 512:
        steps = 2     # v7x: give the 'parallel' grid axis >= 2 steps for its 2 TensorCores
    tile = _round_up(-(-n_pad // steps), 256)
    return tile, tile * steps, steps


def lotd_nerf_decoders(x, v, h, packed, tile_n=2048):
    w1, w2, b2, w3, b3 = packed
    n = x.shape[0]

    # Single lane-contiguous bf16 activation stream: [x | v | h | 1 | 0] (N, 16).
    ones = jnp.ones((n, 1), x.dtype)
    zero = jnp.zeros((n, 1), x.dtype)
    feat = jnp.concatenate([x, v, h, ones, zero], axis=-1).astype(jnp.bfloat16)

    tile, n_pad, steps = _choose_tiling(n, tile_n)
    if n_pad != n:
        feat = jnp.pad(feat, ((0, n_pad - n), (0, 0)))         # padded rows are all-zero

    row = pl.BlockSpec((tile, _FEAT_IN), lambda i: (i, 0))
    const = lambda a: pl.BlockSpec(a.shape, lambda i: (0, 0))  # weights: DMA'd once

    # Default tile_n=2048 keeps the per-step VMEM footprint well under the 16 MiB
    # v5e / v7x scoped defaults (no vmem_limit_bytes override needed).
    out = pl.pallas_call(
        nerf_decoder_kernel,
        out_shape=jax.ShapeDtypeStruct((n_pad, 4), jnp.float32),
        grid=(steps,),
        in_specs=[row, const(w1), const(w2), const(b2), const(w3), const(b3)],
        out_specs=pl.BlockSpec((tile, 4), lambda i: (i, 0)),
        compiler_params=pltpu.CompilerParams(
            dimension_semantics=("parallel",)),
    )(feat, w1, w2, b2, w3, b3)

    return out[:n, 0], out[:n, 1:4]


@functools.partial(jax.jit, static_argnames=("tile_n",))
def lotd_nerf_forward(x, v, grids, packed_params, tile_n=2048):
    # TODO(synk): the LoTD 8-corner grid gather stays in XLA glue; fusing a
    # data-dependent row gather into the Pallas kernel has no guaranteed lowering.
    h = lotd_encode(x, grids)                                   # (N, F_enc) f32
    sigma, rgb = lotd_nerf_decoders(x, v, h, packed_params, tile_n=tile_n)
    return dict(sigma=sigma, rgb=rgb)


# ----------------------------------------------------------------------------
# Parameter construction & MXU-friendly repacking
# ----------------------------------------------------------------------------
def make_params(key, f_enc=8, hidden=64, pos_dim=3, dir_dim=3):
    ks = jax.random.split(key, 10)

    def lin(k, cin, cout):
        s = 1.0 / jnp.sqrt(cin)
        return jax.random.uniform(k, (cin, cout), jnp.float32, -s, s)

    def bias(k, cout, cin):
        s = 1.0 / jnp.sqrt(cin)
        return jax.random.uniform(k, (1, cout), jnp.float32, -s, s)

    # density decoder: f_enc -> hidden -> 1
    wd1 = lin(ks[0], f_enc, hidden)
    bd1 = bias(ks[1], hidden, f_enc)
    wd2 = lin(ks[2], hidden, 1)
    bd2 = bias(ks[3], 1, hidden)
    # radiance decoder: (pos + dir + f_enc) -> hidden -> hidden -> 3
    cin = pos_dim + dir_dim + f_enc
    wr1 = lin(ks[4], cin, hidden)
    br1 = bias(ks[5], hidden, cin)
    wr2 = lin(ks[6], hidden, hidden)
    br2 = bias(ks[7], hidden, hidden)
    wr3 = lin(ks[8], hidden, 3)
    br3 = bias(ks[9], 3, hidden)
    return (wd1, bd1, wd2, bd2, wr1, br1, wr2, br2, wr3, br3)


def pack_params(params):
    """Repack per-layer weights into the fused blocks the kernel expects."""
    wd1, bd1, wd2, bd2, wr1, br1, wr2, br2, wr3, br3 = [
        p.astype(jnp.float32) for p in params]
    H = _HID
    # stage 1: feat [x|v|h|1|0] -> [radiance hidden1 (64) | density hidden (64)]
    w1 = jnp.zeros((_FEAT_IN, 2 * H), jnp.float32)
    w1 = w1.at[0:14, 0:H].set(wr1)              # x, v, h -> radiance hidden 1
    w1 = w1.at[6:14, H:2 * H].set(wd1)          # h       -> density hidden
    w1 = w1.at[14, 0:H].set(br1[0])             # biases via the constant-1 lane
    w1 = w1.at[14, H:2 * H].set(bd1[0])
    # stage 2: z1 -> [sigma (lane 0) | zeros | radiance hidden2 (lanes 64:128)]
    w2 = jnp.zeros((2 * H, 2 * H), jnp.float32)
    w2 = w2.at[0:H, H:2 * H].set(wr2)
    w2 = w2.at[H:2 * H, 0:1].set(wd2)
    b2 = jnp.zeros((1, 2 * H), jnp.float32)
    b2 = b2.at[:, 0:1].set(bd2)
    b2 = b2.at[:, H:2 * H].set(br2)
    # stage 3: rgb head on lanes 64:128 -> packed lanes [_, r, g, b]
    w3 = jnp.zeros((2 * H, 4), jnp.float32).at[H:2 * H, 1:4].set(wr3)
    b3 = jnp.zeros((1, 4), jnp.float32).at[:, 1:4].set(br3)
    # bf16 for the MXU blocks; biases stay f32 (elementwise add, sigma bias exact).
    return (w1.astype(jnp.bfloat16), w2.astype(jnp.bfloat16), b2,
            w3.astype(jnp.bfloat16), b3)


def make_grids(key, resolutions=(4, 8, 16, 32), n_feat=2):
    keys = jax.random.split(key, len(resolutions))
    # LoTD-style small uniform init
    return [jax.random.uniform(k, (r, r, r, n_feat), jnp.float32, -1e-2, 1e-2)
            for k, r in zip(keys, resolutions)]


# ----------------------------------------------------------------------------
# Pure-JAX reference (unfused, f32) for a correctness check
# ----------------------------------------------------------------------------
def reference_forward(x, v, grids, params):
    h = lotd_encode(x, grids)
    wd1, bd1, wd2, bd2, wr1, br1, wr2, br2, wr3, br3 = params
    zd = jnp.maximum(h @ wd1 + bd1, 0.0)
    sigma = (zd @ wd2 + bd2)[:, 0]
    f = jnp.concatenate([x, v, h], axis=-1)
    zr = jnp.maximum(f @ wr1 + br1, 0.0)
    zr = jnp.maximum(zr @ wr2 + br2, 0.0)
    rgb = jax.nn.sigmoid(zr @ wr3 + br3)
    return sigma, rgb


if __name__ == "__main__":
    key = jax.random.PRNGKey(0)
    k_x, k_v, k_g, k_p = jax.random.split(key, 4)

    N = 3000                                       # deliberately not a tile multiple
    x = jax.random.uniform(k_x, (N, 3), jnp.float32, -1.0, 1.0)   # normalized coords
    v = jax.random.normal(k_v, (N, 3), jnp.float32)
    v = v / jnp.linalg.norm(v, axis=-1, keepdims=True)            # view directions

    grids = make_grids(k_g)                        # 4 levels x 2 feats -> F_enc = 8
    params = make_params(k_p, f_enc=8, hidden=64)
    packed = pack_params(params)

    out = lotd_nerf_forward(x, v, grids, packed, tile_n=2048)
    jax.block_until_ready(out["sigma"])
    jax.block_until_ready(out["rgb"])

    sigma_ref, rgb_ref = reference_forward(x, v, grids, params)

    assert out["sigma"].shape == (N,)
    assert out["rgb"].shape == (N, 3)
    assert bool(jnp.all(jnp.isfinite(out["sigma"])))
    assert bool(jnp.all((out["rgb"] >= 0.0) & (out["rgb"] <= 1.0)))
    # bf16 weights/activations vs f32 reference -> loose tolerances
    assert bool(jnp.allclose(out["sigma"], sigma_ref, atol=5e-2, rtol=5e-2))
    assert bool(jnp.allclose(out["rgb"], rgb_ref, atol=5e-2, rtol=5e-2))
    print("KERNEL_OK")
</pallas_src>

<mosaic_0001>
module attributes {stable_mosaic.version = 11 : i64} {
  func.func private @main(%arg0: i32) attributes {dimension_semantics = [#tpu.dimension_semantics<core_parallel>], iteration_bounds = array<i64: 2>, tpu.core_type = #tpu.core_type<sc_scalar_subcore>, window_params = []} {
    return
  }
}

module attributes {stable_mosaic.version = 11 : i64} {
  func.func private @main(%arg0: i32) attributes {dimension_semantics = [#tpu.dimension_semantics<core_parallel>], iteration_bounds = array<i64: 2>, tpu.core_type = #tpu.core_type<sc_scalar_subcore>, window_params = []} {
    return
  }
}

module attributes {stable_mosaic.version = 11 : i64} {
  func.func @nerf_decoder_kernel(%arg0: i32, %arg1: memref<1536x16xbf16, #tpu.memory_space<vmem>>, %arg2: memref<16x128xbf16, #tpu.memory_space<vmem>>, %arg3: memref<128x128xbf16, #tpu.memory_space<vmem>>, %arg4: memref<1x128xf32, #tpu.memory_space<vmem>>, %arg5: memref<128x4xbf16, #tpu.memory_space<vmem>>, %arg6: memref<1x4xf32, #tpu.memory_space<vmem>>, %arg7: memref<1536x4xf32, #tpu.memory_space<vmem>>) attributes {dimension_semantics = [#tpu.dimension_semantics<parallel>], iteration_bounds = array<i64: 2>, scalar_prefetch = 0 : i64, scratch_operands = 0 : i64, tpu.core_type = #tpu.core_type<tc>, window_params = [{transform_indices = @transform_0, window_bounds = array<i64: 1536, 16>}, {pipeline_mode = #tpu.pipeline_mode<synchronous>, transform_indices = @transform_1, window_bounds = array<i64: 16, 128>}, {pipeline_mode = #tpu.pipeline_mode<synchronous>, transform_indices = @transform_2, window_bounds = array<i64: 128, 128>}, {pipeline_mode = #tpu.pipeline_mode<synchronous>, transform_indices = @transform_3, window_bounds = array<i64: 1, 128>}, {pipeline_mode = #tpu.pipeline_mode<synchronous>, transform_indices = @transform_4, window_bounds = array<i64: 128, 4>}, {pipeline_mode = #tpu.pipeline_mode<synchronous>, transform_indices = @transform_5, window_bounds = array<i64: 1, 4>}, {transform_indices = @transform_6, window_bounds = array<i64: 1536, 4>}]} {
    %c0 = arith.constant 0 : index
    %c0_0 = arith.constant 0 : index
    %0 = vector.load %arg1[%c0, %c0_0] : memref<1536x16xbf16, #tpu.memory_space<vmem>>, vector<1536x16xbf16>
    %c0_1 = arith.constant 0 : index
    %c0_2 = arith.constant 0 : index
    %1 = vector.load %arg2[%c0_1, %c0_2] : memref<16x128xbf16, #tpu.memory_space<vmem>>, vector<16x128xbf16>
    %cst = arith.constant dense<0.000000e+00> : vector<1536x128xf32>
    %2 = tpu.matmul %0, %1, %cst {dimension_numbers = #tpu.dot_dimension_numbers<[1], [0], [0], [1], [0, 0, 1, 1], [], []>} : vector<1536x16xbf16>, vector<16x128xbf16>, vector<1536x128xf32> -> vector<1536x128xf32>
    %cst_3 = arith.constant 0.000000e+00 : f32
    %3 = vector.broadcast %cst_3 : f32 to vector<1536x128xf32>
    %4 = arith.maximumf %2, %3 : vector<1536x128xf32>
    %5 = arith.truncf %4 : vector<1536x128xf32> to vector<1536x128xbf16>
    %c0_4 = arith.constant 0 : index
    %c0_5 = arith.constant 0 : index
    %6 = vector.load %arg3[%c0_4, %c0_5] : memref<128x128xbf16, #tpu.memory_space<vmem>>, vector<128x128xbf16>
    %cst_6 = arith.constant dense<0.000000e+00> : vector<1536x128xf32>
    %7 = tpu.matmul %5, %6, %cst_6 {dimension_numbers = #tpu.dot_dimension_numbers<[1], [0], [0], [1], [0, 0, 1, 1], [], []>} : vector<1536x128xbf16>, vector<128x128xbf16>, vector<1536x128xf32> -> vector<1536x128xf32>
    %c0_7 = arith.constant 0 : index
    %c0_8 = arith.constant 0 : index
    %8 = vector.load %arg4[%c0_7, %c0_8] : memref<1x128xf32, #tpu.memory_space<vmem>>, vector<1x128xf32>
    %9 = vector.broadcast %8 : vector<1x128xf32> to vector<1536x128xf32>
    %10 = arith.addf %7, %9 : vector<1536x128xf32>
    %11 = tpu.iota {dimensions = array<i32: 1>} : vector<1536x128xi32>
    %c0_i32 = arith.constant 0 : i32
    %12 = vector.broadcast %c0_i32 : i32 to vector<1536x128xi32>
    %13 = arith.cmpi eq, %11, %12 : vector<1536x128xi32>
    %cst_9 = arith.constant 0.000000e+00 : f32
    %14 = vector.broadcast %cst_9 : f32 to vector<1536x128xf32>
    %15 = arith.maximumf %10, %14 : vector<1536x128xf32>
    %16 = arith.select %13, %10, %15 : vector<1536x128xi1>, vector<1536x128xf32>
    %17 = vector.extract_strided_slice %16 {offsets = [0, 0], sizes = [1536, 1], strides = [1, 1]} : vector<1536x128xf32> to vector<1536x1xf32>
    %18 = arith.truncf %16 : vector<1536x128xf32> to vector<1536x128xbf16>
    %c0_10 = arith.constant 0 : index
    %c0_11 = arith.constant 0 : index
    %19 = vector.load %arg5[%c0_10, %c0_11] : memref<128x4xbf16, #tpu.memory_space<vmem>>, vector<128x4xbf16>
    %cst_12 = arith.constant dense<0.000000e+00> : vector<1536x4xf32>
    %20 = tpu.matmul %18, %19, %cst_12 {dimension_numbers = #tpu.dot_dimension_numbers<[1], [0], [0], [1], [0, 0, 1, 1], [], []>} : vector<1536x128xbf16>, vector<128x4xbf16>, vector<1536x4xf32> -> vector<1536x4xf32>
    %c0_13 = arith.constant 0 : index
    %c0_14 = arith.constant 0 : index
    %21 = vector.load %arg6[%c0_13, %c0_14] : memref<1x4xf32, #tpu.memory_space<vmem>>, vector<1x4xf32>
    %22 = vector.broadcast %21 : vector<1x4xf32> to vector<1536x4xf32>
    %23 = arith.addf %20, %22 : vector<1536x4xf32>
    %24 = tpu.iota {dimensions = array<i32: 1>} : vector<1536x4xi32>
    %c0_i32_15 = arith.constant 0 : i32
    %25 = vector.broadcast %c0_i32_15 : i32 to vector<1536x4xi32>
    %26 = arith.cmpi eq, %24, %25 : vector<1536x4xi32>
    %27 = arith.negf %23 : vector<1536x4xf32>
    %28 = math.exp %27 : vector<1536x4xf32>
    %cst_16 = arith.constant 1.000000e+00 : f32
    %29 = vector.broadcast %cst_16 : f32 to vector<1536x4xf32>
    %30 = arith.addf %29, %28 : vector<1536x4xf32>
    %31 = arith.divf %29, %30 : vector<1536x4xf32>
    %32 = vector.shape_cast %17 : vector<1536x1xf32> to vector<1536x1xf32>
    %33 = vector.broadcast %32 : vector<1536x1xf32> to vector<1536x4xf32>
    %34 = arith.select %26, %33, %31 : vector<1536x4xi1>, vector<1536x4xf32>
    %c0_17 = arith.constant 0 : index
    %c0_18 = arith.constant 0 : index
    %35 = vector.load %arg7[%c0_17, %c0_18] : memref<1536x4xf32, #tpu.memory_space<vmem>>, vector<1536x4xf32>
    tpu.vector_store %arg7[%c0_17, %c0_18], %34 {strides = array<i32>} : memref<1536x4xf32, #tpu.memory_space<vmem>>, vector<1536x4xf32>,
    return
  }
  func.func @transform_0(%arg0: i32) -> (i32, i32) {
    %c0_i32 = arith.constant 0 : i32
    %c0_i32_0 = arith.constant 0 : i32
    return %arg0, %c0_i32 : i32, i32
  }
  func.func @transform_1(%arg0: i32) -> (i32, i32) {
    %c0_i32 = arith.constant 0 : i32
    %c0_i32_0 = arith.constant 0 : i32
    %c0_i32_1 = arith.constant 0 : i32
    return %c0_i32, %c0_i32_0 : i32, i32
  }
  func.func @transform_2(%arg0: i32) -> (i32, i32) {
    %c0_i32 = arith.constant 0 : i32
    %c0_i32_0 = arith.constant 0 : i32
    %c0_i32_1 = arith.constant 0 : i32
    return %c0_i32, %c0_i32_0 : i32, i32
  }
  func.func @transform_3(%arg0: i32) -> (i32, i32) {
    %c0_i32 = arith.constant 0 : i32
    %c0_i32_0 = arith.constant 0 : i32
    %c0_i32_1 = arith.constant 0 : i32
    return %c0_i32, %c0_i32_0 : i32, i32
  }
  func.func @transform_4(%arg0: i32) -> (i32, i32) {
    %c0_i32 = arith.constant 0 : i32
    %c0_i32_0 = arith.constant 0 : i32
    %c0_i32_1 = arith.constant 0 : i32
    return %c0_i32, %c0_i32_0 : i32, i32
  }
  func.func @transform_5(%arg0: i32) -> (i32, i32) {
    %c0_i32 = arith.constant 0 : i32
    %c0_i32_0 = arith.constant 0 : i32
    %c0_i32_1 = arith.constant 0 : i32
    return %c0_i32, %c0_i32_0 : i32, i32
  }
  func.func @transform_6(%arg0: i32) -> (i32, i32) {
    %c0_i32 = arith.constant 0 : i32
    %c0_i32_0 = arith.constant 0 : i32
    return %arg0, %c0_i32 : i32, i32
  }
}

</mosaic_0001>

<bundles_post_ra>
// kernel: lotd_nerf_forward.1
= control target key start
LH: loop header
LB: loop body
LE: loop exit
PB: predicated region body
PF: predicated region fallthrough
CT: control target
= control target key end

     0   :  { %s9366_s21 = smov 0   ;;  %s12737_s0 = inlined_call_operand.vmem [shape: bf16[3072,16], index: 0, kind: input, shape index: {}]   ;;  %s12738_s1 = inlined_call_operand.vmem [shape: bf16[16,128], index: 1, kind: input, shape index: {}]   ;;  %s12739_s2 = inlined_call_operand.vmem [shape: bf16[128,128], index: 2, kind: input, shape index: {}]   ;;  %s12740_s3 = inlined_call_operand.vmem [shape: f32[1,128], index: 3, kind: input, shape index: {}]   ;;  %s12741_s4 = inlined_call_operand.vmem [shape: bf16[128,4], index: 4, kind: input, shape index: {}]   ;;  %s12742_s5 = inlined_call_operand.vmem [shape: f32[1,4], index: 5, kind: input, shape index: {}]   ;;  %s12743_s6 = inlined_call_operand.vmem [shape: f32[3072,4], index: 6, kind: output, shape index: {}]  }
   0x1 LB: > { %s7094_s22 = sadd.s32 4294967295, %s9328_s21   ;;  %p7098_p0 = scmp.ge.s32.totalorder %s9328_s21, 1  ;;  %s9328_s21 = sphi %s9366_s21, %s16_s21  }
   0x2   : > { %p213_p1 = scmp.lt.s32.totalorder %s9328_s21, 3 }
   0x4   : > { %p214_p2 = pnand %p7098_p0, %p213_p1 }
   0x6   : > { %217 = sbr.rel (%p214_p2) target bundleno = 1132 (0x46c), region = 44 }
   0xd   : > { %v8434_v0 = vld [vmem:[%s12738_s1] sm:$0xff]   ;;  %s243_s25 = smul.u32 192, %s7094_s22  ;;  %vm936_vm0 = vcmask 130048   ;;  %v8458_v7 = vld [vmem:[%s12739_s2 + $0x8] sm:$0xff]   ;;  %v8471_v10 = vld [vmem:[%s12739_s2 + $0x10] sm:$0xff]   ;;  %vm6845_vm2 = vcmask 31744  }
   0xe   : > { %v8445_v1 = vld [vmem:[%s12739_s2] sm:$0xff]   ;;  %7811 = vmatprep.subr.bf16.mxu0 %v8434_v0  ;;  %8421 = vmatprep.subr.bf16.mxu1 %v8434_v0  ;;  %v8484_v16 = vld [vmem:[%s12739_s2 + $0x18] sm:$0xff]   ;;  %v8510_v44 = vld [vmem:[%s12739_s2 + $0x28] sm:$0xff]  }
   0xf   : > { %p244_p3 = scmp.lt.s32.totalorder %s243_s25, 383  ;;  %7812 = vmatpush3.bf16.msra.mxu0 %v8434_v0  ;;  %8422 = vmatpush3.bf16.msra.mxu1 %v8434_v0  ;;  %v8497_v17 = vld [vmem:[%s12739_s2 + $0x20] sm:$0xff]   ;;  %v8523_v51 = vld [vmem:[%s12739_s2 + $0x30] sm:$0xff]   ;;  %v8534_v57 = vld [vmem:[%s12739_s2 + $0x38] sm:$0xff]  }
  0x10   : > { %8005 = vmatprep.subr.bf16.mxu1 %v8445_v1 }
  0x11   : > { %s12872_s25 = smov (!%p244_p3, %s243_s25), 383 }
  0x12   : > { %s7099_s28 = sshll.u32 %s12872_s25, 2  ;;  %s7100_s23 = sshll.u32 %s12872_s25, 3 }
  0x13   : > { %s9386_s7 = scalar_lea.vmem %s12737_s0, %s7099_s28  ;;  %s10312_s26 = scalar_lea.vmem %s12743_s6, %s7100_s23 }
  0x14   : > { %v8435_v2 = vld [vmem:[%s9386_s7] sm:$0xff]   ;;  %v8436_v3 = vld [vmem:[%s9386_s7 + $0x8] sm:$0xff]   ;;  %v8437_v4 = vld [vmem:[%s9386_s7 + $0x10] sm:$0xff]  }
  0x15   : > { %7813 = vmatprep.mubr.msk.bf16.mxu0 %vm936_vm0, %v8435_v2  ;;  %v8438_v5 = vld [vmem:[%s9386_s7 + $0x18] sm:$0xff]   ;;  %v8439_v6 = vld [vmem:[%s9386_s7 + $0x20] sm:$0xff]   ;;  %v8444_v9 = vld [vmem:[%s9386_s7 + $0x188] sm:$0xff]  }
  0x16   : > { %7814 = vmatmul.mubr.msk.bf16.vlgmr.msra.gmra.mrb[0].mxu0 %vm936_vm0, %v8436_v3  ;;  %v8443_v8 = vld [vmem:[%s9386_s7 + $0x180] sm:$0xff]   ;;  %v8448_v11 = vld [vmem:[%s9386_s7 + $0x190] sm:$0xff]   ;;  %v8440_v12 = vld [vmem:[%s9386_s7 + $0x28] sm:$0xff]  }
  0x17   : > { %7817 = vmatprep.mubr.msk.bf16.mxu0 %vm936_vm0, %v8437_v4  ;;  %7909 = vmatprep.mubr.msk.bf16.mxu1 %vm936_vm0, %v8443_v8  ;;  %v8441_v13 = vld [vmem:[%s9386_s7 + $0x30] sm:$0xff]   ;;  %v8449_v14 = vld [vmem:[%s9386_s7 + $0x198] sm:$0xff]   ;;  %v8452_v15 = vld [vmem:[%s9386_s7 + $0x1a0] sm:$0xff]  }
  0x18   : > { %7910 = vmatmul.mubr.msk.bf16.vlgmr.msra.gmra.mrb[0].mxu1 %vm936_vm0, %v8444_v9  ;;  %v8442_v18 = vld [vmem:[%s9386_s7 + $0x38] sm:$0xff]   ;;  %v8446_v19 = vld [vmem:[%s9386_s7 + $0x40] sm:$0xff]   ;;  %v8453_v20 = vld [vmem:[%s9386_s7 + $0x1a8] sm:$0xff]  }
  0x19   : > { %8006 = vmatpush3.bf16.msra.mxu1 %v8445_v1  ;;  %7913 = vmatprep.mubr.msk.bf16.mxu1 %vm936_vm0, %v8448_v11  ;;  %v8456_v21 = vld [vmem:[%s9386_s7 + $0x1b0] sm:$0xff]   ;;  %v8447_v22 = vld [vmem:[%s9386_s7 + $0x48] sm:$0xff]   ;;  %v8457_v24 = vld [vmem:[%s9386_s7 + $0x1b8] sm:$0xff]  }
  0x1a   : > { %8007 = vmatprep.subr.bf16.mxu1 %v8458_v7  ;;  %v8450_v23 = vld [vmem:[%s9386_s7 + $0x50] sm:$0xff]   ;;  %v8461_v25 = vld [vmem:[%s9386_s7 + $0x1c0] sm:$0xff]   ;;  %v8451_v26 = vld [vmem:[%s9386_s7 + $0x58] sm:$0xff]  }
  0x1b   : > { %v8454_v27 = vld [vmem:[%s9386_s7 + $0x60] sm:$0xff]   ;;  %v8462_v28 = vld [vmem:[%s9386_s7 + $0x1c8] sm:$0xff]   ;;  %v8465_v29 = vld [vmem:[%s9386_s7 + $0x1d0] sm:$0xff]  }
  0x1c   : > { %v8455_v30 = vld [vmem:[%s9386_s7 + $0x68] sm:$0xff]   ;;  %v8459_v31 = vld [vmem:[%s9386_s7 + $0x70] sm:$0xff]   ;;  %v8466_v32 = vld [vmem:[%s9386_s7 + $0x1d8] sm:$0xff]  }
  0x1d   : > { %8008 = vmatpush3.bf16.msra.mxu1 %v8458_v7  ;;  %v8469_v33 = vld [vmem:[%s9386_s7 + $0x1e0] sm:$0xff]   ;;  %v8460_v34 = vld [vmem:[%s9386_s7 + $0x78] sm:$0xff]   ;;  %v8470_v36 = vld [vmem:[%s9386_s7 + $0x1e8] sm:$0xff]  }
  0x1e   : > { %7818 = vmatmul.mubr.msk.bf16.gmra.mrb[4].mxu0 %vm936_vm0, %v8438_v5  ;;  %8009 = vmatprep.subr.bf16.mxu1 %v8471_v10  ;;  %v8463_v35 = vld [vmem:[%s9386_s7 + $0x80] sm:$0xff]   ;;  %v8474_v37 = vld [vmem:[%s9386_s7 + $0x1f0] sm:$0xff]   ;;  %v8464_v38 = vld [vmem:[%s9386_s7 + $0x88] sm:$0xff]  }
  0x1f   : > { %7821 = vmatprep.mubr.msk.bf16.mxu0 %vm936_vm0, %v8439_v6  ;;  %v8467_v39 = vld [vmem:[%s9386_s7 + $0x90] sm:$0xff]   ;;  %v8475_v40 = vld [vmem:[%s9386_s7 + $0x1f8] sm:$0xff]   ;;  %v8478_v41 = vld [vmem:[%s9386_s7 + $0x200] sm:$0xff]  }
  0x20   : > { %7914 = vmatmul.mubr.msk.bf16.gmra.mrb[4].mxu1 %vm936_vm0, %v8449_v14  ;;  %v8468_v42 = vld [vmem:[%s9386_s7 + $0x98] sm:$0xff]   ;;  %v8472_v43 = vld [vmem:[%s9386_s7 + $0xa0] sm:$0xff]   ;;  %v8479_v45 = vld [vmem:[%s9386_s7 + $0x208] sm:$0xff]  }
  0x21   : > { %7917 = vmatprep.mubr.msk.bf16.mxu1 %vm936_vm0, %v8452_v15  ;;  %8010 = vmatpush3.bf16.msra.mxu1 %v8471_v10  ;;  %v8482_v46 = vld [vmem:[%s9386_s7 + $0x210] sm:$0xff]   ;;  %v8473_v47 = vld [vmem:[%s9386_s7 + $0xa8] sm:$0xff]   ;;  %v8483_v49 = vld [vmem:[%s9386_s7 + $0x218] sm:$0xff]  }
  0x22   : > { %8011 = vmatprep.subr.bf16.mxu1 %v8484_v16  ;;  %v8476_v48 = vld [vmem:[%s9386_s7 + $0xb0] sm:$0xff]   ;;  %v8487_v50 = vld [vmem:[%s9386_s7 + $0x220] sm:$0xff]   ;;  %v8477_v52 = vld [vmem:[%s9386_s7 + $0xb8] sm:$0xff]  }
  0x23   : > { %v8480_v53 = vld [vmem:[%s9386_s7 + $0xc0] sm:$0xff]   ;;  %v8488_v54 = vld [vmem:[%s9386_s7 + $0x228] sm:$0xff]   ;;  %v8491_v55 = vld [vmem:[%s9386_s7 + $0x230] sm:$0xff]  }
  0x24   : > { %v8481_v56 = vld [vmem:[%s9386_s7 + $0xc8] sm:$0xff]   ;;  %v8485_v58 = vld [vmem:[%s9386_s7 + $0xd0] sm:$0xff]   ;;  %v8492_v59 = vld [vmem:[%s9386_s7 + $0x238] sm:$0xff]  }
  0x25   : > { %8012 = vmatpush3.bf16.msra.mxu1 %v8484_v16  ;;  %v8495_v60 = vld [vmem:[%s9386_s7 + $0x240] sm:$0xff]   ;;  %v8486_v61 = vld [vmem:[%s9386_s7 + $0xd8] sm:$0xff]   ;;  %v8496_v62 = vld [vmem:[%s9386_s7 + $0x248] sm:$0xff]  }
  0x26   : > { %7822 = vmatmul.mubr.msk.bf16.gmra.mrb[8].mxu0 %vm936_vm0, %v8440_v12  ;;  %8013 = vmatprep.subr.bf16.mxu1 %v8497_v17  ;;  %v8489_v63 = vld [vmem:[%s9386_s7 + $0xe0] sm:$0xff]   ;;  %v8500_v0 = vld [vmem:[%s9386_s7 + $0x250] sm:$0xff]   ;;  %v8490_v1 = vld [vmem:[%s9386_s7 + $0xe8] sm:$0xff]  }
  0x27   : > { %7825 = vmatprep.mubr.msk.bf16.mxu0 %vm936_vm0, %v8441_v13  ;;  %v8501_v2 = vld [vmem:[%s9386_s7 + $0x258] sm:$0xff]   ;;  %v8493_v3 = vld [vmem:[%s9386_s7 + $0xf0] sm:$0xff]   ;;  %v8504_v4 = vld [vmem:[%s9386_s7 + $0x260] sm:$0xff]  }
  0x28   : > { %7918 = vmatmul.mubr.msk.bf16.gmra.mrb[8].mxu1 %vm936_vm0, %v8453_v20  ;;  %v8494_v5 = vld [vmem:[%s9386_s7 + $0xf8] sm:$0xff]   ;;  %v8505_v6 = vld [vmem:[%s9386_s7 + $0x268] sm:$0xff]   ;;  %v8498_v7 = vld [vmem:[%s9386_s7 + $0x100] sm:$0xff]  }
  0x29   : > { %7921 = vmatprep.mubr.msk.bf16.mxu1 %vm936_vm0, %v8456_v21  ;;  %8014 = vmatpush3.bf16.msra.mxu1 %v8497_v17  ;;  %v8508_v8 = vld [vmem:[%s9386_s7 + $0x270] sm:$0xff]   ;;  %v8539_v9 = vld [vmem:[%s12741_s4] sm:$0xff]   ;;  %v8499_v10 = vld [vmem:[%s9386_s7 + $0x108] sm:$0xff]  }
  0x2a   : > { %8015 = vmatprep.subr.bf16.mxu1 %v8510_v44  ;;  %8213 = vmatprep.subr.bf16.mxu0 %v8539_v9  ;;  %v8509_v11 = vld [vmem:[%s9386_s7 + $0x278] sm:$0xff]   ;;  %v8502_v12 = vld [vmem:[%s9386_s7 + $0x110] sm:$0xff]   ;;  %v8513_v13 = vld [vmem:[%s9386_s7 + $0x280] sm:$0xff]  }
  0x2b   : > { %8214 = vmatpush3.bf16.msra.mxu0 %v8539_v9  ;;  %v8503_v14 = vld [vmem:[%s9386_s7 + $0x118] sm:$0xff]   ;;  %v8514_v15 = vld [vmem:[%s9386_s7 + $0x288] sm:$0xff]   ;;  %v8506_v16 = vld [vmem:[%s9386_s7 + $0x120] sm:$0xff]  }
  0x2c   : > { %v8517_v17 = vld [vmem:[%s9386_s7 + $0x290] sm:$0xff]   ;;  %v8521_v21 = vld [vmem:[%s9386_s7 + $0x2a0] sm:$0xff]  }
  0x2d   : > { %8016 = vmatpush3.bf16.msra.mxu1 %v8510_v44  ;;  %v8511_v20 = vld [vmem:[%s9386_s7 + $0x130] sm:$0xff]   ;;  %v8542_v44 = vld [vmem:[%s12741_s4 + $0x18] sm:$0xff]  }
  0x2e   : > { %7826 = vmatmul.mubr.msk.bf16.gmra.mrb[12].mxu0 %vm936_vm0, %v8442_v18  ;;  %8017 = vmatprep.subr.bf16.mxu1 %v8523_v51  ;;  %v8507_v18 = vld [vmem:[%s9386_s7 + $0x128] sm:$0xff]  }
  0x2f   : > { %7829 = vmatprep.mubr.msk.bf16.mxu0 %vm936_vm0, %v8446_v19  ;;  %v8518_v19 = vld [vmem:[%s9386_s7 + $0x298] sm:$0xff]  }
  0x30   : > { %7922 = vmatmul.mubr.msk.bf16.gmra.mrb[12].mxu1 %vm936_vm0, %v8457_v24  ;;  %v8522_v24 = vld [vmem:[%s9386_s7 + $0x2a8] sm:$0xff]  }
  0x31   : > { %7925 = vmatprep.mubr.msk.bf16.mxu1 %vm936_vm0, %v8461_v25  ;;  %8018 = vmatpush3.bf16.msra.mxu1 %v8523_v51  ;;  %v8515_v25 = vld [vmem:[%s9386_s7 + $0x140] sm:$0xff]  }
  0x32   : > { %8019 = vmatprep.subr.bf16.mxu1 %v8534_v57 }
  0x35   : > { %8020 = vmatpush3.bf16.msra.mxu1 %v8534_v57 }
  0x36   : > { %7830 = vmatmul.mubr.msk.bf16.gmra.mrb[16].mxu0 %vm936_vm0, %v8447_v22  ;;  %v8540_v22 = vld [vmem:[%s12741_s4 + $0x8] sm:$0xff]  }
  0x37   : > { %7833 = vmatprep.mubr.msk.bf16.mxu0 %vm936_vm0, %v8450_v23  ;;  %8215 = vmatprep.subr.bf16.mxu0 %v8540_v22  ;;  %v8512_v23 = vld [vmem:[%s9386_s7 + $0x138] sm:$0xff]  }
  0x38   : > { %7926 = vmatmul.mubr.msk.bf16.gmra.mrb[16].mxu1 %vm936_vm0, %v8462_v28  ;;  %8216 = vmatpush3.bf16.msra.mxu0 %v8540_v22  ;;  %v8527_v28 = vld [vmem:[%s9386_s7 + $0x2b8] sm:$0xff]  }
  0x39   : > { %7929 = vmatprep.mubr.msk.bf16.mxu1 %vm936_vm0, %v8465_v29  ;;  %v8519_v29 = vld [vmem:[%s9386_s7 + $0x150] sm:$0xff]  }
  0x3e   : > { %7834 = vmatmul.mubr.msk.bf16.gmra.mrb[20].mxu0 %vm936_vm0, %v8451_v26  ;;  %v8526_v26 = vld [vmem:[%s9386_s7 + $0x2b0] sm:$0xff]  }
  0x3f   : > { %7837 = vmatprep.mubr.msk.bf16.mxu0 %vm936_vm0, %v8454_v27  ;;  %v8516_v27 = vld [vmem:[%s9386_s7 + $0x148] sm:$0xff]  }
  0x40   : > { %7930 = vmatmul.mubr.msk.bf16.gmra.mrb[20].mxu1 %vm936_vm0, %v8466_v32  ;;  %v8531_v32 = vld [vmem:[%s9386_s7 + $0x2c8] sm:$0xff]  }
  0x41   : > { %7933 = vmatprep.mubr.msk.bf16.mxu1 %vm936_vm0, %v8469_v33  ;;  %v8524_v33 = vld [vmem:[%s9386_s7 + $0x160] sm:$0xff]  }
  0x46   : > { %7838 = vmatmul.mubr.msk.bf16.gmra.mrb[24].mxu0 %vm936_vm0, %v8455_v30  ;;  %v8530_v30 = vld [vmem:[%s9386_s7 + $0x2c0] sm:$0xff]  }
  0x47   : > { %7841 = vmatprep.mubr.msk.bf16.mxu0 %vm936_vm0, %v8459_v31  ;;  %v8520_v31 = vld [vmem:[%s9386_s7 + $0x158] sm:$0xff]  }
  0x48   : > { %7934 = vmatmul.mubr.msk.bf16.gmra.mrb[24].mxu1 %vm936_vm0, %v8470_v36  ;;  %v8525_v36 = vld [vmem:[%s9386_s7 + $0x168] sm:$0xff]  }
  0x49   : > { %7937 = vmatprep.mubr.msk.bf16.mxu1 %vm936_vm0, %v8474_v37  ;;  %v8533_v37 = vld [vmem:[%s9386_s7 + $0x2d8] sm:$0xff]  }
  0x4e   : > { %7842 = vmatmul.mubr.msk.bf16.gmra.mrb[28].mxu0 %vm936_vm0, %v8460_v34  ;;  %v8532_v34 = vld [vmem:[%s9386_s7 + $0x2d0] sm:$0xff]  }
  0x4f   : > { %7845 = vmatprep.mubr.msk.bf16.mxu0 %vm936_vm0, %v8463_v35  ;;  %v8541_v35 = vld [vmem:[%s12741_s4 + $0x10] sm:$0xff]  }
  0x50   : > { %7938 = vmatmul.mubr.msk.bf16.gmra.mrb[28].mxu1 %vm936_vm0, %v8475_v40  ;;  %8217 = vmatprep.subr.bf16.mxu0 %v8541_v35  ;;  %v8529_v40 = vld [vmem:[%s9386_s7 + $0x178] sm:$0xff]  }
  0x51   : > { %7941 = vmatprep.mubr.msk.bf16.mxu1 %vm936_vm0, %v8478_v41  ;;  %8218 = vmatpush3.bf16.msra.mxu0 %v8541_v35  ;;  %v8536_v41 = vld [vmem:[%s9386_s7 + $0x2e8] sm:$0xff]  }
  0x52   : > { %8219 = vmatprep.subr.bf16.mxu0 %v8542_v44 }
  0x55   : > { %8220 = vmatpush3.bf16.msra.mxu0 %v8542_v44 }
  0x56   : > { %7846 = vmatmul.mubr.msk.bf16.gmra.mrb[32].mxu0 %vm936_vm0, %v8464_v38  ;;  %v8528_v38 = vld [vmem:[%s9386_s7 + $0x170] sm:$0xff]  }
  0x57   : > { %7849 = vmatprep.mubr.msk.bf16.mxu0 %vm936_vm0, %v8467_v39  ;;  %v8535_v39 = vld [vmem:[%s9386_s7 + $0x2e0] sm:$0xff]  }
  0x58   : > { %7942 = vmatmul.mubr.msk.bf16.gmra.mrb[32].mxu1 %vm936_vm0, %v8479_v45 }
  0x59   : > { %7945 = vmatprep.mubr.msk.bf16.mxu1 %vm936_vm0, %v8482_v46 }
  0x5e   : > { %7850 = vmatmul.mubr.msk.bf16.gmra.mrb[36].mxu0 %vm936_vm0, %v8468_v42  ;;  %v8537_v42 = vld [vmem:[%s9386_s7 + $0x2f0] sm:$0xff]  }
  0x5f   : > { %7853 = vmatprep.mubr.msk.bf16.mxu0 %vm936_vm0, %v8472_v43  ;;  %v8538_v43 = vld [vmem:[%s9386_s7 + $0x2f8] sm:$0xff]  }
  0x60   : > { %7946 = vmatmul.mubr.msk.bf16.gmra.mrb[36].mxu1 %vm936_vm0, %v8483_v49 }
  0x61   : > { %7949 = vmatprep.mubr.msk.bf16.mxu1 %vm936_vm0, %v8487_v50 }
  0x66   : > { %7854 = vmatmul.mubr.msk.bf16.gmra.mrb[40].mxu0 %vm936_vm0, %v8473_v47 }
  0x67   : > { %7857 = vmatprep.mubr.msk.bf16.mxu0 %vm936_vm0, %v8476_v48 }
  0x68   : > { %7950 = vmatmul.mubr.msk.bf16.gmra.mrb[40].mxu1 %vm936_vm0, %v8488_v54 }
  0x69   : > { %7953 = vmatprep.mubr.msk.bf16.mxu1 %vm936_vm0, %v8491_v55  ;;  %v8543_v55 = vld [vmem:[%s12741_s4 + $0x20] sm:$0xff]  }
  0x6a   : > { %8221 = vmatprep.subr.bf16.mxu0 %v8543_v55 }
  0x6b   : > { %8222 = vmatpush3.bf16.msra.mxu0 %v8543_v55 }
  0x6e   : > { %7858 = vmatmul.mubr.msk.bf16.gmra.mrb[44].mxu0 %vm936_vm0, %v8477_v52 }
  0x6f   : > { %7861 = vmatprep.mubr.msk.bf16.mxu0 %vm936_vm0, %v8480_v53 }
  0x70   : > { %7954 = vmatmul.mubr.msk.bf16.gmra.mrb[44].mxu1 %vm936_vm0, %v8492_v59 }
  0x71   : > { %7957 = vmatprep.mubr.msk.bf16.mxu1 %vm936_vm0, %v8495_v60 }
  0x76   : > { %7862 = vmatmul.mubr.msk.bf16.gmra.mrb[48].mxu0 %vm936_vm0, %v8481_v56 }
  0x77   : > { %7865 = vmatprep.mubr.msk.bf16.mxu0 %vm936_vm0, %v8485_v58 }
  0x78   : > { %7958 = vmatmul.mubr.msk.bf16.gmra.mrb[48].mxu1 %vm936_vm0, %v8496_v62 }
  0x79   : > { %7961 = vmatprep.mubr.msk.bf16.mxu1 %vm936_vm0, %v8500_v0 }
  0x7e   : > { %7866 = vmatmul.mubr.msk.bf16.gmra.mrb[52].mxu0 %vm936_vm0, %v8486_v61 }
  0x7f   : > { %7869 = vmatprep.mubr.msk.bf16.mxu0 %vm936_vm0, %v8489_v63 }
  0x80   : > { %7962 = vmatmul.mubr.msk.bf16.gmra.mrb[52].mxu1 %vm936_vm0, %v8501_v2 }
  0x81   : > { %7965 = vmatprep.mubr.msk.bf16.mxu1 %vm936_vm0, %v8504_v4 }
  0x86   : > { %7870 = vmatmul.mubr.msk.bf16.gmra.mrb[56].mxu0 %vm936_vm0, %v8490_v1 }
  0x87   : > { %7873 = vmatprep.mubr.msk.bf16.mxu0 %vm936_vm0, %v8493_v3 }
  0x88   : > { %7966 = vmatmul.mubr.msk.bf16.gmra.mrb[56].mxu1 %vm936_vm0, %v8505_v6 }
  0x89   : > { %7969 = vmatprep.mubr.msk.bf16.mxu1 %vm936_vm0, %v8508_v8 }
  0x8e   : > { %7874 = vmatmul.mubr.msk.bf16.gmra.mrb[60].mxu0 %vm936_vm0, %v8494_v5 }
  0x8f   : > { %7877 = vmatprep.mubr.msk.bf16.mxu0 %vm936_vm0, %v8498_v7 }
  0x90   : > { %7970 = vmatmul.mubr.msk.bf16.gmra.mrb[60].mxu1 %vm936_vm0, %v8509_v11 }
  0x91   : > { %7973 = vmatprep.mubr.msk.bf16.mxu1 %vm936_vm0, %v8513_v13 }
  0x96   : > { %7878 = vmatmul.mubr.msk.bf16.gmra.mrb[64].mxu0 %vm936_vm0, %v8499_v10 }
  0x97   : > { %7881 = vmatprep.mubr.msk.bf16.mxu0 %vm936_vm0, %v8502_v12 }
  0x98   : > { %7974 = vmatmul.mubr.msk.bf16.gmra.mrb[64].mxu1 %vm936_vm0, %v8514_v15 }
  0x99   : > { %7977 = vmatprep.mubr.msk.bf16.mxu1 %vm936_vm0, %v8517_v17 }
  0x9e   : > { %7882 = vmatmul.mubr.msk.bf16.gmra.mrb[68].mxu0 %vm936_vm0, %v8503_v14 }
  0x9f   : > { %7885 = vmatprep.mubr.msk.bf16.mxu0 %vm936_vm0, %v8506_v16 }
  0xa0   : > { %7978 = vmatmul.mubr.msk.bf16.gmra.mrb[68].mxu1 %vm936_vm0, %v8518_v19 }
  0xa1   : > { %7981 = vmatprep.mubr.msk.bf16.mxu1 %vm936_vm0, %v8521_v21 }
  0xa6   : > { %7886 = vmatmul.mubr.msk.bf16.gmra.mrb[72].mxu0 %vm936_vm0, %v8507_v18 }
  0xa7   : > { %7889 = vmatprep.mubr.msk.bf16.mxu0 %vm936_vm0, %v8511_v20 }
  0xa8   : > { %7982 = vmatmul.mubr.msk.bf16.gmra.mrb[72].mxu1 %vm936_vm0, %v8522_v24 }
  0xa9   : > { %7985 = vmatprep.mubr.msk.bf16.mxu1 %vm936_vm0, %v8526_v26 }
  0xae   : > { %7890 = vmatmul.mubr.msk.bf16.gmra.mrb[76].mxu0 %vm936_vm0, %v8512_v23 }
  0xaf   : > { %7893 = vmatprep.mubr.msk.bf16.mxu0 %vm936_vm0, %v8515_v25 }
  0xb0   : > { %7986 = vmatmul.mubr.msk.bf16.gmra.mrb[76].mxu1 %vm936_vm0, %v8527_v28 }
  0xb1   : > { %7989 = vmatprep.mubr.msk.bf16.mxu1 %vm936_vm0, %v8530_v30 }
  0xb6   : > { %7894 = vmatmul.mubr.msk.bf16.gmra.mrb[80].mxu0 %vm936_vm0, %v8516_v27 }
  0xb7   : > { %7897 = vmatprep.mubr.msk.bf16.mxu0 %vm936_vm0, %v8519_v29 }
  0xb8   : > { %7990 = vmatmul.mubr.msk.bf16.gmra.mrb[80].mxu1 %vm936_vm0, %v8531_v32 }
  0xb9   : > { %7993 = vmatprep.mubr.msk.bf16.mxu1 %vm936_vm0, %v8532_v34 }
  0xbe   : > { %7898 = vmatmul.mubr.msk.bf16.gmra.mrb[84].mxu0 %vm936_vm0, %v8520_v31 }
  0xbf   : > { %7901 = vmatprep.mubr.msk.bf16.mxu0 %vm936_vm0, %v8524_v33 }
  0xc0   : > { %7994 = vmatmul.mubr.msk.bf16.gmra.mrb[84].mxu1 %vm936_vm0, %v8533_v37 }
  0xc1   : > { %7997 = vmatprep.mubr.msk.bf16.mxu1 %vm936_vm0, %v8535_v39 }
  0xc6   : > { %7902 = vmatmul.mubr.msk.bf16.gmra.mrb[88].mxu0 %vm936_vm0, %v8525_v36 }
  0xc7   : > { %7905 = vmatprep.mubr.msk.bf16.mxu0 %vm936_vm0, %v8528_v38 }
  0xc8   : > { %7998 = vmatmul.mubr.msk.bf16.gmra.mrb[88].mxu1 %vm936_vm0, %v8536_v41 }
  0xc9   : > { %8001 = vmatprep.mubr.msk.bf16.mxu1 %vm936_vm0, %v8537_v42 }
  0xce   : > { %7906 = vmatmul.mubr.msk.bf16.gmra.mrb[92].mxu0 %vm936_vm0, %v8529_v40 }
  0xd0   : > { %8002 = vmatmul.mubr.msk.bf16.gmra.mrb[92].mxu1 %vm936_vm0, %v8538_v43 }
  0xe9   : > { %v7815_v45 = vpop.f32.mrb[0].mxu0 }
  0xea   : > { %v1259_v46 = vpop.f32.mrb[1].mxu0  ;;  %v2028_v48 = vmax.f32 %v7815_v45, 0.0 }
  0xeb   : > { %v7816_v47 = vpop.f32.mrb[2].mxu0  ;;  %v2026_v51 = vmax.f32 %v1259_v46, 0.0  ;;  %v7911_v57 = vpop.f32.mrb[0].mxu1 }
  0xec   : > { %v2029_v49 = vmax.f32 %v7816_v47, 0.0  ;;  %v1262_v50 = vpop.f32.mrb[3].mxu0  ;;  %v2124_v59 = vmax.f32 %v7911_v57, 0.0  ;;  %v1643_v60 = vpop.f32.mrb[1].mxu1 }
  0xed   : > { %v2027_v52 = vmax.f32 %v1262_v50, 0.0  ;;  %v2122_v62 = vmax.f32 %v1643_v60, 0.0  ;;  %v7912_v63 = vpop.f32.mrb[2].mxu1 }
  0xee   : > { %v2219_v53 = vpack.c.bf16 %v2029_v49, %v2028_v48  ;;  %v2125_v3 = vmax.f32 %v7912_v63, 0.0  ;;  %v1646_v4 = vpop.f32.mrb[3].mxu1 }
  0xef   : > { %v2218_v54 = vpack.c.bf16 %v2027_v52, %v2026_v51  ;;  %v2123_v7 = vmax.f32 %v1646_v4, 0.0  ;;  %v8544_v51 = vld [vmem:[%s12741_s4 + $0x28] sm:$0xff]  }
  0xf0   : > { %v9616_v9 = vpack.c.bf16 %v2125_v3, %v2124_v59  ;;  %8223 = vmatprep.subr.bf16.mxu0 %v8544_v51 }
  0xf1   : > { %v7819_v56 = vpop.f32.mrb[4].mxu0  ;;  %8021 = vmatprep.mubr.bf16.mxu1 %v2218_v54  ;;  %v9618_v11 = vpack.c.bf16 %v2123_v7, %v2122_v62  ;;  %8224 = vmatpush3.bf16.msra.mxu0 %v8544_v51 }
  0xf2   : > { %v1275_v58 = vpop.f32.mrb[5].mxu0  ;;  %8022 = vmatmul.mubr.bf16.vlgmr.msra.gmra.mrb[96].mxu1 %v2219_v53  ;;  %v2032_v0 = vmax.f32 %v7819_v56, 0.0 }
  0xf3   : > { %v7820_v61 = vpop.f32.mrb[6].mxu0  ;;  %v2030_v5 = vmax.f32 %v1275_v58, 0.0  ;;  %v7915_v13 = vpop.f32.mrb[4].mxu1 }
  0xf4   : > { %v2033_v1 = vmax.f32 %v7820_v61, 0.0  ;;  %v1278_v2 = vpop.f32.mrb[7].mxu0  ;;  %v2128_v15 = vmax.f32 %v7915_v13, 0.0  ;;  %v1659_v16 = vpop.f32.mrb[5].mxu1 }
  0xf5   : > { %v2031_v6 = vmax.f32 %v1278_v2, 0.0  ;;  %v2126_v18 = vmax.f32 %v1659_v16, 0.0  ;;  %v7916_v19 = vpop.f32.mrb[6].mxu1 }
  0xf6   : > { %v2221_v8 = vpack.c.bf16 %v2033_v1, %v2032_v0  ;;  %v2129_v23 = vmax.f32 %v7916_v19, 0.0  ;;  %v1662_v24 = vpop.f32.mrb[7].mxu1 }
  0xf7   : > { %v2220_v10 = vpack.c.bf16 %v2031_v6, %v2030_v5  ;;  %v2127_v27 = vmax.f32 %v1662_v24, 0.0 }
  0xf8   : > { %v9620_v29 = vpack.c.bf16 %v2129_v23, %v2128_v15 }
  0xf9   : > { %v7823_v12 = vpop.f32.mrb[8].mxu0  ;;  %8025 = vmatprep.mubr.bf16.mxu1 %v2220_v10  ;;  %v9622_v31 = vpack.c.bf16 %v2127_v27, %v2126_v18 }
  0xfa   : > { %v1291_v14 = vpop.f32.mrb[9].mxu0  ;;  %8026 = vmatmul.mubr.bf16.gmra.mrb[100].mxu1 %v2221_v8  ;;  %v2036_v20 = vmax.f32 %v7823_v12, 0.0 }
  0xfb   : > { %v7824_v17 = vpop.f32.mrb[10].mxu0  ;;  %v2034_v25 = vmax.f32 %v1291_v14, 0.0  ;;  %v7919_v33 = vpop.f32.mrb[8].mxu1 }
  0xfc   : > { %v2037_v21 = vmax.f32 %v7824_v17, 0.0  ;;  %v1294_v22 = vpop.f32.mrb[11].mxu0  ;;  %v2132_v35 = vmax.f32 %v7919_v33, 0.0  ;;  %v1675_v36 = vpop.f32.mrb[9].mxu1 }
  0xfd   : > { %v2035_v26 = vmax.f32 %v1294_v22, 0.0  ;;  %v2130_v38 = vmax.f32 %v1675_v36, 0.0  ;;  %v7920_v39 = vpop.f32.mrb[10].mxu1 }
  0xfe   : > { %v2223_v28 = vpack.c.bf16 %v2037_v21, %v2036_v20  ;;  %v2133_v43 = vmax.f32 %v7920_v39, 0.0  ;;  %v1678_v44 = vpop.f32.mrb[11].mxu1 }
  0xff   : > { %v2222_v30 = vpack.c.bf16 %v2035_v26, %v2034_v25  ;;  %v2131_v47 = vmax.f32 %v1678_v44, 0.0 }
 0x100   : > { %v9624_v49 = vpack.c.bf16 %v2133_v43, %v2132_v35 }
 0x101   : > { %v7827_v32 = vpop.f32.mrb[12].mxu0  ;;  %8029 = vmatprep.mubr.bf16.mxu1 %v2222_v30  ;;  %v9629_v52 = vpack.c.bf16 %v2131_v47, %v2130_v38 }
 0x102   : > { %v1307_v34 = vpop.f32.mrb[13].mxu0  ;;  %8030 = vmatmul.mubr.bf16.gmra.mrb[104].mxu1 %v2223_v28  ;;  %v2040_v40 = vmax.f32 %v7827_v32, 0.0 }
 0x103   : > { %v7828_v37 = vpop.f32.mrb[14].mxu0  ;;  %v2038_v45 = vmax.f32 %v1307_v34, 0.0  ;;  %v7923_v54 = vpop.f32.mrb[12].mxu1 }
 0x104   : > { %v2041_v41 = vmax.f32 %v7828_v37, 0.0  ;;  %v1310_v42 = vpop.f32.mrb[15].mxu0  ;;  %v2136_v56 = vmax.f32 %v7923_v54, 0.0  ;;  %v1691_v57 = vpop.f32.mrb[13].mxu1  ;;  %v8545_v54 = vld [vmem:[%s12741_s4 + $0x30] sm:$0xff]  }
 0x105   : > { %v2039_v46 = vmax.f32 %v1310_v42, 0.0  ;;  %v2134_v59 = vmax.f32 %v1691_v57, 0.0  ;;  %v7924_v60 = vpop.f32.mrb[14].mxu1  ;;  %8225 = vmatprep.subr.bf16.mxu0 %v8545_v54 }
 0x106   : > { %v2225_v48 = vpack.c.bf16 %v2041_v41, %v2040_v40  ;;  %v2137_v0 = vmax.f32 %v7924_v60, 0.0  ;;  %v1694_v1 = vpop.f32.mrb[15].mxu1  ;;  %8226 = vmatpush3.bf16.msra.mxu0 %v8545_v54 }
 0x107   : > { %v2224_v50 = vpack.c.bf16 %v2039_v46, %v2038_v45  ;;  %v2135_v4 = vmax.f32 %v1694_v1, 0.0 }
 0x108   : > { %v9631_v6 = vpack.c.bf16 %v2137_v0, %v2136_v56 }
 0x109   : > { %v7831_v53 = vpop.f32.mrb[16].mxu0  ;;  %8033 = vmatprep.mubr.bf16.mxu1 %v2224_v50  ;;  %v9633_v8 = vpack.c.bf16 %v2135_v4, %v2134_v59 }
 0x10a   : > { %v1323_v55 = vpop.f32.mrb[17].mxu0  ;;  %8034 = vmatmul.mubr.bf16.gmra.mrb[108].mxu1 %v2225_v48  ;;  %v2044_v61 = vmax.f32 %v7831_v53, 0.0 }
 0x10b   : > { %v7832_v58 = vpop.f32.mrb[18].mxu0  ;;  %v2042_v2 = vmax.f32 %v1323_v55, 0.0  ;;  %v7927_v12 = vpop.f32.mrb[16].mxu1 }
 0x10c   : > { %v2045_v62 = vmax.f32 %v7832_v58, 0.0  ;;  %v1326_v63 = vpop.f32.mrb[19].mxu0  ;;  %v2140_v14 = vmax.f32 %v7927_v12, 0.0  ;;  %v1707_v15 = vpop.f32.mrb[17].mxu1 }
 0x10d   : > { %v2043_v3 = vmax.f32 %v1326_v63, 0.0  ;;  %v2138_v17 = vmax.f32 %v1707_v15, 0.0  ;;  %v7928_v18 = vpop.f32.mrb[18].mxu1 }
 0x10e   : > { %v2227_v5 = vpack.c.bf16 %v2045_v62, %v2044_v61  ;;  %v2141_v22 = vmax.f32 %v7928_v18, 0.0  ;;  %v1710_v23 = vpop.f32.mrb[19].mxu1 }
 0x10f   : > { %v2226_v7 = vpack.c.bf16 %v2043_v3, %v2042_v2  ;;  %v2139_v26 = vmax.f32 %v1710_v23, 0.0 }
 0x110   : > { %v9635_v28 = vpack.c.bf16 %v2141_v22, %v2140_v14 }
 0x111   : > { %v7835_v10 = vpop.f32.mrb[20].mxu0  ;;  %8037 = vmatprep.mubr.bf16.mxu1 %v2226_v7  ;;  %v9637_v32 = vpack.c.bf16 %v2139_v26, %v2138_v17 }
 0x112   : > { %v1339_v13 = vpop.f32.mrb[21].mxu0  ;;  %8038 = vmatmul.mubr.bf16.gmra.mrb[112].mxu1 %v2227_v5  ;;  %v2048_v19 = vmax.f32 %v7835_v10, 0.0 }
 0x113   : > { %v7836_v16 = vpop.f32.mrb[22].mxu0  ;;  %v2046_v24 = vmax.f32 %v1339_v13, 0.0  ;;  %v7931_v34 = vpop.f32.mrb[20].mxu1 }
 0x114   : > { %v2049_v20 = vmax.f32 %v7836_v16, 0.0  ;;  %v1342_v21 = vpop.f32.mrb[23].mxu0  ;;  %v2144_v36 = vmax.f32 %v7931_v34, 0.0  ;;  %v1723_v37 = vpop.f32.mrb[21].mxu1 }
 0x115   : > { %v2047_v25 = vmax.f32 %v1342_v21, 0.0  ;;  %v2142_v39 = vmax.f32 %v1723_v37, 0.0  ;;  %v7932_v40 = vpop.f32.mrb[22].mxu1 }
 0x116   : > { %v2229_v27 = vpack.c.bf16 %v2049_v20, %v2048_v19  ;;  %v2145_v44 = vmax.f32 %v7932_v40, 0.0  ;;  %v1726_v45 = vpop.f32.mrb[23].mxu1 }
 0x117   : > { %v2228_v30 = vpack.c.bf16 %v2047_v25, %v2046_v24  ;;  %v2143_v48 = vmax.f32 %v1726_v45, 0.0 }
 0x118   : > { %v9639_v51 = vpack.c.bf16 %v2145_v44, %v2144_v36 }
 0x119   : > { %v7839_v33 = vpop.f32.mrb[24].mxu0  ;;  %8041 = vmatprep.mubr.bf16.mxu1 %v2228_v30  ;;  %v9644_v55 = vpack.c.bf16 %v2143_v48, %v2142_v39  ;;  %v8546_v48 = vld [vmem:[%s12741_s4 + $0x38] sm:$0xff]  }
 0x11a   : > { %v1355_v35 = vpop.f32.mrb[25].mxu0  ;;  %8042 = vmatmul.mubr.bf16.gmra.mrb[116].mxu1 %v2229_v27  ;;  %v2052_v41 = vmax.f32 %v7839_v33, 0.0  ;;  %8227 = vmatprep.subr.bf16.mxu0 %v8546_v48 }
 0x11b   : > { %v7840_v38 = vpop.f32.mrb[26].mxu0  ;;  %v2050_v46 = vmax.f32 %v1355_v35, 0.0  ;;  %v7935_v57 = vpop.f32.mrb[24].mxu1  ;;  %8228 = vmatpush3.bf16.msra.mxu0 %v8546_v48 }
 0x11c   : > { %v2053_v42 = vmax.f32 %v7840_v38, 0.0  ;;  %v1358_v43 = vpop.f32.mrb[27].mxu0  ;;  %v2148_v59 = vmax.f32 %v7935_v57, 0.0  ;;  %v1739_v60 = vpop.f32.mrb[25].mxu1 }
 0x11d   : > { %v2051_v47 = vmax.f32 %v1358_v43, 0.0  ;;  %v2146_v62 = vmax.f32 %v1739_v60, 0.0  ;;  %v7936_v63 = vpop.f32.mrb[26].mxu1 }
 0x11e   : > { %v2231_v50 = vpack.c.bf16 %v2053_v42, %v2052_v41  ;;  %v2149_v3 = vmax.f32 %v7936_v63, 0.0  ;;  %v1742_v4 = vpop.f32.mrb[27].mxu1 }
 0x11f   : > { %v2230_v53 = vpack.c.bf16 %v2051_v47, %v2050_v46  ;;  %v2147_v10 = vmax.f32 %v1742_v4, 0.0 }
 0x120   : > { %v9646_v13 = vpack.c.bf16 %v2149_v3, %v2148_v59 }
 0x121   : > { %v7843_v56 = vpop.f32.mrb[28].mxu0  ;;  %8045 = vmatprep.mubr.bf16.mxu1 %v2230_v53  ;;  %v9648_v15 = vpack.c.bf16 %v2147_v10, %v2146_v62 }
 0x122   : > { %v1371_v58 = vpop.f32.mrb[29].mxu0  ;;  %8046 = vmatmul.mubr.bf16.gmra.mrb[120].mxu1 %v2231_v50  ;;  %v2056_v0 = vmax.f32 %v7843_v56, 0.0 }
 0x123   : > { %v7844_v61 = vpop.f32.mrb[30].mxu0  ;;  %v2054_v5 = vmax.f32 %v1371_v58, 0.0  ;;  %v7939_v17 = vpop.f32.mrb[28].mxu1 }
 0x124   : > { %v2057_v1 = vmax.f32 %v7844_v61, 0.0  ;;  %v1374_v2 = vpop.f32.mrb[31].mxu0  ;;  %v2152_v19 = vmax.f32 %v7939_v17, 0.0  ;;  %v1755_v20 = vpop.f32.mrb[29].mxu1 }
 0x125   : > { %v2055_v7 = vmax.f32 %v1374_v2, 0.0  ;;  %v2150_v22 = vmax.f32 %v1755_v20, 0.0  ;;  %v7940_v23 = vpop.f32.mrb[30].mxu1 }
 0x126   : > { %v2233_v12 = vpack.c.bf16 %v2057_v1, %v2056_v0  ;;  %v2153_v27 = vmax.f32 %v7940_v23, 0.0  ;;  %v1758_v30 = vpop.f32.mrb[31].mxu1 }
 0x127   : > { %v2232_v14 = vpack.c.bf16 %v2055_v7, %v2054_v5  ;;  %v2151_v35 = vmax.f32 %v1758_v30, 0.0 }
 0x128   : > { %v9650_v37 = vpack.c.bf16 %v2153_v27, %v2152_v19 }
 0x129   : > { %v7847_v16 = vpop.f32.mrb[32].mxu0  ;;  %8049 = vmatprep.mubr.bf16.mxu1 %v2232_v14  ;;  %v9652_v39 = vpack.c.bf16 %v2151_v35, %v2150_v22 }
 0x12a   : > { %v1387_v18 = vpop.f32.mrb[33].mxu0  ;;  %8050 = vmatmul.mubr.bf16.gmra.mrb[124].mxu1 %v2233_v12  ;;  %v2060_v24 = vmax.f32 %v7847_v16, 0.0 }
 0x12b   : > { %v7848_v21 = vpop.f32.mrb[34].mxu0  ;;  %v2058_v33 = vmax.f32 %v1387_v18, 0.0  ;;  %v7943_v41 = vpop.f32.mrb[32].mxu1 }
 0x12c   : > { %v2061_v25 = vmax.f32 %v7848_v21, 0.0  ;;  %v1390_v26 = vpop.f32.mrb[35].mxu0  ;;  %v2156_v43 = vmax.f32 %v7943_v41, 0.0  ;;  %v1771_v44 = vpop.f32.mrb[33].mxu1 }
 0x12d   : > { %v2059_v34 = vmax.f32 %v1390_v26, 0.0  ;;  %v2154_v46 = vmax.f32 %v1771_v44, 0.0  ;;  %v7944_v47 = vpop.f32.mrb[34].mxu1 }
 0x12e   : > { %v2235_v36 = vpack.c.bf16 %v2061_v25, %v2060_v24  ;;  %v2157_v56 = vmax.f32 %v7944_v47, 0.0  ;;  %v1774_v57 = vpop.f32.mrb[35].mxu1 }
 0x12f   : > { %v2234_v38 = vpack.c.bf16 %v2059_v34, %v2058_v33  ;;  %v2155_v60 = vmax.f32 %v1774_v57, 0.0 }
 0x130   : > { %v9657_v62 = vpack.c.bf16 %v2157_v56, %v2156_v43 }
 0x131   : > { %v7851_v40 = vpop.f32.mrb[36].mxu0  ;;  %8053 = vmatprep.mubr.bf16.mxu1 %v2234_v38  ;;  %v9659_v0 = vpack.c.bf16 %v2155_v60, %v2154_v46 }
 0x132   : > { %v1403_v42 = vpop.f32.mrb[37].mxu0  ;;  %8054 = vmatmul.mubr.bf16.gmra.mrb[128].mxu1 %v2235_v36  ;;  %v2064_v50 = vmax.f32 %v7851_v40, 0.0 }
 0x133   : > { %v7852_v45 = vpop.f32.mrb[38].mxu0  ;;  %v2062_v58 = vmax.f32 %v1403_v42, 0.0  ;;  %v7947_v2 = vpop.f32.mrb[36].mxu1 }
 0x134   : > { %v2065_v53 = vmax.f32 %v7852_v45, 0.0  ;;  %v1406_v54 = vpop.f32.mrb[39].mxu0  ;;  %v2160_v4 = vmax.f32 %v7947_v2, 0.0  ;;  %v1787_v5 = vpop.f32.mrb[37].mxu1 }
 0x135   : > { %v2063_v59 = vmax.f32 %v1406_v54, 0.0  ;;  %v2158_v10 = vmax.f32 %v1787_v5, 0.0  ;;  %v7948_v12 = vpop.f32.mrb[38].mxu1 }
 0x136   : > { %v2237_v61 = vpack.c.bf16 %v2065_v53, %v2064_v50  ;;  %v2161_v18 = vmax.f32 %v7948_v12, 0.0  ;;  %v1790_v19 = vpop.f32.mrb[39].mxu1 }
 0x137   : > { %v2236_v63 = vpack.c.bf16 %v2063_v59, %v2062_v58  ;;  %v2159_v22 = vmax.f32 %v1790_v19, 0.0 }
 0x138   : > { %v9661_v24 = vpack.c.bf16 %v2161_v18, %v2160_v4 }
 0x139   : > { %v7855_v1 = vpop.f32.mrb[40].mxu0  ;;  %8057 = vmatprep.mubr.bf16.mxu1 %v2236_v63  ;;  %v9663_v26 = vpack.c.bf16 %v2159_v22, %v2158_v10  ;;  %v9330_v63 = vmov 0  }
 0x13a   : > { %v1419_v3 = vpop.f32.mrb[41].mxu0  ;;  %8058 = vmatmul.mubr.bf16.gmra.mrb[132].mxu1 %v2237_v61  ;;  %v2068_v14 = vmax.f32 %v7855_v1, 0.0  ;;  %8432 = vset.pattern.permute.xlu1 %v9330_v63 }
 0x13b   : > { %v7856_v7 = vpop.f32.mrb[42].mxu0  ;;  %v2066_v20 = vmax.f32 %v1419_v3, 0.0  ;;  %v7951_v30 = vpop.f32.mrb[40].mxu1  ;;  %8433 = vset.pattern.permute.xlu0 %v9330_v63 }
 0x13c   : > { %v2069_v16 = vmax.f32 %v7856_v7, 0.0  ;;  %v1422_v17 = vpop.f32.mrb[43].mxu0  ;;  %v2164_v34 = vmax.f32 %v7951_v30, 0.0  ;;  %v1803_v35 = vpop.f32.mrb[41].mxu1 }
 0x13d   : > { %v2067_v21 = vmax.f32 %v1422_v17, 0.0  ;;  %v2162_v38 = vmax.f32 %v1803_v35, 0.0  ;;  %v7952_v40 = vpop.f32.mrb[42].mxu1 }
 0x13e   : > { %v2239_v23 = vpack.c.bf16 %v2069_v16, %v2068_v14  ;;  %v2165_v44 = vmax.f32 %v7952_v40, 0.0  ;;  %v1806_v45 = vpop.f32.mrb[43].mxu1 }
 0x13f   : > { %v2238_v25 = vpack.c.bf16 %v2067_v21, %v2066_v20  ;;  %v2163_v48 = vmax.f32 %v1806_v45, 0.0 }
 0x140   : > { %v9665_v53 = vpack.c.bf16 %v2165_v44, %v2164_v34 }
 0x141   : > { %v7859_v27 = vpop.f32.mrb[44].mxu0  ;;  %8061 = vmatprep.mubr.bf16.mxu1 %v2238_v25  ;;  %v9667_v56 = vpack.c.bf16 %v2163_v48, %v2162_v38 }
 0x142   : > { %v1435_v33 = vpop.f32.mrb[45].mxu0  ;;  %8062 = vmatmul.mubr.bf16.gmra.mrb[136].mxu1 %v2239_v23  ;;  %v2072_v41 = vmax.f32 %v7859_v27, 0.0 }
 0x143   : > { %v7860_v36 = vpop.f32.mrb[46].mxu0  ;;  %v2070_v46 = vmax.f32 %v1435_v33, 0.0  ;;  %v7955_v58 = vpop.f32.mrb[44].mxu1 }
 0x144   : > { %v2073_v42 = vmax.f32 %v7860_v36, 0.0  ;;  %v1438_v43 = vpop.f32.mrb[47].mxu0  ;;  %v2168_v60 = vmax.f32 %v7955_v58, 0.0  ;;  %v1819_v61 = vpop.f32.mrb[45].mxu1 }
 0x145   : > { %v2071_v47 = vmax.f32 %v1438_v43, 0.0  ;;  %v2166_v2 = vmax.f32 %v1819_v61, 0.0  ;;  %v7956_v3 = vpop.f32.mrb[46].mxu1 }
 0x146   : > { %v2241_v50 = vpack.c.bf16 %v2073_v42, %v2072_v41  ;;  %v2169_v10 = vmax.f32 %v7956_v3, 0.0  ;;  %v1822_v12 = vpop.f32.mrb[47].mxu1 }
 0x147   : > { %v2240_v54 = vpack.c.bf16 %v2071_v47, %v2070_v46  ;;  %v2167_v17 = vmax.f32 %v1822_v12, 0.0 }
 0x148   : > { %v9669_v19 = vpack.c.bf16 %v2169_v10, %v2168_v60 }
 0x149   : > { %v7863_v57 = vpop.f32.mrb[48].mxu0  ;;  %8065 = vmatprep.mubr.bf16.mxu1 %v2240_v54  ;;  %v9671_v21 = vpack.c.bf16 %v2167_v17, %v2166_v2 }
 0x14a   : > { %v1451_v59 = vpop.f32.mrb[49].mxu0  ;;  %8066 = vmatmul.mubr.bf16.gmra.mrb[140].mxu1 %v2241_v50  ;;  %v2076_v4 = vmax.f32 %v7863_v57, 0.0 }
 0x14b   : > { %v7864_v1 = vpop.f32.mrb[50].mxu0  ;;  %v2074_v14 = vmax.f32 %v1451_v59, 0.0  ;;  %v7959_v23 = vpop.f32.mrb[48].mxu1 }
 0x14c   : > { %v2077_v5 = vmax.f32 %v7864_v1, 0.0  ;;  %v1454_v7 = vpop.f32.mrb[51].mxu0  ;;  %v2172_v27 = vmax.f32 %v7959_v23, 0.0  ;;  %v1835_v30 = vpop.f32.mrb[49].mxu1 }
 0x14d   : > { %v2075_v16 = vmax.f32 %v1454_v7, 0.0  ;;  %v2170_v34 = vmax.f32 %v1835_v30, 0.0  ;;  %v7960_v35 = vpop.f32.mrb[50].mxu1 }
 0x14e   : > { %v2243_v18 = vpack.c.bf16 %v2077_v5, %v2076_v4  ;;  %v2173_v41 = vmax.f32 %v7960_v35, 0.0  ;;  %v1838_v42 = vpop.f32.mrb[51].mxu1 }
 0x14f   : > { %v2242_v20 = vpack.c.bf16 %v2075_v16, %v2074_v14  ;;  %v2171_v45 = vmax.f32 %v1838_v42, 0.0 }
 0x150   : > { %v9673_v47 = vpack.c.bf16 %v2173_v41, %v2172_v27 }
 0x151   : > { %v7867_v22 = vpop.f32.mrb[52].mxu0  ;;  %8069 = vmatprep.mubr.bf16.mxu1 %v2242_v20  ;;  %v9675_v50 = vpack.c.bf16 %v2171_v45, %v2170_v34 }
 0x152   : > { %v1467_v25 = vpop.f32.mrb[53].mxu0  ;;  %8070 = vmatmul.mubr.bf16.gmra.mrb[144].mxu1 %v2243_v18  ;;  %v2080_v36 = vmax.f32 %v7867_v22, 0.0 }
 0x153   : > { %v7868_v33 = vpop.f32.mrb[54].mxu0  ;;  %v2078_v43 = vmax.f32 %v1467_v25, 0.0  ;;  %v7963_v57 = vpop.f32.mrb[52].mxu1 }
 0x154   : > { %v2081_v38 = vmax.f32 %v7868_v33, 0.0  ;;  %v1470_v40 = vpop.f32.mrb[55].mxu0  ;;  %v2176_v59 = vmax.f32 %v7963_v57, 0.0  ;;  %v1851_v60 = vpop.f32.mrb[53].mxu1 }
 0x155   : > { %v2079_v44 = vmax.f32 %v1470_v40, 0.0  ;;  %v2174_v63 = vmax.f32 %v1851_v60, 0.0  ;;  %v7964_v1 = vpop.f32.mrb[54].mxu1 }
 0x156   : > { %v2245_v46 = vpack.c.bf16 %v2081_v38, %v2080_v36  ;;  %v2177_v5 = vmax.f32 %v7964_v1, 0.0  ;;  %v1854_v7 = vpop.f32.mrb[55].mxu1 }
 0x157   : > { %v2244_v48 = vpack.c.bf16 %v2079_v44, %v2078_v43  ;;  %v2175_v14 = vmax.f32 %v1854_v7, 0.0 }
 0x158   : > { %v9677_v17 = vpack.c.bf16 %v2177_v5, %v2176_v59 }
 0x159   : > { %v7871_v54 = vpop.f32.mrb[56].mxu0  ;;  %8073 = vmatprep.mubr.bf16.mxu1 %v2244_v48  ;;  %v9679_v20 = vpack.c.bf16 %v2175_v14, %v2174_v63 }
 0x15a   : > { %v1483_v58 = vpop.f32.mrb[57].mxu0  ;;  %8074 = vmatmul.mubr.bf16.gmra.mrb[148].mxu1 %v2245_v46  ;;  %v2084_v2 = vmax.f32 %v7871_v54, 0.0 }
 0x15b   : > { %v7872_v61 = vpop.f32.mrb[58].mxu0  ;;  %v2082_v10 = vmax.f32 %v1483_v58, 0.0  ;;  %v7967_v23 = vpop.f32.mrb[56].mxu1 }
 0x15c   : > { %v2085_v3 = vmax.f32 %v7872_v61, 0.0  ;;  %v1486_v4 = vpop.f32.mrb[59].mxu0  ;;  %v2180_v27 = vmax.f32 %v7967_v23, 0.0  ;;  %v1867_v30 = vpop.f32.mrb[57].mxu1 }
 0x15d   : > { %v2083_v12 = vmax.f32 %v1486_v4, 0.0  ;;  %v2178_v34 = vmax.f32 %v1867_v30, 0.0  ;;  %v7968_v35 = vpop.f32.mrb[58].mxu1 }
 0x15e   : > { %v2247_v16 = vpack.c.bf16 %v2085_v3, %v2084_v2  ;;  %v2181_v41 = vmax.f32 %v7968_v35, 0.0  ;;  %v1870_v42 = vpop.f32.mrb[59].mxu1 }
 0x15f   : > { %v2246_v18 = vpack.c.bf16 %v2083_v12, %v2082_v10  ;;  %v2179_v45 = vmax.f32 %v1870_v42, 0.0 }
 0x160   : > { %v9681_v48 = vpack.c.bf16 %v2181_v41, %v2180_v27 }
 0x161   : > { %v7875_v22 = vpop.f32.mrb[60].mxu0  ;;  %8077 = vmatprep.mubr.bf16.mxu1 %v2246_v18  ;;  %v9683_v57 = vpack.c.bf16 %v2179_v45, %v2178_v34 }
 0x162   : > { %v1499_v25 = vpop.f32.mrb[61].mxu0  ;;  %8078 = vmatmul.mubr.bf16.gmra.mrb[152].mxu1 %v2247_v16  ;;  %v2088_v36 = vmax.f32 %v7875_v22, 0.0 }
 0x163   : > { %v7876_v33 = vpop.f32.mrb[62].mxu0  ;;  %v2086_v43 = vmax.f32 %v1499_v25, 0.0  ;;  %v7971_v59 = vpop.f32.mrb[60].mxu1 }
 0x164   : > { %v2089_v38 = vmax.f32 %v7876_v33, 0.0  ;;  %v1502_v40 = vpop.f32.mrb[63].mxu0  ;;  %v2184_v61 = vmax.f32 %v7971_v59, 0.0  ;;  %v1883_v63 = vpop.f32.mrb[61].mxu1 }
 0x165   : > { %v2087_v44 = vmax.f32 %v1502_v40, 0.0  ;;  %v2182_v2 = vmax.f32 %v1883_v63, 0.0  ;;  %v7972_v3 = vpop.f32.mrb[62].mxu1 }
 0x166   : > { %v2249_v46 = vpack.c.bf16 %v2089_v38, %v2088_v36  ;;  %v2185_v10 = vmax.f32 %v7972_v3, 0.0  ;;  %v1886_v12 = vpop.f32.mrb[63].mxu1 }
 0x167   : > { %v2248_v54 = vpack.c.bf16 %v2087_v44, %v2086_v43  ;;  %v2183_v18 = vmax.f32 %v1886_v12, 0.0 }
 0x168   : > { %v9685_v23 = vpack.c.bf16 %v2185_v10, %v2184_v61 }
 0x169   : > { %v7879_v58 = vpop.f32.mrb[64].mxu0  ;;  %8081 = vmatprep.mubr.bf16.mxu1 %v2248_v54  ;;  %v9687_v27 = vpack.c.bf16 %v2183_v18, %v2182_v2 }
 0x16a   : > { %v1515_v60 = vpop.f32.mrb[65].mxu0  ;;  %8082 = vmatmul.mubr.bf16.gmra.mrb[156].mxu1 %v2249_v46  ;;  %v2092_v4 = vmax.f32 %v7879_v58, 0.0 }
 0x16b   : > { %v7880_v1 = vpop.f32.mrb[66].mxu0  ;;  %v2090_v14 = vmax.f32 %v1515_v60, 0.0  ;;  %v7975_v33 = vpop.f32.mrb[64].mxu1 }
 0x16c   : > { %v2093_v5 = vmax.f32 %v7880_v1, 0.0  ;;  %v1518_v7 = vpop.f32.mrb[67].mxu0  ;;  %v2188_v35 = vmax.f32 %v7975_v33, 0.0  ;;  %v1899_v36 = vpop.f32.mrb[65].mxu1 }
 0x16d   : > { %v2091_v16 = vmax.f32 %v1518_v7, 0.0  ;;  %v2186_v40 = vmax.f32 %v1899_v36, 0.0  ;;  %v7976_v41 = vpop.f32.mrb[66].mxu1 }
 0x16e   : > { %v2251_v22 = vpack.c.bf16 %v2093_v5, %v2092_v4  ;;  %v2189_v45 = vmax.f32 %v7976_v41, 0.0  ;;  %v1902_v46 = vpop.f32.mrb[67].mxu1 }
 0x16f   : > { %v2250_v25 = vpack.c.bf16 %v2091_v16, %v2090_v14  ;;  %v2187_v59 = vmax.f32 %v1902_v46, 0.0 }
 0x170   : > { %v9689_v61 = vpack.c.bf16 %v2189_v45, %v2188_v35 }
 0x171   : > { %v7883_v30 = vpop.f32.mrb[68].mxu0  ;;  %8085 = vmatprep.mubr.bf16.mxu1 %v2250_v25  ;;  %v9691_v1 = vpack.c.bf16 %v2187_v59, %v2186_v40 }
 0x172   : > { %v1531_v34 = vpop.f32.mrb[69].mxu0  ;;  %8086 = vmatmul.mubr.bf16.gmra.mrb[160].mxu1 %v2251_v22  ;;  %v2096_v42 = vmax.f32 %v7883_v30, 0.0 }
 0x173   : > { %v7884_v38 = vpop.f32.mrb[70].mxu0  ;;  %v2094_v54 = vmax.f32 %v1531_v34, 0.0  ;;  %v7979_v3 = vpop.f32.mrb[68].mxu1 }
 0x174   : > { %v2097_v43 = vmax.f32 %v7884_v38, 0.0  ;;  %v1534_v44 = vpop.f32.mrb[71].mxu0  ;;  %v2192_v5 = vmax.f32 %v7979_v3, 0.0  ;;  %v1915_v7 = vpop.f32.mrb[69].mxu1 }
 0x175   : > { %v2095_v58 = vmax.f32 %v1534_v44, 0.0  ;;  %v2190_v12 = vmax.f32 %v1915_v7, 0.0  ;;  %v7980_v14 = vpop.f32.mrb[70].mxu1 }
 0x176   : > { %v2253_v60 = vpack.c.bf16 %v2097_v43, %v2096_v42  ;;  %v2193_v25 = vmax.f32 %v7980_v14, 0.0  ;;  %v1918_v30 = vpop.f32.mrb[71].mxu1 }
 0x177   : > { %v2252_v63 = vpack.c.bf16 %v2095_v58, %v2094_v54  ;;  %v2191_v35 = vmax.f32 %v1918_v30, 0.0 }
 0x178   : > { %v9693_v38 = vpack.c.bf16 %v2193_v25, %v2192_v5 }
 0x179   : > { %v7887_v2 = vpop.f32.mrb[72].mxu0  ;;  %8089 = vmatprep.mubr.bf16.mxu1 %v2252_v63  ;;  %v9695_v41 = vpack.c.bf16 %v2191_v35, %v2190_v12 }
 0x17a   : > { %v1547_v4 = vpop.f32.mrb[73].mxu0  ;;  %8090 = vmatmul.mubr.bf16.gmra.mrb[164].mxu1 %v2253_v60  ;;  %v2100_v16 = vmax.f32 %v7887_v2, 0.0 }
 0x17b   : > { %v7888_v10 = vpop.f32.mrb[74].mxu0  ;;  %v2098_v33 = vmax.f32 %v1547_v4, 0.0  ;;  %v7983_v43 = vpop.f32.mrb[72].mxu1 }
 0x17c   : > { %v2101_v18 = vmax.f32 %v7888_v10, 0.0  ;;  %v1550_v22 = vpop.f32.mrb[75].mxu0  ;;  %v2196_v45 = vmax.f32 %v7983_v43, 0.0  ;;  %v1931_v46 = vpop.f32.mrb[73].mxu1 }
 0x17d   : > { %v2099_v34 = vmax.f32 %v1550_v22, 0.0  ;;  %v2194_v58 = vmax.f32 %v1931_v46, 0.0  ;;  %v7984_v59 = vpop.f32.mrb[74].mxu1 }
 0x17e   : > { %v2255_v36 = vpack.c.bf16 %v2101_v18, %v2100_v16  ;;  %v2197_v3 = vmax.f32 %v7984_v59, 0.0  ;;  %v1934_v4 = vpop.f32.mrb[75].mxu1 }
 0x17f   : > { %v2254_v40 = vpack.c.bf16 %v2099_v34, %v2098_v33  ;;  %v2195_v10 = vmax.f32 %v1934_v4, 0.0 }
 0x180   : > { %v9697_v14 = vpack.c.bf16 %v2197_v3, %v2196_v45 }
 0x181   : > { %v7891_v42 = vpop.f32.mrb[76].mxu0  ;;  %8093 = vmatprep.mubr.bf16.mxu1 %v2254_v40  ;;  %v9699_v18 = vpack.c.bf16 %v2195_v10, %v2194_v58 }
 0x182   : > { %v1563_v44 = vpop.f32.mrb[77].mxu0  ;;  %8094 = vmatmul.mubr.bf16.gmra.mrb[168].mxu1 %v2255_v36  ;;  %v2104_v60 = vmax.f32 %v7891_v42, 0.0 }
 0x183   : > { %v7892_v54 = vpop.f32.mrb[78].mxu0  ;;  %v2102_v5 = vmax.f32 %v1563_v44, 0.0  ;;  %v7987_v25 = vpop.f32.mrb[76].mxu1 }
 0x184   : > { %v2105_v63 = vmax.f32 %v7892_v54, 0.0  ;;  %v1566_v2 = vpop.f32.mrb[79].mxu0  ;;  %v2200_v33 = vmax.f32 %v7987_v25, 0.0  ;;  %v1947_v34 = vpop.f32.mrb[77].mxu1 }
 0x185   : > { %v2103_v7 = vmax.f32 %v1566_v2, 0.0  ;;  %v2198_v36 = vmax.f32 %v1947_v34, 0.0  ;;  %v7988_v40 = vpop.f32.mrb[78].mxu1 }
 0x186   : > { %v2257_v12 = vpack.c.bf16 %v2105_v63, %v2104_v60  ;;  %v2201_v46 = vmax.f32 %v7988_v40, 0.0  ;;  %v1950_v54 = vpop.f32.mrb[79].mxu1 }
 0x187   : > { %v2256_v16 = vpack.c.bf16 %v2103_v7, %v2102_v5  ;;  %v2199_v60 = vmax.f32 %v1950_v54, 0.0 }
 0x188   : > { %v9701_v63 = vpack.c.bf16 %v2201_v46, %v2200_v33 }
 0x189   : > { %v7895_v22 = vpop.f32.mrb[80].mxu0  ;;  %8097 = vmatprep.mubr.bf16.mxu1 %v2256_v16  ;;  %v9703_v3 = vpack.c.bf16 %v2199_v60, %v2198_v36 }
 0x18a   : > { %v1579_v30 = vpop.f32.mrb[81].mxu0  ;;  %8098 = vmatmul.mubr.bf16.gmra.mrb[172].mxu1 %v2257_v12  ;;  %v2108_v42 = vmax.f32 %v7895_v22, 0.0 }
 0x18b   : > { %v7896_v35 = vpop.f32.mrb[82].mxu0  ;;  %v2106_v45 = vmax.f32 %v1579_v30, 0.0  ;;  %v7991_v5 = vpop.f32.mrb[80].mxu1 }
 0x18c   : > { %v2109_v43 = vmax.f32 %v7896_v35, 0.0  ;;  %v1582_v44 = vpop.f32.mrb[83].mxu0  ;;  %v2204_v10 = vmax.f32 %v7991_v5, 0.0  ;;  %v1963_v12 = vpop.f32.mrb[81].mxu1 }
 0x18d   : > { %v2107_v59 = vmax.f32 %v1582_v44, 0.0  ;;  %v2202_v22 = vmax.f32 %v1963_v12, 0.0  ;;  %v7992_v25 = vpop.f32.mrb[82].mxu1 }
 0x18e   : > { %v2259_v58 = vpack.c.bf16 %v2109_v43, %v2108_v42  ;;  %v2205_v40 = vmax.f32 %v7992_v25, 0.0  ;;  %v1966_v42 = vpop.f32.mrb[83].mxu1 }
 0x18f   : > { %v2258_v2 = vpack.c.bf16 %v2107_v59, %v2106_v45  ;;  %v2203_v44 = vmax.f32 %v1966_v42, 0.0 }
 0x190   : > { %v9705_v46 = vpack.c.bf16 %v2205_v40, %v2204_v10 }
 0x191   : > { %v7899_v4 = vpop.f32.mrb[84].mxu0  ;;  %8101 = vmatprep.mubr.bf16.mxu1 %v2258_v2  ;;  %v9707_v45 = vpack.c.bf16 %v2203_v44, %v2202_v22 }
 0x192   : > { %v1595_v7 = vpop.f32.mrb[85].mxu0  ;;  %8102 = vmatmul.mubr.bf16.gmra.mrb[176].mxu1 %v2259_v58  ;;  %v2112_v34 = vmax.f32 %v7899_v4, 0.0  ;;  %12744 = vst [vmem:[#allocation2_spill] sm:$0xff] %v9705_v46 }
 0x193   : > { %v7900_v16 = vpop.f32.mrb[86].mxu0  ;;  %v2110_v33 = vmax.f32 %v1595_v7, 0.0  ;;  %12745 = vst [vmem:[#allocation3_spill] sm:$0xff] %v9707_v45  ;;  %v7995_v60 = vpop.f32.mrb[84].mxu1 }
 0x194   : > { %v2113_v30 = vmax.f32 %v7900_v16, 0.0  ;;  %v1598_v35 = vpop.f32.mrb[87].mxu0  ;;  %v2208_v2 = vmax.f32 %v7995_v60, 0.0  ;;  %v1979_v4 = vpop.f32.mrb[85].mxu1 }
 0x195   : > { %v2111_v43 = vmax.f32 %v1598_v35, 0.0  ;;  %v2206_v12 = vmax.f32 %v1979_v4, 0.0  ;;  %v7996_v16 = vpop.f32.mrb[86].mxu1 }
 0x196   : > { %v2261_v36 = vpack.c.bf16 %v2113_v30, %v2112_v34  ;;  %v2209_v42 = vmax.f32 %v7996_v16, 0.0  ;;  %v1982_v34 = vpop.f32.mrb[87].mxu1 }
 0x197   : > { %v2260_v54 = vpack.c.bf16 %v2111_v43, %v2110_v33  ;;  %v2207_v40 = vmax.f32 %v1982_v34, 0.0 }
 0x198   : > { %v9709_v33 = vpack.c.bf16 %v2209_v42, %v2208_v2 }
 0x199   : > { %v7903_v59 = vpop.f32.mrb[88].mxu0  ;;  %8105 = vmatprep.mubr.bf16.mxu1 %v2260_v54  ;;  %v9711_v44 = vpack.c.bf16 %v2207_v40, %v2206_v12 }
 0x19a   : > { %v1611_v58 = vpop.f32.mrb[89].mxu0  ;;  %8106 = vmatmul.mubr.bf16.gmra.mrb[180].mxu1 %v2261_v36  ;;  %v2116_v25 = vmax.f32 %v7903_v59, 0.0 }
 0x19b   : > { %v7904_v5 = vpop.f32.mrb[90].mxu0  ;;  %v2114_v10 = vmax.f32 %v1611_v58, 0.0  ;;  %v7999_v54 = vpop.f32.mrb[88].mxu1 }
 0x19c   : > { %v2117_v7 = vmax.f32 %v7904_v5, 0.0  ;;  %v1614_v35 = vpop.f32.mrb[91].mxu0  ;;  %v2212_v4 = vmax.f32 %v7999_v54, 0.0  ;;  %v1995_v59 = vpop.f32.mrb[89].mxu1 }
 0x19d   : > { %v2115_v30 = vmax.f32 %v1614_v35, 0.0  ;;  %v2210_v46 = vmax.f32 %v1995_v59, 0.0  ;;  %v8000_v16 = vpop.f32.mrb[90].mxu1 }
 0x19e   : > { %v2263_v22 = vpack.c.bf16 %v2117_v7, %v2116_v25  ;;  %v2213_v34 = vmax.f32 %v8000_v16, 0.0  ;;  %v1998_v25 = vpop.f32.mrb[91].mxu1 }
 0x19f   : > { %v2262_v43 = vpack.c.bf16 %v2115_v30, %v2114_v10  ;;  %v2211_v42 = vmax.f32 %v1998_v25, 0.0 }
 0x1a0   : > { %v9713_v10 = vpack.c.bf16 %v2213_v34, %v2212_v4 }
 0x1a1   : > { %v7907_v36 = vpop.f32.mrb[92].mxu0  ;;  %8109 = vmatprep.mubr.bf16.mxu1 %v2262_v43  ;;  %v9715_v40 = vpack.c.bf16 %v2211_v42, %v2210_v46  ;;  %v3186_v46 = vlaneseq }
 0x1a2   : > { %v1627_v60 = vpop.f32.mrb[93].mxu0  ;;  %8110 = vmatmul.mubr.bf16.gmra.mrb[184].mxu1 %v2263_v22  ;;  %v2120_v45 = vmax.f32 %v7907_v36, 0.0 }
 0x1a3   : > { %v7908_v5 = vpop.f32.mrb[94].mxu0  ;;  %v2118_v2 = vmax.f32 %v1627_v60, 0.0  ;;  %v8003_v22 = vpop.f32.mrb[92].mxu1  ;;  %v9733_v4 = vand.u32 127, %v3186_v46 }
 0x1a4   : > { %v2121_v58 = vmax.f32 %v7908_v5, 0.0  ;;  %v1630_v35 = vpop.f32.mrb[95].mxu0  ;;  %v2216_v43 = vmax.f32 %v8003_v22, 0.0  ;;  %v2011_v54 = vpop.f32.mrb[93].mxu1 }
 0x1a5   : > { %v2119_v7 = vmax.f32 %v1630_v35, 0.0  ;;  %v2214_v36 = vmax.f32 %v2011_v54, 0.0  ;;  %v8004_v59 = vpop.f32.mrb[94].mxu1  ;;  %vm3188_vm1 = vcmp.eq.s32.totalorder %v9733_v4, 0 }
 0x1a6   : > { %v2265_v12 = vpack.c.bf16 %v2121_v58, %v2120_v45  ;;  %v2217_v5 = vmax.f32 %v8004_v59, 0.0  ;;  %v2014_v16 = vpop.f32.mrb[95].mxu1 }
 0x1a7   : > { %v2264_v30 = vpack.c.bf16 %v2119_v7, %v2118_v2  ;;  %v2215_v60 = vmax.f32 %v2014_v16, 0.0 }
 0x1a8   : > { %v9718_v35 = vpack.c.bf16 %v2217_v5, %v2216_v43 }
 0x1a9   : > { %8113 = vmatprep.mubr.bf16.mxu1 %v2264_v30  ;;  %v9720_v45 = vpack.c.bf16 %v2215_v60, %v2214_v36 }
 0x1aa   : > { %8114 = vmatmul.mubr.bf16.gmra.mrb[188].mxu1 %v2265_v12 }
 0x1ab   : > { %8117 = vmatprep.mubr.bf16.mxu1 %v9618_v11  ;;  %v9731_v11 = vld [vmem:[%s12740_s3] ss:$0 sm:$0xff] }
 0x1b2   : > { %8118 = vmatmul.mubr.bf16.gmra.mrb[192].mxu1 %v9616_v9 }
 0x1b3   : > { %8121 = vmatprep.mubr.bf16.mxu1 %v9622_v31 }
 0x1ba   : > { %8122 = vmatmul.mubr.bf16.gmra.mrb[196].mxu1 %v9620_v29 }
 0x1bb   : > { %8125 = vmatprep.mubr.bf16.mxu1 %v9629_v52 }
 0x1c2   : > { %8126 = vmatmul.mubr.bf16.gmra.mrb[200].mxu1 %v9624_v49 }
 0x1c3   : > { %8129 = vmatprep.mubr.bf16.mxu1 %v9633_v8 }
 0x1c5   : > { %v8023_v58 = vpop.f32.mrb[96].mxu1 }
 0x1c6   : > { %v2428_v9 = vadd.f32 %v8023_v58, %v9731_v11  ;;  %v2419_v31 = vpop.f32.mrb[97].mxu1 }
 0x1c7   : > { %v2420_v29 = vadd.f32 %v9731_v11, %v2419_v31  ;;  %v8024_v34 = vpop.f32.mrb[98].mxu1 }
 0x1c8   : > { %v3191_v52 = vmax.f32 %v2428_v9, 0.0  ;;  %v2431_v49 = vadd.f32 %v8024_v34, %v9731_v11  ;;  %v2422_v8 = vpop.f32.mrb[99].mxu1 }
 0x1c9   : > { %v3189_v25 = vmax.f32 %v2420_v29, 0.0  ;;  %v2423_v2 = vadd.f32 %v9731_v11, %v2422_v8 }
 0x1ca   : > { %v3192_v7 = vmax.f32 %v2431_v49, 0.0  ;;  %8130 = vmatmul.mubr.bf16.gmra.mrb[204].mxu1 %v9631_v6  ;;  %v3383_v42 = vsel %vm3188_vm1, %v2428_v9, %v3191_v52 }
 0x1cb   : > { %v3190_v12 = vmax.f32 %v2423_v2, 0.0  ;;  %5705 = vperm.xlu1 %8432, %v3383_v42   ;;  %8133 = vmatprep.mubr.bf16.mxu1 %v9637_v32  ;;  %v3381_v30 = vsel %vm3188_vm1, %v2420_v29, %v3189_v25 }
 0x1cc   : > { %v3384_v22 = vsel %vm3188_vm1, %v2431_v49, %v3192_v7  ;;  %5695 = vperm.xlu0 %8433, %v3381_v30  }
 0x1cd   : > { %v3574_v43 = vpack.c.bf16 %v3384_v22, %v3383_v42  ;;  %v3382_v54 = vsel %vm3188_vm1, %v2423_v2, %v3190_v12  ;;  %v8027_v36 = vpop.f32.mrb[100].mxu1 }
 0x1ce   : > { %v3573_v6 = vpack.c.bf16 %v3382_v54, %v3381_v30  ;;  %v2444_v59 = vadd.f32 %v8027_v36, %v9731_v11  ;;  %v2435_v5 = vpop.f32.mrb[101].mxu1 }
 0x1cf   : > { %v2436_v16 = vadd.f32 %v9731_v11, %v2435_v5  ;;  %5710 = vperm.xlu1 %8432, %v3384_v22   ;;  %v8028_v32 = vpop.f32.mrb[102].mxu1 }
 0x1d0   : > { %v3195_v60 = vmax.f32 %v2444_v59, 0.0  ;;  %v2447_v46 = vadd.f32 %v8028_v32, %v9731_v11  ;;  %5700 = vperm.xlu0 %8433, %v3382_v54   ;;  %v2438_v58 = vpop.f32.mrb[103].mxu1  ;;  %8229 = vmatprep.mubr.bf16.mxu0 %v3573_v6 }
 0x1d1   : > { %v3193_v9 = vmax.f32 %v2436_v16, 0.0  ;;  %v2439_v31 = vadd.f32 %v9731_v11, %v2438_v58  ;;  %8230 = vmatmul.mubr.bf16.vlgmr.msra.gmra.mrb[96].mxu0 %v3574_v43 }
 0x1d2   : > { %v3196_v29 = vmax.f32 %v2447_v46, 0.0  ;;  %8134 = vmatmul.mubr.bf16.gmra.mrb[208].mxu1 %v9635_v28  ;;  %v3387_v34 = vsel %vm3188_vm1, %v2444_v59, %v3195_v60 }
 0x1d3   : > { %v3194_v52 = vmax.f32 %v2439_v31, 0.0  ;;  %8137 = vmatprep.mubr.bf16.mxu1 %v9644_v55  ;;  %v3385_v2 = vsel %vm3188_vm1, %v2436_v16, %v3193_v9 }
 0x1d4   : > { %5725 = vperm.xlu0 %8433, %v3387_v34   ;;  %v3388_v49 = vsel %vm3188_vm1, %v2447_v46, %v3196_v29 }
 0x1d5   : > { %5730 = vperm.xlu1 %8432, %v3388_v49   ;;  %v3576_v8 = vpack.c.bf16 %v3388_v49, %v3387_v34  ;;  %v8031_v25 = vpop.f32.mrb[104].mxu1  ;;  %v3386_v7 = vsel %vm3188_vm1, %v2439_v31, %v3194_v52 }
 0x1d6   : > { %v2460_v28 = vadd.f32 %v8031_v25, %v9731_v11  ;;  %v2451_v42 = vpop.f32.mrb[105].mxu1  ;;  %v3575_v12 = vpack.c.bf16 %v3386_v7, %v3385_v2 }
 0x1d7   : > { %v2452_v30 = vadd.f32 %v9731_v11, %v2451_v42  ;;  %v8032_v55 = vpop.f32.mrb[106].mxu1 }
 0x1d8   : > { %v3199_v22 = vmax.f32 %v2460_v28, 0.0  ;;  %v2463_v43 = vadd.f32 %v8032_v55, %v9731_v11  ;;  %5715 = vperm.xlu0 %8433, %v3385_v2   ;;  %v2454_v54 = vpop.f32.mrb[107].mxu1  ;;  %8233 = vmatprep.mubr.bf16.mxu0 %v3575_v12 }
 0x1d9   : > { %v3197_v36 = vmax.f32 %v2452_v30, 0.0  ;;  %v2455_v6 = vadd.f32 %v9731_v11, %v2454_v54  ;;  %5720 = vperm.xlu1 %8432, %v3386_v7   ;;  %8234 = vmatmul.mubr.bf16.gmra.mrb[100].mxu0 %v3576_v8 }
 0x1da   : > { %v3200_v59 = vmax.f32 %v2463_v43, 0.0  ;;  %8138 = vmatmul.mubr.bf16.gmra.mrb[212].mxu1 %v9639_v51  ;;  %v3391_v5 = vsel %vm3188_vm1, %v2460_v28, %v3199_v22 }
 0x1db   : > { %v3198_v16 = vmax.f32 %v2455_v6, 0.0  ;;  %8141 = vmatprep.mubr.bf16.mxu1 %v9648_v15  ;;  %v3389_v58 = vsel %vm3188_vm1, %v2452_v30, %v3197_v36 }
 0x1dc   : > { %5745 = vperm.xlu0 %8433, %v3391_v5   ;;  %v3392_v32 = vsel %vm3188_vm1, %v2463_v43, %v3200_v59 }
 0x1dd   : > { %5750 = vperm.xlu1 %8432, %v3392_v32   ;;  %v3578_v60 = vpack.c.bf16 %v3392_v32, %v3391_v5  ;;  %v8035_v46 = vpop.f32.mrb[108].mxu1  ;;  %v3390_v9 = vsel %vm3188_vm1, %v2455_v6, %v3198_v16 }
 0x1de   : > { %v2476_v51 = vadd.f32 %v8035_v46, %v9731_v11  ;;  %v2467_v31 = vpop.f32.mrb[109].mxu1  ;;  %v3577_v29 = vpack.c.bf16 %v3390_v9, %v3389_v58 }
 0x1df   : > { %v2468_v34 = vadd.f32 %v9731_v11, %v2467_v31  ;;  %v8036_v15 = vpop.f32.mrb[110].mxu1 }
 0x1e0   : > { %v3203_v52 = vmax.f32 %v2476_v51, 0.0  ;;  %v2479_v49 = vadd.f32 %v8036_v15, %v9731_v11  ;;  %5735 = vperm.xlu0 %8433, %v3389_v58   ;;  %v2470_v8 = vpop.f32.mrb[111].mxu1  ;;  %8237 = vmatprep.mubr.bf16.mxu0 %v3577_v29 }
 0x1e1   : > { %v3201_v25 = vmax.f32 %v2468_v34, 0.0  ;;  %v2471_v2 = vadd.f32 %v9731_v11, %v2470_v8  ;;  %5740 = vperm.xlu1 %8432, %v3390_v9   ;;  %8238 = vmatmul.mubr.bf16.gmra.mrb[104].mxu0 %v3578_v60 }
 0x1e2   : > { %v3204_v7 = vmax.f32 %v2479_v49, 0.0  ;;  %8142 = vmatmul.mubr.bf16.gmra.mrb[216].mxu1 %v9646_v13  ;;  %v3395_v28 = vsel %vm3188_vm1, %v2476_v51, %v3203_v52 }
 0x1e3   : > { %v3202_v42 = vmax.f32 %v2471_v2, 0.0  ;;  %8145 = vmatprep.mubr.bf16.mxu1 %v9652_v39  ;;  %v3393_v22 = vsel %vm3188_vm1, %v2468_v34, %v3201_v25 }
 0x1e4   : > { %5765 = vperm.xlu0 %8433, %v3395_v28   ;;  %v3396_v12 = vsel %vm3188_vm1, %v2479_v49, %v3204_v7 }
 0x1e5   : > { %5770 = vperm.xlu1 %8432, %v3396_v12   ;;  %v3580_v30 = vpack.c.bf16 %v3396_v12, %v3395_v28  ;;  %v8039_v55 = vpop.f32.mrb[112].mxu1  ;;  %v3394_v43 = vsel %vm3188_vm1, %v2471_v2, %v3202_v42 }
 0x1e6   : > { %v2492_v13 = vadd.f32 %v8039_v55, %v9731_v11  ;;  %v2483_v54 = vpop.f32.mrb[113].mxu1  ;;  %v3579_v36 = vpack.c.bf16 %v3394_v43, %v3393_v22 }
 0x1e7   : > { %v2484_v6 = vadd.f32 %v9731_v11, %v2483_v54  ;;  %v8040_v39 = vpop.f32.mrb[114].mxu1 }
 0x1e8   : > { %v3207_v59 = vmax.f32 %v2492_v13, 0.0  ;;  %v2495_v5 = vadd.f32 %v8040_v39, %v9731_v11  ;;  %5755 = vperm.xlu0 %8433, %v3393_v22   ;;  %v2486_v16 = vpop.f32.mrb[115].mxu1  ;;  %8241 = vmatprep.mubr.bf16.mxu0 %v3579_v36 }
 0x1e9   : > { %v3205_v32 = vmax.f32 %v2484_v6, 0.0  ;;  %v2487_v60 = vadd.f32 %v9731_v11, %v2486_v16  ;;  %5760 = vperm.xlu1 %8432, %v3394_v43   ;;  %8242 = vmatmul.mubr.bf16.gmra.mrb[108].mxu0 %v3580_v30 }
 0x1ea   : > { %v3208_v46 = vmax.f32 %v2495_v5, 0.0  ;;  %8146 = vmatmul.mubr.bf16.gmra.mrb[220].mxu1 %v9650_v37  ;;  %v3399_v58 = vsel %vm3188_vm1, %v2492_v13, %v3207_v59 }
 0x1eb   : > { %v3206_v9 = vmax.f32 %v2487_v60, 0.0  ;;  %8149 = vmatprep.mubr.bf16.mxu1 %v9659_v0  ;;  %v3397_v34 = vsel %vm3188_vm1, %v2484_v6, %v3205_v32 }
 0x1ec   : > { %5785 = vperm.xlu0 %8433, %v3399_v58   ;;  %v3400_v51 = vsel %vm3188_vm1, %v2495_v5, %v3208_v46 }
 0x1ed   : > { %5790 = vperm.xlu1 %8432, %v3400_v51   ;;  %v3582_v31 = vpack.c.bf16 %v3400_v51, %v3399_v58  ;;  %v8043_v29 = vpop.f32.mrb[116].mxu1  ;;  %v3398_v15 = vsel %vm3188_vm1, %v2487_v60, %v3206_v9 }
 0x1ee   : > { %v2508_v37 = vadd.f32 %v8043_v29, %v9731_v11  ;;  %v2499_v52 = vpop.f32.mrb[117].mxu1  ;;  %v3581_v49 = vpack.c.bf16 %v3398_v15, %v3397_v34 }
 0x1ef   : > { %v2500_v8 = vadd.f32 %v9731_v11, %v2499_v52  ;;  %v8044_v0 = vpop.f32.mrb[118].mxu1 }
 0x1f0   : > { %v3211_v25 = vmax.f32 %v2508_v37, 0.0  ;;  %v2511_v2 = vadd.f32 %v8044_v0, %v9731_v11  ;;  %5775 = vperm.xlu0 %8433, %v3397_v34   ;;  %v2502_v7 = vpop.f32.mrb[119].mxu1  ;;  %8245 = vmatprep.mubr.bf16.mxu0 %v3581_v49 }
 0x1f1   : > { %v3209_v28 = vmax.f32 %v2500_v8, 0.0  ;;  %v2503_v42 = vadd.f32 %v9731_v11, %v2502_v7  ;;  %5780 = vperm.xlu1 %8432, %v3398_v15   ;;  %8246 = vmatmul.mubr.bf16.gmra.mrb[112].mxu0 %v3582_v31 }
 0x1f2   : > { %v3212_v12 = vmax.f32 %v2511_v2, 0.0  ;;  %8150 = vmatmul.mubr.bf16.gmra.mrb[224].mxu1 %v9657_v62  ;;  %v3403_v30 = vsel %vm3188_vm1, %v2508_v37, %v3211_v25 }
 0x1f3   : > { %v3210_v55 = vmax.f32 %v2503_v42, 0.0  ;;  %8153 = vmatprep.mubr.bf16.mxu1 %v9663_v26  ;;  %v3401_v54 = vsel %vm3188_vm1, %v2500_v8, %v3209_v28 }
 0x1f4   : > { %5805 = vperm.xlu0 %8433, %v3403_v30   ;;  %v3404_v22 = vsel %vm3188_vm1, %v2511_v2, %v3212_v12 }
 0x1f5   : > { %5810 = vperm.xlu1 %8432, %v3404_v22   ;;  %v3584_v43 = vpack.c.bf16 %v3404_v22, %v3403_v30  ;;  %v8047_v13 = vpop.f32.mrb[120].mxu1  ;;  %v3402_v36 = vsel %vm3188_vm1, %v2503_v42, %v3210_v55 }
 0x1f6   : > { %v2524_v62 = vadd.f32 %v8047_v13, %v9731_v11  ;;  %v2515_v6 = vpop.f32.mrb[121].mxu1  ;;  %v3583_v39 = vpack.c.bf16 %v3402_v36, %v3401_v54 }
 0x1f7   : > { %v2516_v59 = vadd.f32 %v9731_v11, %v2515_v6  ;;  %v8048_v26 = vpop.f32.mrb[122].mxu1 }
 0x1f8   : > { %v3215_v5 = vmax.f32 %v2524_v62, 0.0  ;;  %v2527_v16 = vadd.f32 %v8048_v26, %v9731_v11  ;;  %5795 = vperm.xlu0 %8433, %v3401_v54   ;;  %v2518_v32 = vpop.f32.mrb[123].mxu1  ;;  %8249 = vmatprep.mubr.bf16.mxu0 %v3583_v39 }
 0x1f9   : > { %v3213_v60 = vmax.f32 %v2516_v59, 0.0  ;;  %v2519_v46 = vadd.f32 %v9731_v11, %v2518_v32  ;;  %5800 = vperm.xlu1 %8432, %v3402_v36   ;;  %8250 = vmatmul.mubr.bf16.gmra.mrb[116].mxu0 %v3584_v43 }
 0x1fa   : > { %v3216_v58 = vmax.f32 %v2527_v16, 0.0  ;;  %8154 = vmatmul.mubr.bf16.gmra.mrb[228].mxu1 %v9661_v24  ;;  %v3407_v9 = vsel %vm3188_vm1, %v2524_v62, %v3215_v5 }
 0x1fb   : > { %v3214_v51 = vmax.f32 %v2519_v46, 0.0  ;;  %8157 = vmatprep.mubr.bf16.mxu1 %v9667_v56  ;;  %v3405_v15 = vsel %vm3188_vm1, %v2516_v59, %v3213_v60 }
 0x1fc   : > { %5825 = vperm.xlu0 %8433, %v3407_v9   ;;  %v3408_v31 = vsel %vm3188_vm1, %v2527_v16, %v3216_v58 }
 0x1fd   : > { %5830 = vperm.xlu1 %8432, %v3408_v31   ;;  %v3586_v29 = vpack.c.bf16 %v3408_v31, %v3407_v9  ;;  %v8051_v34 = vpop.f32.mrb[124].mxu1  ;;  %v3406_v37 = vsel %vm3188_vm1, %v2519_v46, %v3214_v51 }
 0x1fe   : > { %v2540_v24 = vadd.f32 %v8051_v34, %v9731_v11  ;;  %v2531_v52 = vpop.f32.mrb[125].mxu1  ;;  %v3585_v49 = vpack.c.bf16 %v3406_v37, %v3405_v15 }
 0x1ff   : > { %v2532_v8 = vadd.f32 %v9731_v11, %v2531_v52  ;;  %v8052_v56 = vpop.f32.mrb[126].mxu1 }
 0x200   : > { %v3219_v0 = vmax.f32 %v2540_v24, 0.0  ;;  %v2543_v25 = vadd.f32 %v8052_v56, %v9731_v11  ;;  %5815 = vperm.xlu0 %8433, %v3405_v15   ;;  %v2534_v2 = vpop.f32.mrb[127].mxu1  ;;  %8253 = vmatprep.mubr.bf16.mxu0 %v3585_v49 }
 0x201   : > { %v3217_v7 = vmax.f32 %v2532_v8, 0.0  ;;  %v2535_v28 = vadd.f32 %v9731_v11, %v2534_v2  ;;  %5820 = vperm.xlu1 %8432, %v3406_v37   ;;  %8254 = vmatmul.mubr.bf16.gmra.mrb[120].mxu0 %v3586_v29 }
 0x202   : > { %v3220_v42 = vmax.f32 %v2543_v25, 0.0  ;;  %8158 = vmatmul.mubr.bf16.gmra.mrb[232].mxu1 %v9665_v53  ;;  %v3411_v12 = vsel %vm3188_vm1, %v2540_v24, %v3219_v0 }
 0x203   : > { %v3218_v30 = vmax.f32 %v2535_v28, 0.0  ;;  %8161 = vmatprep.mubr.bf16.mxu1 %v9671_v21  ;;  %v3409_v13 = vsel %vm3188_vm1, %v2532_v8, %v3217_v7 }
 0x204   : > { %5845 = vperm.xlu0 %8433, %v3411_v12   ;;  %v3412_v55 = vsel %vm3188_vm1, %v2543_v25, %v3220_v42 }
 0x205   : > { %5850 = vperm.xlu1 %8432, %v3412_v55   ;;  %v3588_v22 = vpack.c.bf16 %v3412_v55, %v3411_v12  ;;  %v8055_v43 = vpop.f32.mrb[128].mxu1  ;;  %v3410_v54 = vsel %vm3188_vm1, %v2535_v28, %v3218_v30 }
 0x206   : > { %v2556_v53 = vadd.f32 %v8055_v43, %v9731_v11  ;;  %v2547_v36 = vpop.f32.mrb[129].mxu1  ;;  %v3587_v62 = vpack.c.bf16 %v3410_v54, %v3409_v13 }
 0x207   : > { %v2548_v6 = vadd.f32 %v9731_v11, %v2547_v36  ;;  %v8056_v21 = vpop.f32.mrb[130].mxu1 }
 0x208   : > { %v3223_v39 = vmax.f32 %v2556_v53, 0.0  ;;  %v2559_v59 = vadd.f32 %v8056_v21, %v9731_v11  ;;  %5835 = vperm.xlu0 %8433, %v3409_v13   ;;  %v2550_v26 = vpop.f32.mrb[131].mxu1  ;;  %8257 = vmatprep.mubr.bf16.mxu0 %v3587_v62 }
 0x209   : > { %v3221_v5 = vmax.f32 %v2548_v6, 0.0  ;;  %v2551_v16 = vadd.f32 %v9731_v11, %v2550_v26  ;;  %5840 = vperm.xlu1 %8432, %v3410_v54   ;;  %8258 = vmatmul.mubr.bf16.gmra.mrb[124].mxu0 %v3588_v22 }
 0x20a   : > { %v3224_v32 = vmax.f32 %v2559_v59, 0.0  ;;  %8162 = vmatmul.mubr.bf16.gmra.mrb[236].mxu1 %v9669_v19  ;;  %v3415_v60 = vsel %vm3188_vm1, %v2556_v53, %v3223_v39 }
 0x20b   : > { %v3222_v46 = vmax.f32 %v2551_v16, 0.0  ;;  %8165 = vmatprep.mubr.bf16.mxu1 %v9675_v50  ;;  %v3413_v31 = vsel %vm3188_vm1, %v2548_v6, %v3221_v5 }
 0x20c   : > { %5865 = vperm.xlu0 %8433, %v3415_v60   ;;  %v3416_v58 = vsel %vm3188_vm1, %v2559_v59, %v3224_v32 }
 0x20d   : > { %5870 = vperm.xlu1 %8432, %v3416_v58   ;;  %v3590_v9 = vpack.c.bf16 %v3416_v58, %v3415_v60  ;;  %v8059_v51 = vpop.f32.mrb[132].mxu1  ;;  %v3414_v29 = vsel %vm3188_vm1, %v2551_v16, %v3222_v46 }
 0x20e   : > { %v2572_v19 = vadd.f32 %v8059_v51, %v9731_v11  ;;  %v2563_v34 = vpop.f32.mrb[133].mxu1  ;;  %v3589_v15 = vpack.c.bf16 %v3414_v29, %v3413_v31 }
 0x20f   : > { %v2564_v37 = vadd.f32 %v9731_v11, %v2563_v34  ;;  %v8060_v50 = vpop.f32.mrb[134].mxu1 }
 0x210   : > { %v3227_v24 = vmax.f32 %v2572_v19, 0.0  ;;  %v2575_v52 = vadd.f32 %v8060_v50, %v9731_v11  ;;  %5855 = vperm.xlu0 %8433, %v3413_v31   ;;  %v2566_v49 = vpop.f32.mrb[135].mxu1  ;;  %8261 = vmatprep.mubr.bf16.mxu0 %v3589_v15 }
 0x211   : > { %v3225_v8 = vmax.f32 %v2564_v37, 0.0  ;;  %v2567_v56 = vadd.f32 %v9731_v11, %v2566_v49  ;;  %5860 = vperm.xlu1 %8432, %v3414_v29   ;;  %8262 = vmatmul.mubr.bf16.gmra.mrb[128].mxu0 %v3590_v9 }
 0x212   : > { %v3228_v0 = vmax.f32 %v2575_v52, 0.0  ;;  %8166 = vmatmul.mubr.bf16.gmra.mrb[240].mxu1 %v9673_v47  ;;  %v3419_v25 = vsel %vm3188_vm1, %v2572_v19, %v3227_v24 }
 0x213   : > { %v3226_v2 = vmax.f32 %v2567_v56, 0.0  ;;  %8169 = vmatprep.mubr.bf16.mxu1 %v9679_v20  ;;  %v3417_v12 = vsel %vm3188_vm1, %v2564_v37, %v3225_v8 }
 0x214   : > { %5885 = vperm.xlu0 %8433, %v3419_v25   ;;  %v3420_v7 = vsel %vm3188_vm1, %v2575_v52, %v3228_v0 }
 0x215   : > { %5890 = vperm.xlu1 %8432, %v3420_v7   ;;  %v3592_v28 = vpack.c.bf16 %v3420_v7, %v3419_v25  ;;  %v8063_v42 = vpop.f32.mrb[136].mxu1  ;;  %v3418_v30 = vsel %vm3188_vm1, %v2567_v56, %v3226_v2 }
 0x216   : > { %v2588_v47 = vadd.f32 %v8063_v42, %v9731_v11  ;;  %v2579_v55 = vpop.f32.mrb[137].mxu1  ;;  %v3591_v22 = vpack.c.bf16 %v3418_v30, %v3417_v12 }
 0x217   : > { %v2580_v43 = vadd.f32 %v9731_v11, %v2579_v55  ;;  %v8064_v20 = vpop.f32.mrb[138].mxu1 }
 0x218   : > { %v3231_v13 = vmax.f32 %v2588_v47, 0.0  ;;  %v2591_v54 = vadd.f32 %v8064_v20, %v9731_v11  ;;  %5875 = vperm.xlu0 %8433, %v3417_v12   ;;  %v2582_v53 = vpop.f32.mrb[139].mxu1  ;;  %8265 = vmatprep.mubr.bf16.mxu0 %v3591_v22 }
 0x219   : > { %v3229_v36 = vmax.f32 %v2580_v43, 0.0  ;;  %v2583_v62 = vadd.f32 %v9731_v11, %v2582_v53  ;;  %5880 = vperm.xlu1 %8432, %v3418_v30   ;;  %8266 = vmatmul.mubr.bf16.gmra.mrb[132].mxu0 %v3592_v28 }
 0x21a   : > { %v3232_v6 = vmax.f32 %v2591_v54, 0.0  ;;  %8170 = vmatmul.mubr.bf16.gmra.mrb[244].mxu1 %v9677_v17  ;;  %v3423_v21 = vsel %vm3188_vm1, %v2588_v47, %v3231_v13 }
 0x21b   : > { %v3230_v39 = vmax.f32 %v2583_v62, 0.0  ;;  %8173 = vmatprep.mubr.bf16.mxu1 %v9683_v57  ;;  %v3421_v16 = vsel %vm3188_vm1, %v2580_v43, %v3229_v36 }
 0x21c   : > { %5905 = vperm.xlu0 %8433, %v3423_v21   ;;  %v3424_v59 = vsel %vm3188_vm1, %v2591_v54, %v3232_v6 }
 0x21d   : > { %5910 = vperm.xlu1 %8432, %v3424_v59   ;;  %v3594_v26 = vpack.c.bf16 %v3424_v59, %v3423_v21  ;;  %v8067_v5 = vpop.f32.mrb[140].mxu1  ;;  %v3422_v32 = vsel %vm3188_vm1, %v2583_v62, %v3230_v39 }
 0x21e   : > { %v2604_v17 = vadd.f32 %v8067_v5, %v9731_v11  ;;  %v2595_v60 = vpop.f32.mrb[141].mxu1  ;;  %v3593_v46 = vpack.c.bf16 %v3422_v32, %v3421_v16 }
 0x21f   : > { %v2596_v58 = vadd.f32 %v9731_v11, %v2595_v60  ;;  %v8068_v57 = vpop.f32.mrb[142].mxu1 }
 0x220   : > { %v3235_v9 = vmax.f32 %v2604_v17, 0.0  ;;  %v2607_v51 = vadd.f32 %v8068_v57, %v9731_v11  ;;  %5895 = vperm.xlu0 %8433, %v3421_v16   ;;  %v2598_v31 = vpop.f32.mrb[143].mxu1  ;;  %8269 = vmatprep.mubr.bf16.mxu0 %v3593_v46 }
 0x221   : > { %v3233_v29 = vmax.f32 %v2596_v58, 0.0  ;;  %v2599_v19 = vadd.f32 %v9731_v11, %v2598_v31  ;;  %5900 = vperm.xlu1 %8432, %v3422_v32   ;;  %8270 = vmatmul.mubr.bf16.gmra.mrb[136].mxu0 %v3594_v26 }
 0x222   : > { %v3236_v34 = vmax.f32 %v2607_v51, 0.0  ;;  %8174 = vmatmul.mubr.bf16.gmra.mrb[248].mxu1 %v9681_v48  ;;  %v3427_v15 = vsel %vm3188_vm1, %v2604_v17, %v3235_v9 }
 0x223   : > { %v3234_v37 = vmax.f32 %v2599_v19, 0.0  ;;  %8177 = vmatprep.mubr.bf16.mxu1 %v9687_v27  ;;  %v3425_v49 = vsel %vm3188_vm1, %v2596_v58, %v3233_v29 }
 0x224   : > { %5925 = vperm.xlu0 %8433, %v3427_v15   ;;  %v3428_v50 = vsel %vm3188_vm1, %v2607_v51, %v3236_v34 }
 0x225   : > { %5930 = vperm.xlu1 %8432, %v3428_v50   ;;  %v3596_v24 = vpack.c.bf16 %v3428_v50, %v3427_v15  ;;  %v8071_v52 = vpop.f32.mrb[144].mxu1  ;;  %v3426_v8 = vsel %vm3188_vm1, %v2599_v19, %v3234_v37 }
 0x226   : > { %v2620_v48 = vadd.f32 %v8071_v52, %v9731_v11  ;;  %v2611_v56 = vpop.f32.mrb[145].mxu1  ;;  %v3595_v0 = vpack.c.bf16 %v3426_v8, %v3425_v49 }
 0x227   : > { %v2612_v25 = vadd.f32 %v9731_v11, %v2611_v56  ;;  %v8072_v27 = vpop.f32.mrb[146].mxu1 }
 0x228   : > { %v3239_v2 = vmax.f32 %v2620_v48, 0.0  ;;  %v2623_v7 = vadd.f32 %v8072_v27, %v9731_v11  ;;  %5915 = vperm.xlu0 %8433, %v3425_v49   ;;  %v2614_v28 = vpop.f32.mrb[147].mxu1  ;;  %8273 = vmatprep.mubr.bf16.mxu0 %v3595_v0 }
 0x229   : > { %v3237_v42 = vmax.f32 %v2612_v25, 0.0  ;;  %v2615_v12 = vadd.f32 %v9731_v11, %v2614_v28  ;;  %5920 = vperm.xlu1 %8432, %v3426_v8   ;;  %8274 = vmatmul.mubr.bf16.gmra.mrb[140].mxu0 %v3596_v24 }
 0x22a   : > { %v3240_v30 = vmax.f32 %v2623_v7, 0.0  ;;  %8178 = vmatmul.mubr.bf16.gmra.mrb[252].mxu1 %v9685_v23  ;;  %v3431_v47 = vsel %vm3188_vm1, %v2620_v48, %v3239_v2 }
 0x22b   : > { %v3238_v55 = vmax.f32 %v2615_v12, 0.0  ;;  %8181 = vmatprep.mubr.bf16.mxu1 %v9691_v1  ;;  %v3429_v13 = vsel %vm3188_vm1, %v2612_v25, %v3237_v42 }
 0x22c   : > { %5945 = vperm.xlu0 %8433, %v3431_v47   ;;  %v3432_v22 = vsel %vm3188_vm1, %v2623_v7, %v3240_v30 }
 0x22d   : > { %5950 = vperm.xlu1 %8432, %v3432_v22   ;;  %v3598_v43 = vpack.c.bf16 %v3432_v22, %v3431_v47  ;;  %v8075_v20 = vpop.f32.mrb[148].mxu1  ;;  %v3430_v54 = vsel %vm3188_vm1, %v2615_v12, %v3238_v55 }
 0x22e   : > { %v2636_v23 = vadd.f32 %v8075_v20, %v9731_v11  ;;  %v2627_v53 = vpop.f32.mrb[149].mxu1  ;;  %v3597_v36 = vpack.c.bf16 %v3430_v54, %v3429_v13 }
 0x22f   : > { %v2628_v62 = vadd.f32 %v9731_v11, %v2627_v53  ;;  %v8076_v1 = vpop.f32.mrb[150].mxu1 }
 0x230   : > { %v3243_v6 = vmax.f32 %v2636_v23, 0.0  ;;  %v2639_v21 = vadd.f32 %v8076_v1, %v9731_v11  ;;  %5935 = vperm.xlu0 %8433, %v3429_v13   ;;  %v2630_v39 = vpop.f32.mrb[151].mxu1  ;;  %8277 = vmatprep.mubr.bf16.mxu0 %v3597_v36 }
 0x231   : > { %v3241_v59 = vmax.f32 %v2628_v62, 0.0  ;;  %v2631_v26 = vadd.f32 %v9731_v11, %v2630_v39  ;;  %5940 = vperm.xlu1 %8432, %v3430_v54   ;;  %8278 = vmatmul.mubr.bf16.gmra.mrb[144].mxu0 %v3598_v43 }
 0x232   : > { %v3244_v5 = vmax.f32 %v2639_v21, 0.0  ;;  %8182 = vmatmul.mubr.bf16.gmra.mrb[0].mxu1 %v9689_v61  ;;  %v3435_v16 = vsel %vm3188_vm1, %v2636_v23, %v3243_v6 }
 0x233   : > { %v3242_v32 = vmax.f32 %v2631_v26, 0.0  ;;  %8185 = vmatprep.mubr.bf16.mxu1 %v9695_v41  ;;  %v3433_v58 = vsel %vm3188_vm1, %v2628_v62, %v3241_v59 }
 0x234   : > { %5965 = vperm.xlu0 %8433, %v3435_v16   ;;  %v3436_v17 = vsel %vm3188_vm1, %v2639_v21, %v3244_v5 }
 0x235   : > { %5970 = vperm.xlu1 %8432, %v3436_v17   ;;  %v3600_v60 = vpack.c.bf16 %v3436_v17, %v3435_v16  ;;  %v8079_v46 = vpop.f32.mrb[152].mxu1  ;;  %v3434_v57 = vsel %vm3188_vm1, %v2631_v26, %v3242_v32 }
 0x236   : > { %v2652_v61 = vadd.f32 %v8079_v46, %v9731_v11  ;;  %v2643_v9 = vpop.f32.mrb[153].mxu1  ;;  %v3599_v51 = vpack.c.bf16 %v3434_v57, %v3433_v58 }
 0x237   : > { %v2644_v31 = vadd.f32 %v9731_v11, %v2643_v9  ;;  %v8080_v41 = vpop.f32.mrb[154].mxu1 }
 0x238   : > { %v3247_v29 = vmax.f32 %v2652_v61, 0.0  ;;  %v2655_v19 = vadd.f32 %v8080_v41, %v9731_v11  ;;  %5955 = vperm.xlu0 %8433, %v3433_v58   ;;  %v2646_v34 = vpop.f32.mrb[155].mxu1  ;;  %8281 = vmatprep.mubr.bf16.mxu0 %v3599_v51 }
 0x239   : > { %v3245_v15 = vmax.f32 %v2644_v31, 0.0  ;;  %v2647_v37 = vadd.f32 %v9731_v11, %v2646_v34  ;;  %5960 = vperm.xlu1 %8432, %v3434_v57   ;;  %8282 = vmatmul.mubr.bf16.gmra.mrb[148].mxu0 %v3600_v60  ;;  %v12746_v60 = vld [vmem:[#allocation3_spill] sm:$0xff] }
 0x23a   : > { %v3248_v50 = vmax.f32 %v2655_v19, 0.0  ;;  %8186 = vmatmul.mubr.bf16.gmra.mrb[4].mxu1 %v9693_v38  ;;  %v3439_v24 = vsel %vm3188_vm1, %v2652_v61, %v3247_v29 }
 0x23b   : > { %v3246_v52 = vmax.f32 %v2647_v37, 0.0  ;;  %8189 = vmatprep.mubr.bf16.mxu1 %v9699_v18  ;;  %v3437_v56 = vsel %vm3188_vm1, %v2644_v31, %v3245_v15 }
 0x23c   : > { %5985 = vperm.xlu0 %8433, %v3439_v24   ;;  %v3440_v49 = vsel %vm3188_vm1, %v2655_v19, %v3248_v50 }
 0x23d   : > { %5990 = vperm.xlu1 %8432, %v3440_v49   ;;  %v3602_v8 = vpack.c.bf16 %v3440_v49, %v3439_v24  ;;  %v8083_v48 = vpop.f32.mrb[156].mxu1  ;;  %v3438_v0 = vsel %vm3188_vm1, %v2647_v37, %v3246_v52 }
 0x23e   : > { %v2668_v38 = vadd.f32 %v8083_v48, %v9731_v11  ;;  %v2659_v25 = vpop.f32.mrb[157].mxu1  ;;  %v3601_v27 = vpack.c.bf16 %v3438_v0, %v3437_v56 }
 0x23f   : > { %v2660_v2 = vadd.f32 %v9731_v11, %v2659_v25  ;;  %v8084_v18 = vpop.f32.mrb[158].mxu1 }
 0x240   : > { %v3251_v7 = vmax.f32 %v2668_v38, 0.0  ;;  %v2671_v28 = vadd.f32 %v8084_v18, %v9731_v11  ;;  %5975 = vperm.xlu0 %8433, %v3437_v56   ;;  %v2662_v42 = vpop.f32.mrb[159].mxu1  ;;  %8285 = vmatprep.mubr.bf16.mxu0 %v3601_v27 }
 0x241   : > { %v3249_v12 = vmax.f32 %v2660_v2, 0.0  ;;  %v2663_v30 = vadd.f32 %v9731_v11, %v2662_v42  ;;  %5980 = vperm.xlu1 %8432, %v3438_v0   ;;  %8286 = vmatmul.mubr.bf16.gmra.mrb[152].mxu0 %v3602_v8  ;;  %v12747_v8 = vld [vmem:[#allocation2_spill] sm:$0xff] }
 0x242   : > { %v3252_v47 = vmax.f32 %v2671_v28, 0.0  ;;  %8190 = vmatmul.mubr.bf16.gmra.mrb[8].mxu1 %v9697_v14  ;;  %v3443_v55 = vsel %vm3188_vm1, %v2668_v38, %v3251_v7 }
 0x243   : > { %v3250_v22 = vmax.f32 %v2663_v30, 0.0  ;;  %8193 = vmatprep.mubr.bf16.mxu1 %v9703_v3  ;;  %v3441_v54 = vsel %vm3188_vm1, %v2660_v2, %v3249_v12 }
 0x244   : > { %6005 = vperm.xlu0 %8433, %v3443_v55   ;;  %v3444_v43 = vsel %vm3188_vm1, %v2671_v28, %v3252_v47 }
 0x245   : > { %6010 = vperm.xlu1 %8432, %v3444_v43   ;;  %v3604_v20 = vpack.c.bf16 %v3444_v43, %v3443_v55  ;;  %v8087_v13 = vpop.f32.mrb[160].mxu1  ;;  %v3442_v23 = vsel %vm3188_vm1, %v2663_v30, %v3250_v22 }
 0x246   : > { %v2684_v14 = vadd.f32 %v8087_v13, %v9731_v11  ;;  %v2675_v53 = vpop.f32.mrb[161].mxu1  ;;  %v3603_v36 = vpack.c.bf16 %v3442_v23, %v3441_v54 }
 0x247   : > { %v2676_v62 = vadd.f32 %v9731_v11, %v2675_v53  ;;  %v8088_v3 = vpop.f32.mrb[162].mxu1 }
 0x248   : > { %v3255_v1 = vmax.f32 %v2684_v14, 0.0  ;;  %v2687_v6 = vadd.f32 %v8088_v3, %v9731_v11  ;;  %5995 = vperm.xlu0 %8433, %v3441_v54   ;;  %v2678_v21 = vpop.f32.mrb[163].mxu1  ;;  %8289 = vmatprep.mubr.bf16.mxu0 %v3603_v36 }
 0x249   : > { %v3253_v39 = vmax.f32 %v2676_v62, 0.0  ;;  %v2679_v59 = vadd.f32 %v9731_v11, %v2678_v21  ;;  %6000 = vperm.xlu1 %8432, %v3442_v23   ;;  %8290 = vmatmul.mubr.bf16.gmra.mrb[156].mxu0 %v3604_v20 }
 0x24a   : > { %v3256_v26 = vmax.f32 %v2687_v6, 0.0  ;;  %v9964_v5 = vpop.permute.xlu1 %5705  ;;  %8194 = vmatmul.mubr.bf16.gmra.mrb[12].mxu1 %v9701_v63  ;;  %v3447_v16 = vsel %vm3188_vm1, %v2684_v14, %v3255_v1 }
 0x24b   : > { %v3254_v32 = vmax.f32 %v2679_v59, 0.0  ;;  %v9969_v17 = vpop.permute.xlu0 %5695  ;;  %8197 = vmatprep.mubr.bf16.mxu1 %v12746_v60  ;;  %v3445_v61 = vsel %vm3188_vm1, %v2676_v62, %v3253_v39 }
 0x24c   : > { %6025 = vperm.xlu0 %8433, %v3447_v16   ;;  %v3448_v46 = vsel %vm3188_vm1, %v2687_v6, %v3256_v26 }
 0x24d   : > { %6030 = vperm.xlu1 %8432, %v3448_v46   ;;  %v3606_v58 = vpack.c.bf16 %v3448_v46, %v3447_v16  ;;  %v8091_v57 = vpop.f32.mrb[164].mxu1  ;;  %v3446_v63 = vsel %vm3188_vm1, %v2679_v59, %v3254_v32 }
 0x24e   : > { %v2700_v9 = vadd.f32 %v8091_v57, %v9731_v11  ;;  %v2691_v51 = vpop.f32.mrb[165].mxu1  ;;  %v3605_v31 = vpack.c.bf16 %v3446_v63, %v3445_v61  ;;  %v9982_v15 = vpop.permute.xlu1 %5710 }
 0x24f   : > { %v2692_v41 = vadd.f32 %v9731_v11, %v2691_v51  ;;  %v9980_v29 = vpop.permute.xlu0 %5700  ;;  %v8092_v19 = vpop.f32.mrb[166].mxu1 }
 0x250   : > { %v3259_v34 = vmax.f32 %v2700_v9, 0.0  ;;  %v2703_v37 = vadd.f32 %v8092_v19, %v9731_v11  ;;  %6015 = vperm.xlu0 %8433, %v3445_v61   ;;  %v2694_v50 = vpop.f32.mrb[167].mxu1  ;;  %8293 = vmatprep.mubr.bf16.mxu0 %v3605_v31 }
 0x251   : > { %v3257_v24 = vmax.f32 %v2692_v41, 0.0  ;;  %v2695_v52 = vadd.f32 %v9731_v11, %v2694_v50  ;;  %6020 = vperm.xlu1 %8432, %v3446_v63   ;;  %8294 = vmatmul.mubr.bf16.gmra.mrb[160].mxu0 %v3606_v58  ;;  %v10032_v63 = vld [vmem:[%s12740_s3] ss:$0 sm:$0xff] }
 0x252   : > { %v3260_v49 = vmax.f32 %v2703_v37, 0.0  ;;  %8198 = vmatmul.mubr.bf16.gmra.mrb[16].mxu1 %v12747_v8  ;;  %v3451_v48 = vsel %vm3188_vm1, %v2700_v9, %v3259_v34 }
 0x253   : > { %v3258_v56 = vmax.f32 %v2695_v52, 0.0  ;;  %v9989_v0 = vpop.permute.xlu0 %5725  ;;  %8201 = vmatprep.mubr.bf16.mxu1 %v9711_v44  ;;  %v3449_v18 = vsel %vm3188_vm1, %v2692_v41, %v3257_v24 }
 0x254   : > { %v9992_v38 = vpop.permute.xlu1 %5730  ;;  %6045 = vperm.xlu0 %8433, %v3451_v48   ;;  %v3452_v25 = vsel %vm3188_vm1, %v2703_v37, %v3260_v49 }
 0x255   : > { %6050 = vperm.xlu1 %8432, %v3452_v25   ;;  %v3608_v27 = vpack.c.bf16 %v3452_v25, %v3451_v48  ;;  %v8095_v2 = vpop.f32.mrb[168].mxu1  ;;  %v3450_v7 = vsel %vm3188_vm1, %v2695_v52, %v3258_v56 }
 0x256   : > { %v2716_v28 = vadd.f32 %v8095_v2, %v9731_v11  ;;  %v2707_v42 = vpop.f32.mrb[169].mxu1  ;;  %v3607_v12 = vpack.c.bf16 %v3450_v7, %v3449_v18 }
 0x257   : > { %v2708_v44 = vadd.f32 %v9731_v11, %v2707_v42  ;;  %v10002_v30 = vpop.permute.xlu0 %5715  ;;  %v8096_v47 = vpop.f32.mrb[170].mxu1 }
 0x258   : > { %v3263_v55 = vmax.f32 %v2716_v28, 0.0  ;;  %v2719_v22 = vadd.f32 %v8096_v47, %v9731_v11  ;;  %v10005_v43 = vpop.permute.xlu1 %5720  ;;  %6035 = vperm.xlu0 %8433, %v3449_v18   ;;  %v2710_v20 = vpop.f32.mrb[171].mxu1  ;;  %8297 = vmatprep.mubr.bf16.mxu0 %v3607_v12 }
 0x259   : > { %v3261_v13 = vmax.f32 %v2708_v44, 0.0  ;;  %v2711_v54 = vadd.f32 %v9731_v11, %v2710_v20  ;;  %6040 = vperm.xlu1 %8432, %v3450_v7   ;;  %8298 = vmatmul.mubr.bf16.gmra.mrb[164].mxu0 %v3608_v27 }
 0x25a   : > { %v3264_v23 = vmax.f32 %v2719_v22, 0.0  ;;  %8202 = vmatmul.mubr.bf16.gmra.mrb[20].mxu1 %v9709_v33  ;;  %v3455_v14 = vsel %vm3188_vm1, %v2716_v28, %v3263_v55 }
 0x25b   : > { %v3262_v53 = vmax.f32 %v2711_v54, 0.0  ;;  %v10011_v36 = vpop.permute.xlu0 %5745  ;;  %8205 = vmatprep.mubr.bf16.mxu1 %v9715_v40  ;;  %v3453_v33 = vsel %vm3188_vm1, %v2708_v44, %v3261_v13 }
 0x25c   : > { %v10014_v62 = vpop.permute.xlu1 %5750  ;;  %6065 = vperm.xlu0 %8433, %v3455_v14   ;;  %v3456_v3 = vsel %vm3188_vm1, %v2719_v22, %v3264_v23 }
 0x25d   : > { %6070 = vperm.xlu1 %8432, %v3456_v3   ;;  %v3610_v1 = vpack.c.bf16 %v3456_v3, %v3455_v14  ;;  %v8099_v6 = vpop.f32.mrb[172].mxu1  ;;  %v3454_v21 = vsel %vm3188_vm1, %v2711_v54, %v3262_v53 }
 0x25e   : > { %v2732_v39 = vadd.f32 %v8099_v6, %v9731_v11  ;;  %v2723_v59 = vpop.f32.mrb[173].mxu1  ;;  %v3609_v26 = vpack.c.bf16 %v3454_v21, %v3453_v33 }
 0x25f   : > { %v2724_v40 = vadd.f32 %v9731_v11, %v2723_v59  ;;  %v10024_v16 = vpop.permute.xlu0 %5735  ;;  %v8100_v32 = vpop.f32.mrb[174].mxu1 }
 0x260   : > { %v3267_v60 = vmax.f32 %v2732_v39, 0.0  ;;  %v2735_v46 = vadd.f32 %v8100_v32, %v9731_v11  ;;  %v10027_v58 = vpop.permute.xlu1 %5740  ;;  %6055 = vperm.xlu0 %8433, %v3453_v33   ;;  %v2726_v57 = vpop.f32.mrb[175].mxu1  ;;  %8301 = vmatprep.mubr.bf16.mxu0 %v3609_v26 }
 0x261   : > { %v3265_v61 = vmax.f32 %v2724_v40, 0.0  ;;  %v2727_v9 = vadd.f32 %v10032_v63, %v2726_v57  ;;  %6060 = vperm.xlu1 %8432, %v3454_v21   ;;  %8302 = vmatmul.mubr.bf16.gmra.mrb[168].mxu0 %v3610_v1 }
 0x262   : > { %v3268_v51 = vmax.f32 %v2735_v46, 0.0  ;;  %8206 = vmatmul.mubr.bf16.gmra.mrb[24].mxu1 %v9713_v10  ;;  %v3459_v11 = vsel %vm3188_vm1, %v2732_v39, %v3267_v60 }
 0x263   : > { %v3266_v31 = vmax.f32 %v2727_v9, 0.0  ;;  %v10038_v41 = vpop.permute.xlu0 %5765  ;;  %8209 = vmatprep.mubr.bf16.mxu1 %v9720_v45  ;;  %v3457_v10 = vsel %vm3188_vm1, %v2724_v40, %v3265_v61 }
 0x264   : > { %v10041_v19 = vpop.permute.xlu1 %5770  ;;  %6085 = vperm.xlu0 %8433, %v3459_v11   ;;  %v3460_v34 = vsel %vm3188_vm1, %v2735_v46, %v3268_v51 }
 0x265   : > { %6090 = vperm.xlu1 %8432, %v3460_v34   ;;  %v3612_v37 = vpack.c.bf16 %v3460_v34, %v3459_v11  ;;  %v8103_v50 = vpop.f32.mrb[176].mxu1  ;;  %v3458_v24 = vsel %vm3188_vm1, %v2727_v9, %v3266_v31 }
 0x266   : > { %v2748_v52 = vadd.f32 %v10032_v63, %v8103_v50  ;;  %v2739_v49 = vpop.f32.mrb[177].mxu1  ;;  %v3611_v8 = vpack.c.bf16 %v3458_v24, %v3457_v10 }
 0x267   : > { %v2740_v45 = vadd.f32 %v10032_v63, %v2739_v49  ;;  %v10051_v48 = vpop.permute.xlu0 %5755  ;;  %v8104_v56 = vpop.f32.mrb[178].mxu1 }
 0x268   : > { %v3271_v25 = vmax.f32 %v2748_v52, 0.0  ;;  %v2751_v27 = vadd.f32 %v10032_v63, %v8104_v56  ;;  %v10054_v2 = vpop.permute.xlu1 %5760  ;;  %6075 = vperm.xlu0 %8433, %v3457_v10   ;;  %v2742_v18 = vpop.f32.mrb[179].mxu1  ;;  %8305 = vmatprep.mubr.bf16.mxu0 %v3611_v8 }
 0x269   : > { %v3269_v7 = vmax.f32 %v2740_v45, 0.0  ;;  %v2743_v28 = vadd.f32 %v10032_v63, %v2742_v18  ;;  %6080 = vperm.xlu1 %8432, %v3458_v24   ;;  %8306 = vmatmul.mubr.bf16.gmra.mrb[172].mxu0 %v3612_v37 }
 0x26a   : > { %v3272_v42 = vmax.f32 %v2751_v27, 0.0  ;;  %8210 = vmatmul.mubr.bf16.gmra.mrb[28].mxu1 %v9718_v35  ;;  %v3463_v12 = vsel %vm3188_vm1, %v2748_v52, %v3271_v25 }
 0x26b   : > { %v3270_v44 = vmax.f32 %v2743_v28, 0.0  ;;  %v10060_v47 = vpop.permute.xlu0 %5785  ;;  %v3461_v54 = vsel %vm3188_vm1, %v2740_v45, %v3269_v7 }
 0x26c   : > { %v10062_v55 = vpop.permute.xlu1 %5790  ;;  %6105 = vperm.xlu0 %8433, %v3463_v12   ;;  %v3464_v22 = vsel %vm3188_vm1, %v2751_v27, %v3272_v42 }
 0x26d   : > { %6110 = vperm.xlu1 %8432, %v3464_v22   ;;  %v3614_v20 = vpack.c.bf16 %v3464_v22, %v3463_v12  ;;  %v8107_v13 = vpop.f32.mrb[180].mxu1  ;;  %v3462_v35 = vsel %vm3188_vm1, %v2743_v28, %v3270_v44 }
 0x26e   : > { %v2764_v23 = vadd.f32 %v10032_v63, %v8107_v13  ;;  %v2755_v14 = vpop.f32.mrb[181].mxu1  ;;  %v3613_v53 = vpack.c.bf16 %v3462_v35, %v3461_v54 }
 0x26f   : > { %v2756_v3 = vadd.f32 %v10032_v63, %v2755_v14  ;;  %v10072_v1 = vpop.permute.xlu0 %5775  ;;  %v8108_v6 = vpop.f32.mrb[182].mxu1 }
 0x270   : > { %v3275_v33 = vmax.f32 %v2764_v23, 0.0  ;;  %v2767_v21 = vadd.f32 %v10032_v63, %v8108_v6  ;;  %v10075_v39 = vpop.permute.xlu1 %5780  ;;  %6095 = vperm.xlu0 %8433, %v3461_v54   ;;  %v2758_v59 = vpop.f32.mrb[183].mxu1  ;;  %8309 = vmatprep.mubr.bf16.mxu0 %v3613_v53 }
 0x271   : > { %v3273_v26 = vmax.f32 %v2756_v3, 0.0  ;;  %v2759_v40 = vadd.f32 %v10032_v63, %v2758_v59  ;;  %6100 = vperm.xlu1 %8432, %v3462_v35   ;;  %8310 = vmatmul.mubr.bf16.gmra.mrb[176].mxu0 %v3614_v20 }
 0x272   : > { %v3276_v32 = vmax.f32 %v2767_v21, 0.0  ;;  %v3467_v60 = vsel %vm3188_vm1, %v2764_v23, %v3275_v33 }
 0x273   : > { %v3274_v46 = vmax.f32 %v2759_v40, 0.0  ;;  %v10080_v57 = vpop.permute.xlu0 %5805  ;;  %v3465_v31 = vsel %vm3188_vm1, %v2756_v3, %v3273_v26 }
 0x274   : > { %v10082_v61 = vpop.permute.xlu1 %5810  ;;  %6125 = vperm.xlu0 %8433, %v3467_v60   ;;  %v3468_v9 = vsel %vm3188_vm1, %v2767_v21, %v3276_v32 }
 0x275   : > { %6130 = vperm.xlu1 %8432, %v3468_v9   ;;  %v3616_v51 = vpack.c.bf16 %v3468_v9, %v3467_v60  ;;  %v8111_v11 = vpop.f32.mrb[184].mxu1  ;;  %v3466_v34 = vsel %vm3188_vm1, %v2759_v40, %v3274_v46 }
 0x276   : > { %v2780_v37 = vadd.f32 %v10032_v63, %v8111_v11  ;;  %v2771_v50 = vpop.f32.mrb[185].mxu1  ;;  %v3615_v10 = vpack.c.bf16 %v3466_v34, %v3465_v31 }
 0x277   : > { %v2772_v24 = vadd.f32 %v10032_v63, %v2771_v50  ;;  %v10092_v52 = vpop.permute.xlu0 %5795  ;;  %v8112_v49 = vpop.f32.mrb[186].mxu1 }
 0x278   : > { %v3279_v8 = vmax.f32 %v2780_v37, 0.0  ;;  %v2783_v45 = vadd.f32 %v10032_v63, %v8112_v49  ;;  %v10095_v56 = vpop.permute.xlu1 %5800  ;;  %6115 = vperm.xlu0 %8433, %v3465_v31   ;;  %v2774_v25 = vpop.f32.mrb[187].mxu1  ;;  %8313 = vmatprep.mubr.bf16.mxu0 %v3615_v10 }
 0x279   : > { %v3277_v27 = vmax.f32 %v2772_v24, 0.0  ;;  %v2775_v18 = vadd.f32 %v10032_v63, %v2774_v25  ;;  %6120 = vperm.xlu1 %8432, %v3466_v34   ;;  %8314 = vmatmul.mubr.bf16.gmra.mrb[180].mxu0 %v3616_v51 }
 0x27a   : > { %v3280_v7 = vmax.f32 %v2783_v45, 0.0  ;;  %v3471_v28 = vsel %vm3188_vm1, %v2780_v37, %v3279_v8 }
 0x27b   : > { %v3278_v42 = vmax.f32 %v2775_v18, 0.0  ;;  %v10100_v12 = vpop.permute.xlu0 %5825  ;;  %v3469_v54 = vsel %vm3188_vm1, %v2772_v24, %v3277_v27 }
 0x27c   : > { %v10102_v44 = vpop.permute.xlu1 %5830  ;;  %6145 = vperm.xlu0 %8433, %v3471_v28   ;;  %v3472_v22 = vsel %vm3188_vm1, %v2783_v45, %v3280_v7 }
 0x27d   : > { %6150 = vperm.xlu1 %8432, %v3472_v22   ;;  %v3618_v20 = vpack.c.bf16 %v3472_v22, %v3471_v28  ;;  %v8115_v13 = vpop.f32.mrb[188].mxu1  ;;  %v3470_v35 = vsel %vm3188_vm1, %v2775_v18, %v3278_v42 }
 0x27e   : > { %v2796_v23 = vadd.f32 %v10032_v63, %v8115_v13  ;;  %v2787_v14 = vpop.f32.mrb[189].mxu1  ;;  %v3617_v53 = vpack.c.bf16 %v3470_v35, %v3469_v54 }
 0x27f   : > { %v2788_v3 = vadd.f32 %v10032_v63, %v2787_v14  ;;  %v10112_v6 = vpop.permute.xlu0 %5815  ;;  %v8116_v33 = vpop.f32.mrb[190].mxu1 }
 0x280   : > { %v3283_v21 = vmax.f32 %v2796_v23, 0.0  ;;  %v2799_v59 = vadd.f32 %v10032_v63, %v8116_v33  ;;  %v10115_v26 = vpop.permute.xlu1 %5820  ;;  %6135 = vperm.xlu0 %8433, %v3469_v54   ;;  %v2790_v40 = vpop.f32.mrb[191].mxu1  ;;  %8317 = vmatprep.mubr.bf16.mxu0 %v3617_v53 }
 0x281   : > { %v3281_v32 = vmax.f32 %v2788_v3, 0.0  ;;  %v2791_v60 = vadd.f32 %v10032_v63, %v2790_v40  ;;  %6140 = vperm.xlu1 %8432, %v3470_v35   ;;  %8318 = vmatmul.mubr.bf16.gmra.mrb[184].mxu0 %v3618_v20 }
 0x282   : > { %v3284_v46 = vmax.f32 %v2799_v59, 0.0  ;;  %v3475_v9 = vsel %vm3188_vm1, %v2796_v23, %v3283_v21 }
 0x283   : > { %v3282_v51 = vmax.f32 %v2791_v60, 0.0  ;;  %v10120_v11 = vpop.permute.xlu0 %5845  ;;  %v3473_v10 = vsel %vm3188_vm1, %v2788_v3, %v3281_v32 }
 0x284   : > { %v10122_v31 = vpop.permute.xlu1 %5850  ;;  %6165 = vperm.xlu0 %8433, %v3475_v9   ;;  %v3476_v34 = vsel %vm3188_vm1, %v2799_v59, %v3284_v46 }
 0x285   : > { %6170 = vperm.xlu1 %8432, %v3476_v34   ;;  %v3620_v37 = vpack.c.bf16 %v3476_v34, %v3475_v9  ;;  %v8119_v50 = vpop.f32.mrb[192].mxu1  ;;  %v3474_v24 = vsel %vm3188_vm1, %v2791_v60, %v3282_v51 }
 0x286   : > { %v2812_v49 = vadd.f32 %v10032_v63, %v8119_v50  ;;  %v2803_v8 = vpop.f32.mrb[193].mxu1  ;;  %v3619_v45 = vpack.c.bf16 %v3474_v24, %v3473_v10 }
 0x287   : > { %v2804_v25 = vadd.f32 %v10032_v63, %v2803_v8  ;;  %v10132_v27 = vpop.permute.xlu0 %5835  ;;  %v8120_v18 = vpop.f32.mrb[194].mxu1 }
 0x288   : > { %v3287_v7 = vmax.f32 %v2812_v49, 0.0  ;;  %v2815_v28 = vadd.f32 %v10032_v63, %v8120_v18  ;;  %v10135_v42 = vpop.permute.xlu1 %5840  ;;  %v2806_v22 = vpop.f32.mrb[195].mxu1  ;;  %6155 = vperm.xlu0 %8433, %v3473_v10   ;;  %8321 = vmatprep.mubr.bf16.mxu0 %v3619_v45 }
 0x289   : > { %v3285_v20 = vmax.f32 %v2804_v25, 0.0  ;;  %v2807_v13 = vadd.f32 %v10032_v63, %v2806_v22  ;;  %6160 = vperm.xlu1 %8432, %v3474_v24   ;;  %8322 = vmatmul.mubr.bf16.gmra.mrb[188].mxu0 %v3620_v37 }
 0x28a   : > { %v3288_v54 = vmax.f32 %v2815_v28, 0.0  ;;  %v3479_v35 = vsel %vm3188_vm1, %v2812_v49, %v3287_v7 }
 0x28b   : > { %v3286_v23 = vmax.f32 %v2807_v13, 0.0  ;;  %v10140_v14 = vpop.permute.xlu0 %5865  ;;  %v3477_v59 = vsel %vm3188_vm1, %v2804_v25, %v3285_v20 }
 0x28c   : > { %v10142_v53 = vpop.permute.xlu1 %5870  ;;  %6185 = vperm.xlu0 %8433, %v3479_v35   ;;  %v3480_v3 = vsel %vm3188_vm1, %v2815_v28, %v3288_v54 }
 0x28d   : > { %v8123_v33 = vpop.f32.mrb[196].mxu1  ;;  %v3622_v21 = vpack.c.bf16 %v3480_v3, %v3479_v35  ;;  %6190 = vperm.xlu1 %8432, %v3480_v3   ;;  %v3478_v40 = vsel %vm3188_vm1, %v2807_v13, %v3286_v23 }
 0x28e   : > { %v2828_v32 = vadd.f32 %v10032_v63, %v8123_v33  ;;  %v2819_v60 = vpop.f32.mrb[197].mxu1  ;;  %v3621_v46 = vpack.c.bf16 %v3478_v40, %v3477_v59 }
 0x28f   : > { %v2820_v9 = vadd.f32 %v10032_v63, %v2819_v60  ;;  %v10152_v51 = vpop.permute.xlu0 %5855  ;;  %v8124_v34 = vpop.f32.mrb[198].mxu1 }
 0x290   : > { %v3291_v37 = vmax.f32 %v2828_v32, 0.0  ;;  %v2831_v50 = vadd.f32 %v10032_v63, %v8124_v34  ;;  %v10155_v10 = vpop.permute.xlu1 %5860  ;;  %v2822_v24 = vpop.f32.mrb[199].mxu1  ;;  %6175 = vperm.xlu0 %8433, %v3477_v59   ;;  %8325 = vmatprep.mubr.bf16.mxu0 %v3621_v46 }
 0x291   : > { %12748 = vst [vmem:[#allocation3_spill] sm:$0xff] %v10155_v10  ;;  %v3289_v49 = vmax.f32 %v2820_v9, 0.0  ;;  %v2823_v8 = vadd.f32 %v10032_v63, %v2822_v24  ;;  %6180 = vperm.xlu1 %8432, %v3478_v40   ;;  %8326 = vmatmul.mubr.bf16.gmra.mrb[192].mxu0 %v3622_v21 }
 0x292   : > { %v3292_v45 = vmax.f32 %v2831_v50, 0.0  ;;  %v3483_v25 = vsel %vm3188_vm1, %v2828_v32, %v3291_v37 }
 0x293   : > { %v3290_v18 = vmax.f32 %v2823_v8, 0.0  ;;  %v10160_v7 = vpop.permute.xlu0 %5885  ;;  %v3481_v13 = vsel %vm3188_vm1, %v2820_v9, %v3289_v49 }
 0x294   : > { %12749 = vst [vmem:[#allocation2_spill] sm:$0xff] %v10160_v7  ;;  %v10162_v28 = vpop.permute.xlu1 %5890  ;;  %6205 = vperm.xlu0 %8433, %v3483_v25   ;;  %v3484_v22 = vsel %vm3188_vm1, %v2831_v50, %v3292_v45 }
 0x295   : > { %12750 = vst [vmem:[#allocation4_spill] sm:$0xff] %v10162_v28  ;;  %v8127_v20 = vpop.f32.mrb[200].mxu1  ;;  %6210 = vperm.xlu1 %8432, %v3484_v22   ;;  %v3482_v54 = vsel %vm3188_vm1, %v2823_v8, %v3290_v18  ;;  %v3624_v35 = vpack.c.bf16 %v3484_v22, %v3483_v25 }
 0x296   : > { %v2844_v23 = vadd.f32 %v10032_v63, %v8127_v20  ;;  %v2835_v3 = vpop.f32.mrb[201].mxu1  ;;  %v3623_v33 = vpack.c.bf16 %v3482_v54, %v3481_v13 }
 0x297   : > { %v2836_v21 = vadd.f32 %v10032_v63, %v2835_v3  ;;  %v10172_v59 = vpop.permute.xlu0 %5875  ;;  %v8128_v40 = vpop.f32.mrb[202].mxu1 }
 0x298   : > { %12751 = vst [vmem:[#allocation5_spill] sm:$0xff] %v10172_v59  ;;  %v3295_v32 = vmax.f32 %v2844_v23, 0.0  ;;  %v2847_v60 = vadd.f32 %v10032_v63, %v8128_v40  ;;  %v10175_v46 = vpop.permute.xlu1 %5880  ;;  %v2838_v34 = vpop.f32.mrb[203].mxu1  ;;  %6195 = vperm.xlu0 %8433, %v3481_v13   ;;  %8329 = vmatprep.mubr.bf16.mxu0 %v3623_v33 }
 0x299   : > { %12752 = vst [vmem:[#allocation6_spill] sm:$0xff] %v10175_v46  ;;  %v3293_v9 = vmax.f32 %v2836_v21, 0.0  ;;  %v2839_v37 = vadd.f32 %v10032_v63, %v2838_v34  ;;  %6200 = vperm.xlu1 %8432, %v3482_v54   ;;  %8330 = vmatmul.mubr.bf16.gmra.mrb[196].mxu0 %v3624_v35 }
 0x29a   : > { %v3296_v50 = vmax.f32 %v2847_v60, 0.0  ;;  %v3487_v24 = vsel %vm3188_vm1, %v2844_v23, %v3295_v32 }
 0x29b   : > { %v3294_v49 = vmax.f32 %v2839_v37, 0.0  ;;  %v10180_v8 = vpop.permute.xlu0 %5905  ;;  %v3485_v22 = vsel %vm3188_vm1, %v2836_v21, %v3293_v9 }
 0x29c   : > { %12753 = vst [vmem:[#allocation7_spill] sm:$0xff] %v10180_v8  ;;  %v10182_v45 = vpop.permute.xlu1 %5910  ;;  %6225 = vperm.xlu0 %8433, %v3487_v24   ;;  %v3488_v25 = vsel %vm3188_vm1, %v2847_v60, %v3296_v50 }
 0x29d   : > { %12754 = vst [vmem:[#allocation8_spill] sm:$0xff] %v10182_v45  ;;  %v8131_v18 = vpop.f32.mrb[204].mxu1  ;;  %6230 = vperm.xlu1 %8432, %v3488_v25   ;;  %v3486_v20 = vsel %vm3188_vm1, %v2839_v37, %v3294_v49  ;;  %v3626_v13 = vpack.c.bf16 %v3488_v25, %v3487_v24  ;;  %v10201_v24 = vld [vmem:[%s12742_s5] ss:$0 sm:$0xff] }
 0x29e   : > { %v2860_v54 = vadd.f32 %v10032_v63, %v8131_v18  ;;  %v2851_v35 = vpop.f32.mrb[205].mxu1  ;;  %v3625_v23 = vpack.c.bf16 %v3486_v20, %v3485_v22 }
 0x29f   : > { %v2852_v3 = vadd.f32 %v10032_v63, %v2851_v35  ;;  %v10192_v33 = vpop.permute.xlu0 %5895  ;;  %v8132_v40 = vpop.f32.mrb[206].mxu1 }
 0x2a0   : > { %12755 = vst [vmem:[#allocation9_spill] sm:$0xff] %v10192_v33  ;;  %v3299_v32 = vmax.f32 %v2860_v54, 0.0  ;;  %v2863_v60 = vadd.f32 %v10032_v63, %v8132_v40  ;;  %v10195_v34 = vpop.permute.xlu1 %5900  ;;  %v2854_v50 = vpop.f32.mrb[207].mxu1  ;;  %6215 = vperm.xlu0 %8433, %v3485_v22   ;;  %8333 = vmatprep.mubr.bf16.mxu0 %v3625_v23 }
 0x2a1   : > { %12756 = vst [vmem:[#allocation10_spill] sm:$0xff] %v10195_v34  ;;  %v3297_v21 = vmax.f32 %v2852_v3, 0.0  ;;  %v2855_v9 = vadd.f32 %v10032_v63, %v2854_v50  ;;  %6220 = vperm.xlu1 %8432, %v3486_v20   ;;  %8334 = vmatmul.mubr.bf16.gmra.mrb[200].mxu0 %v3626_v13 }
 0x2a2   : > { %v3300_v37 = vmax.f32 %v2863_v60, 0.0  ;;  %v3491_v49 = vsel %vm3188_vm1, %v2860_v54, %v3299_v32 }
 0x2a3   : > { %v3298_v25 = vmax.f32 %v2855_v9, 0.0  ;;  %v10205_v18 = vpop.permute.xlu0 %5925  ;;  %v3489_v50 = vsel %vm3188_vm1, %v2852_v3, %v3297_v21 }
 0x2a4   : > { %12757 = vst [vmem:[#allocation11_spill] sm:$0xff] %v10205_v18  ;;  %v10207_v35 = vpop.permute.xlu1 %5930  ;;  %v8231_v22 = vpop.f32.mrb[96].mxu0  ;;  %6245 = vperm.xlu0 %8433, %v3491_v49   ;;  %v3492_v20 = vsel %vm3188_vm1, %v2863_v60, %v3300_v37 }
 0x2a5   : > { %12758 = vst [vmem:[#allocation12_spill] sm:$0xff] %v10207_v35  ;;  %v3783_v13 = vadd.f32 %v8231_v22, %v10201_v24  ;;  %v8135_v23 = vpop.f32.mrb[208].mxu1  ;;  %v3774_v40 = vpop.f32.mrb[97].mxu0  ;;  %6250 = vperm.xlu1 %8432, %v3492_v20   ;;  %v3490_v54 = vsel %vm3188_vm1, %v2855_v9, %v3298_v25  ;;  %v3628_v32 = vpack.c.bf16 %v3492_v20, %v3491_v49 }
 0x2a6   : > { %v2876_v18 = vadd.f32 %v10032_v63, %v8135_v23  ;;  %v3775_v35 = vadd.f32 %v10201_v24, %v3774_v40  ;;  %v2867_v34 = vpop.f32.mrb[209].mxu1  ;;  %v8232_v45 = vpop.f32.mrb[98].mxu0  ;;  %v3627_v33 = vpack.c.bf16 %v3490_v54, %v3489_v50 }
 0x2a7   : > { %v7314_v60 = vmul.f32 -1.442695, %v3783_v13  ;;  %v2868_v37 = vadd.f32 %v10032_v63, %v2867_v34  ;;  %v3786_v22 = vadd.f32 %v8232_v45, %v10201_v24  ;;  %v10220_v8 = vpop.permute.xlu0 %5915  ;;  %v8136_v46 = vpop.f32.mrb[210].mxu1 }
 0x2a8   : > { %12759 = vst [vmem:[#allocation13_spill] sm:$0xff] %v10220_v8  ;;  %v3303_v3 = vmax.f32 %v2876_v18, 0.0  ;;  %v7312_v21 = vmul.f32 -1.442695, %v3775_v35  ;;  %v2879_v9 = vadd.f32 %v10032_v63, %v8136_v46  ;;  %v3777_v49 = vpop.f32.mrb[99].mxu0  ;;  %v10223_v25 = vpop.permute.xlu1 %5920  ;;  %6235 = vperm.xlu0 %8433, %v3489_v50   ;;  %8337 = vmatprep.mubr.bf16.mxu0 %v3627_v33 }
 0x2a9   : > { %12760 = vst [vmem:[#allocation14_spill] sm:$0xff] %v10223_v25  ;;  %8547 = vpow2.f32 %v7314_v60  ;;  %v3301_v20 = vmax.f32 %v2868_v37, 0.0  ;;  %v7315_v23 = vmul.f32 -1.442695, %v3786_v22  ;;  %v3778_v13 = vadd.f32 %v10201_v24, %v3777_v49  ;;  %v2870_v34 = vpop.f32.mrb[211].mxu1  ;;  %6240 = vperm.xlu1 %8432, %v3490_v54   ;;  %8338 = vmatmul.mubr.bf16.gmra.mrb[204].mxu0 %v3628_v32 }
 0x2aa   : > { %8549 = vpow2.f32 %v7312_v21  ;;  %v3304_v45 = vmax.f32 %v2879_v9, 0.0  ;;  %v2871_v40 = vadd.f32 %v10032_v63, %v2870_v34  ;;  %v3495_v46 = vsel %vm3188_vm1, %v2876_v18, %v3303_v3 }
 0x2ab   : > { %8551 = vpow2.f32 %v7315_v23  ;;  %v7313_v35 = vmul.f32 -1.442695, %v3778_v13  ;;  %v10229_v25 = vpop.permute.xlu0 %5945  ;;  %v3493_v34 = vsel %vm3188_vm1, %v2868_v37, %v3301_v20 }
 0x2ac   : > { %12761 = vst [vmem:[#allocation15_spill] sm:$0xff] %v10229_v25  ;;  %v3302_v33 = vmax.f32 %v2871_v40, 0.0  ;;  %v10231_v50 = vpop.permute.xlu1 %5950  ;;  %v8235_v60 = vpop.f32.mrb[100].mxu0  ;;  %6265 = vperm.xlu0 %8433, %v3495_v46   ;;  %v3496_v54 = vsel %vm3188_vm1, %v2879_v9, %v3304_v45 }
 0x2ad   : > { %12762 = vst [vmem:[#allocation16_spill] sm:$0xff] %v10231_v50  ;;  %8553 = vpow2.f32 %v7313_v35  ;;  %v3799_v32 = vadd.f32 %v8235_v60, %v10201_v24  ;;  %v8139_v22 = vpop.f32.mrb[212].mxu1  ;;  %v3790_v21 = vpop.f32.mrb[101].mxu0  ;;  %6270 = vperm.xlu1 %8432, %v3496_v54   ;;  %v3630_v49 = vpack.c.bf16 %v3496_v54, %v3495_v46 }
 0x2ae   : > { %v2892_v18 = vadd.f32 %v10032_v63, %v8139_v22  ;;  %v3791_v3 = vadd.f32 %v10201_v24, %v3790_v21  ;;  %v2883_v23 = vpop.f32.mrb[213].mxu1  ;;  %v8236_v13 = vpop.f32.mrb[102].mxu0  ;;  %v3494_v50 = vsel %vm3188_vm1, %v2871_v40, %v3302_v33 }
 0x2af   : > { %v7318_v9 = vmul.f32 -1.442695, %v3799_v32  ;;  %v2884_v45 = vadd.f32 %v10032_v63, %v2883_v23  ;;  %v3802_v35 = vadd.f32 %v8236_v13, %v10201_v24  ;;  %v10244_v60 = vpop.permute.xlu0 %5935  ;;  %v8140_v46 = vpop.f32.mrb[214].mxu1  ;;  %v3629_v54 = vpack.c.bf16 %v3494_v50, %v3493_v34 }
 0x2b0   : > { %12763 = vst [vmem:[#allocation17_spill] sm:$0xff] %v10244_v60  ;;  %v3307_v22 = vmax.f32 %v2892_v18, 0.0  ;;  %v7316_v25 = vmul.f32 -1.442695, %v3791_v3  ;;  %v2895_v21 = vadd.f32 %v10032_v63, %v8140_v46  ;;  %v3793_v8 = vpop.f32.mrb[103].mxu0  ;;  %v10247_v28 = vpop.permute.xlu1 %5940  ;;  %6255 = vperm.xlu0 %8433, %v3493_v34  }
 0x2b1   : > { %12764 = vst [vmem:[#allocation18_spill] sm:$0xff] %v10247_v28  ;;  %8555 = vpow2.f32 %v7318_v9  ;;  %v3305_v37 = vmax.f32 %v2884_v45, 0.0  ;;  %v7319_v20 = vmul.f32 -1.442695, %v3802_v35  ;;  %v3794_v40 = vadd.f32 %v10201_v24, %v3793_v8  ;;  %v2886_v33 = vpop.f32.mrb[215].mxu1  ;;  %8341 = vmatprep.mubr.bf16.mxu0 %v3629_v54  ;;  %6260 = vperm.xlu1 %8432, %v3494_v50  }
 0x2b2   : > { %8557 = vpow2.f32 %v7316_v25  ;;  %v3308_v32 = vmax.f32 %v2895_v21, 0.0  ;;  %v2887_v23 = vadd.f32 %v10032_v63, %v2886_v33  ;;  %8342 = vmatmul.mubr.bf16.gmra.mrb[208].mxu0 %v3630_v49  ;;  %v10253_v3 = vsel %vm3188_vm1, %v2892_v18, %v3307_v22 }
 0x2b3   : > { %v8548_v13 = vpop.eup %8547  ;;  %8559 = vpow2.f32 %v7319_v20  ;;  %v7317_v34 = vmul.f32 -1.442695, %v3794_v40  ;;  %v10255_v9 = vpop.permute.xlu0 %5965  ;;  %v3497_v49 = vsel %vm3188_vm1, %v2884_v45, %v3305_v37 }
 0x2b4   : > { %12765 = vst [vmem:[#allocation19_spill] sm:$0xff] %v10255_v9  ;;  %v8550_v35 = vpop.eup %8549  ;;  %v5119_v46 = vadd.f32 1.0, %v8548_v13  ;;  %v3306_v8 = vmax.f32 %v2887_v23, 0.0  ;;  %v10257_v28 = vpop.permute.xlu1 %5970  ;;  %6285 = vperm.xlu0 %8433, %v10253_v3   ;;  %v10262_v25 = vsel %vm3188_vm1, %v2895_v21, %v3308_v32 }
 0x2b5   : > { %12766 = vst [vmem:[#allocation20_spill] sm:$0xff] %v10257_v28  ;;  %v8239_v50 = vpop.f32.mrb[104].mxu0  ;;  %v8552_v18 = vpop.eup %8551  ;;  %v5117_v54 = vadd.f32 1.0, %v8550_v35  ;;  %8561 = vpow2.f32 %v7317_v34  ;;  %6290 = vperm.xlu1 %8432, %v10262_v25   ;;  %v3632_v33 = vpack.c.bf16 %v10262_v25, %v10253_v3 }
 0x2b6   : > { %v3815_v22 = vadd.f32 %v8239_v50, %v10201_v24  ;;  %v8143_v20 = vpop.f32.mrb[216].mxu1  ;;  %v3806_v40 = vpop.f32.mrb[105].mxu0  ;;  %8563 = vrcp.f32 %v5119_v46  ;;  %v5120_v13 = vadd.f32 1.0, %v8552_v18 }
 0x2b7   : > { %v2908_v21 = vadd.f32 %v10032_v63, %v8143_v20  ;;  %v3807_v32 = vadd.f32 %v10201_v24, %v3806_v40  ;;  %v2899_v28 = vpop.f32.mrb[217].mxu1  ;;  %v8240_v45 = vpop.f32.mrb[106].mxu0  ;;  %8565 = vrcp.f32 %v5117_v54 }
 0x2b8   : > { %v8554_v37 = vpop.eup %8553  ;;  %v7322_v34 = vmul.f32 -1.442695, %v3815_v22  ;;  %v2900_v35 = vadd.f32 %v10032_v63, %v2899_v28  ;;  %v3818_v50 = vadd.f32 %v8240_v45, %v10201_v24  ;;  %v10274_v9 = vpop.permute.xlu0 %5955  ;;  %8567 = vrcp.f32 %v5120_v13  ;;  %6275 = vperm.xlu0 %8433, %v3497_v49  }
 0x2b9   : > { %12767 = vst [vmem:[#allocation21_spill] sm:$0xff] %v10274_v9  ;;  %v8144_v60 = vpop.f32.mrb[218].mxu1  ;;  %v5118_v3 = vadd.f32 1.0, %v8554_v37  ;;  %v3311_v46 = vmax.f32 %v2908_v21, 0.0  ;;  %v7320_v25 = vmul.f32 -1.442695, %v3807_v32  ;;  %v10276_v20 = vpop.permute.xlu1 %5960  ;;  %v3498_v13 = vsel %vm3188_vm1, %v2887_v23, %v3306_v8 }
 0x2ba   : > { %v3809_v18 = vpop.f32.mrb[107].mxu0  ;;  %12768 = vst [vmem:[#allocation22_spill] sm:$0xff] %v10276_v20  ;;  %8569 = vpow2.f32 %v7322_v34  ;;  %v3309_v40 = vmax.f32 %v2900_v35, 0.0  ;;  %v7323_v54 = vmul.f32 -1.442695, %v3818_v50  ;;  %v2911_v22 = vadd.f32 %v10032_v63, %v8144_v60  ;;  %v2902_v28 = vpop.f32.mrb[219].mxu1  ;;  %6280 = vperm.xlu1 %8432, %v3498_v13  }
 0x2bb   : > { %8571 = vrcp.f32 %v5118_v3  ;;  %v3810_v45 = vadd.f32 %v10201_v24, %v3809_v18  ;;  %v10281_v9 = vadd.f32 %v10032_v63, %v2902_v28  ;;  %v8556_v32 = vpop.eup %8555  ;;  %v3631_v20 = vpack.c.bf16 %v3498_v13, %v3497_v49 }
 0x2bc   : > { %8573 = vpow2.f32 %v7320_v25  ;;  %v3312_v37 = vmax.f32 %v2911_v22, 0.0  ;;  %v10285_v34 = vpop.permute.xlu0 %5985  ;;  %v10289_v60 = vsel %vm3188_vm1, %v2908_v21, %v3311_v46  ;;  %v8558_v50 = vpop.eup %8557  ;;  %v5123_v3 = vadd.f32 1.0, %v8556_v32 }
 0x2bd   : > { %12769 = vst [vmem:[#allocation23_spill] sm:$0xff] %v10285_v34  ;;  %8575 = vpow2.f32 %v7323_v54  ;;  %v7321_v18 = vmul.f32 -1.442695, %v3810_v45  ;;  %v3310_v28 = vmax.f32 %v10281_v9, 0.0  ;;  %v10293_v59 = vpop.permute.xlu1 %5990  ;;  %v8243_v23 = vpop.f32.mrb[108].mxu0  ;;  %6305 = vperm.xlu0 %8433, %v10289_v60   ;;  %v5121_v49 = vadd.f32 1.0, %v8558_v50  ;;  %8345 = vmatprep.mubr.bf16.mxu0 %v3631_v20 }
 0x2be   : > { %12770 = vst [vmem:[#allocation24_spill] sm:$0xff] %v10293_v59  ;;  %v8560_v8 = vpop.eup %8559  ;;  %v3831_v25 = vadd.f32 %v8243_v23, %v10201_v24  ;;  %v8147_v13 = vpop.f32.mrb[220].mxu1  ;;  %v10299_v46 = vsel %vm3188_vm1, %v2911_v22, %v3312_v37  ;;  %v10303_v54 = vsel %vm3188_vm1, %v2900_v35, %v3309_v40  ;;  %8577 = vrcp.f32 %v5123_v3  ;;  %8346 = vmatmul.mubr.bf16.gmra.mrb[212].mxu0 %v3632_v33 }
 0x2bf   : > { %v3822_v21 = vpop.f32.mrb[109].mxu0  ;;  %v5124_v45 = vadd.f32 1.0, %v8560_v8  ;;  %v10306_v32 = vadd.f32 %v10032_v63, %v8147_v13  ;;  %v2915_v50 = vpop.f32.mrb[221].mxu1  ;;  %8579 = vrcp.f32 %v5121_v49  ;;  %6310 = vperm.xlu1 %8432, %v10299_v46  }
 0x2c0   : > { %v3823_v20 = vadd.f32 %v10201_v24, %v3822_v21  ;;  %v8244_v23 = vpop.f32.mrb[110].mxu0  ;;  %v8562_v59 = vpop.eup %8561  ;;  %v7326_v22 = vmul.f32 -1.442695, %v3831_v25  ;;  %v10316_v35 = vadd.f32 %v10032_v63, %v2915_v50 }
 0x2c1   : > { %v3834_v33 = vadd.f32 %v8244_v23, %v10201_v24  ;;  %v10319_v40 = vpop.permute.xlu0 %5975  ;;  %v8148_v37 = vpop.f32.mrb[222].mxu1  ;;  %8581 = vrcp.f32 %v5124_v45  ;;  %v5122_v8 = vadd.f32 1.0, %v8562_v59  ;;  %v3315_v13 = vmax.f32 %v10306_v32, 0.0  ;;  %6295 = vperm.xlu0 %8433, %v10303_v54  }
 0x2c2   : > { %12771 = vst [vmem:[#allocation25_spill] sm:$0xff] %v10319_v40  ;;  %v8564_v3 = vpop.eup %8563  ;;  %v7324_v21 = vmul.f32 -1.442695, %v3823_v20  ;;  %v3825_v34 = vpop.f32.mrb[111].mxu0  ;;  %8583 = vpow2.f32 %v7321_v18 }
 0x2c3   : > { %v10322_v49 = vpop.permute.xlu1 %5980  ;;  %v8566_v25 = vpop.eup %8565  ;;  %v6655_v50 = vsel %vm3188_vm1, %v9964_v5, %v8564_v3  ;;  %v7327_v40 = vmul.f32 -1.442695, %v3834_v33  ;;  %8585 = vrcp.f32 %v5122_v8  ;;  %v3826_v7 = vadd.f32 %v10201_v24, %v3825_v34 }
 0x2c4   : > { %12772 = vst [vmem:[#allocation26_spill] sm:$0xff] %v10322_v49  ;;  %v2918_v59 = vpop.f32.mrb[223].mxu1  ;;  %v8568_v45 = vpop.eup %8567  ;;  %6848 = vst.msk [vmem:[%s10312_s26 + $0x10] sm:$0xff] %vm6845_vm2, %v6655_v50  ;;  %v6653_v20 = vsel %vm3188_vm1, %v9969_v17, %v8566_v25  ;;  %v2927_v49 = vadd.f32 %v10032_v63, %v8148_v37  ;;  %8587 = vpow2.f32 %v7326_v22  ;;  %v3502_v17 = vsel %vm3188_vm1, %v10281_v9, %v3310_v28 }
 0x2c5   : > { %v8570_v10 = vpop.eup %8569  ;;  %6846 = vst.msk [vmem:[%s10312_s26] sm:$0xff] %vm6845_vm2, %v6653_v20  ;;  %v6656_v5 = vsel %vm3188_vm1, %v9982_v15, %v8568_v45  ;;  %v10342_v18 = vadd.f32 %v10032_v63, %v2918_v59  ;;  %v10347_v33 = vpop.permute.xlu0 %6005  ;;  %8589 = vpow2.f32 %v7324_v21  ;;  %v7325_v8 = vmul.f32 -1.442695, %v3826_v7  ;;  %6300 = vperm.xlu1 %8432, %v3502_v17  }
 0x2c6   : > { %v8572_v37 = vpop.eup %8571  ;;  %6849 = vst.msk [vmem:[%s10312_s26 + $0x18] sm:$0xff] %vm6845_vm2, %v6656_v5  ;;  %v5127_v34 = vadd.f32 1.0, %v8570_v10  ;;  %v3316_v3 = vmax.f32 %v2927_v49, 0.0  ;;  %v8247_v22 = vpop.f32.mrb[112].mxu0  ;;  %8591 = vpow2.f32 %v7327_v40  ;;  %v3633_v28 = vpack.c.bf16 %v3502_v17, %v10303_v54 }
 0x2c7   : > { %v10351_v15 = vpop.permute.xlu1 %6010  ;;  %v8574_v25 = vpop.eup %8573  ;;  %v6654_v50 = vsel %vm3188_vm1, %v9980_v29, %v8572_v37  ;;  %v3314_v9 = vmax.f32 %v10342_v18, 0.0  ;;  %v3634_v21 = vpack.c.bf16 %v10299_v46, %v10289_v60  ;;  %v3847_v20 = vadd.f32 %v8247_v22, %v10201_v24 }
 0x2c8   : > { %v8151_v59 = vpop.f32.mrb[224].mxu1  ;;  %v3838_v45 = vpop.f32.mrb[113].mxu0  ;;  %6847 = vst.msk [vmem:[%s10312_s26 + $0x8] sm:$0xff] %vm6845_vm2, %v6654_v50  ;;  %8593 = vrcp.f32 %v5127_v34  ;;  %v5125_v7 = vadd.f32 1.0, %v8574_v25  ;;  %8349 = vmatprep.mubr.bf16.mxu0 %v3633_v28  ;;  %v10366_v54 = vsel %vm3188_vm1, %v10306_v32, %v3315_v13 }
 0x2c9   : > { %v8576_v10 = vpop.eup %8575  ;;  %v2931_v5 = vpop.f32.mrb[225].mxu1  ;;  %8595 = vpow2.f32 %v7325_v8  ;;  %v10369_v40 = vadd.f32 %v10032_v63, %v8151_v59  ;;  %8350 = vmatmul.mubr.bf16.gmra.mrb[216].mxu0 %v3634_v21  ;;  %v7330_v60 = vmul.f32 -1.442695, %v3847_v20  ;;  %6325 = vperm.xlu0 %8433, %v10366_v54   ;;  %v3839_v46 = vadd.f32 %v10201_v24, %v3838_v45 }
 0x2ca   : > { %v8248_v23 = vpop.f32.mrb[114].mxu0  ;;  %v5128_v29 = vadd.f32 1.0, %v8576_v10  ;;  %v10371_v17 = vpop.permute.xlu0 %5995  ;;  %8597 = vrcp.f32 %v5125_v7  ;;  %v10377_v8 = vsel %vm3188_vm1, %v2927_v49, %v3316_v3  ;;  %v10387_v28 = vadd.f32 %v10032_v63, %v2931_v5 }
 0x2cb   : > { %v8152_v37 = vpop.f32.mrb[226].mxu1  ;;  %v8578_v34 = vpop.eup %8577  ;;  %v3319_v50 = vmax.f32 %v10369_v40, 0.0  ;;  %6330 = vperm.xlu1 %8432, %v10377_v8   ;;  %v7328_v45 = vmul.f32 -1.442695, %v3839_v46 }
 0x2cc   : > { %v3841_v32 = vpop.f32.mrb[115].mxu0  ;;  %v10379_v13 = vpop.permute.xlu1 %6000  ;;  %v6659_v25 = vsel %vm3188_vm1, %v9989_v0, %v8578_v34  ;;  %8599 = vrcp.f32 %v5128_v29  ;;  %v3850_v0 = vadd.f32 %v8248_v23, %v10201_v24  ;;  %v2943_v20 = vadd.f32 %v10032_v63, %v8152_v37 }
 0x2cd   : > { %v8580_v22 = vpop.eup %8579  ;;  %v2934_v49 = vpop.f32.mrb[227].mxu1  ;;  %6852 = vst.msk [vmem:[%s10312_s26 + $0x30] sm:$0xff] %vm6845_vm2, %v6659_v25  ;;  %8601 = vpow2.f32 %v7330_v60  ;;  %v3842_v5 = vadd.f32 %v10201_v24, %v3841_v32 }
 0x2ce   : > { %v8582_v3 = vpop.eup %8581  ;;  %v6657_v59 = vsel %vm3188_vm1, %v10002_v30, %v8580_v22  ;;  %v10403_v29 = vpop.permute.xlu0 %6025  ;;  %8603 = vpow2.f32 %v7328_v45  ;;  %v7331_v34 = vmul.f32 -1.442695, %v3850_v0  ;;  %v10408_v60 = vadd.f32 %v10032_v63, %v2934_v49 }
 0x2cf   : > { %v8584_v10 = vpop.eup %8583  ;;  %6850 = vst.msk [vmem:[%s10312_s26 + $0x20] sm:$0xff] %vm6845_vm2, %v6657_v59  ;;  %v6660_v7 = vsel %vm3188_vm1, %v9992_v38, %v8582_v3  ;;  %v8251_v38 = vpop.f32.mrb[116].mxu0  ;;  %v3320_v32 = vmax.f32 %v2943_v20, 0.0  ;;  %v7329_v25 = vmul.f32 -1.442695, %v3842_v5  ;;  %v12774_v3 = vmax.f32 %v10316_v35, 0.0 }
 0x2d0   : > { %v8586_v30 = vpop.eup %8585  ;;  %6853 = vst.msk [vmem:[%s10312_s26 + $0x38] sm:$0xff] %vm6845_vm2, %v6660_v7  ;;  %v5126_v23 = vadd.f32 1.0, %v8584_v10  ;;  %v10410_v46 = vpop.permute.xlu1 %6030 }
 0x2d1   : > { %12773 = vst [vmem:[#allocation27_spill] sm:$0xff] %v10410_v46  ;;  %v8588_v22 = vpop.eup %8587  ;;  %v6658_v37 = vsel %vm3188_vm1, %v10005_v43, %v8586_v30  ;;  %v3505_v59 = vsel %vm3188_vm1, %v10316_v35, %v12774_v3  ;;  %v8155_v45 = vpop.f32.mrb[228].mxu1  ;;  %v3506_v43 = vsel %vm3188_vm1, %v10342_v18, %v3314_v9  ;;  %v3863_v46 = vadd.f32 %v8251_v38, %v10201_v24 }
 0x2d2   : > { %v3854_v0 = vpop.f32.mrb[117].mxu0  ;;  %v8590_v63 = vpop.eup %8589  ;;  %6851 = vst.msk [vmem:[%s10312_s26 + $0x28] sm:$0xff] %vm6845_vm2, %v6658_v37  ;;  %8605 = vrcp.f32 %v5126_v23  ;;  %v5131_v49 = vadd.f32 1.0, %v8588_v22  ;;  %6315 = vperm.xlu0 %8433, %v3505_v59   ;;  %v3635_v3 = vpack.c.bf16 %v3506_v43, %v3505_v59  ;;  %6320 = vperm.xlu1 %8432, %v3506_v43   ;;  %v3636_v23 = vpack.c.bf16 %v10377_v8, %v10366_v54  ;;  %v10446_v8 = vld [vmem:[%s12740_s3] ss:$0 sm:$0xff] }
 0x2d3   : > { %v2947_v7 = vpop.f32.mrb[229].mxu1  ;;  %v8252_v5 = vpop.f32.mrb[118].mxu0  ;;  %v5129_v35 = vadd.f32 1.0, %v8590_v63  ;;  %8607 = vpow2.f32 %v7331_v34  ;;  %v10436_v18 = vsel %vm3188_vm1, %v10369_v40, %v3319_v50  ;;  %v10449_v38 = vadd.f32 %v10446_v8, %v8155_v45 }
 0x2d4   : > { %v8592_v30 = vpop.eup %8591  ;;  %v10430_v22 = vpop.permute.xlu0 %6015  ;;  %8609 = vrcp.f32 %v5131_v49  ;;  %8353 = vmatprep.mubr.bf16.mxu0 %v3635_v3  ;;  %v3855_v40 = vadd.f32 %v10201_v24, %v3854_v0 }
 0x2d5   : > { %v8156_v37 = vpop.f32.mrb[230].mxu1  ;;  %v8594_v10 = vpop.eup %8593  ;;  %v5132_v21 = vadd.f32 1.0, %v8592_v30  ;;  %8611 = vrcp.f32 %v5129_v35  ;;  %8354 = vmatmul.mubr.bf16.gmra.mrb[220].mxu0 %v3636_v23  ;;  %v3323_v43 = vmax.f32 %v10449_v38, 0.0 }
 0x2d6   : > { %v3857_v9 = vpop.f32.mrb[119].mxu0  ;;  %v10438_v34 = vpop.permute.xlu1 %6020  ;;  %v6663_v54 = vsel %vm3188_vm1, %v10011_v36, %v8594_v10  ;;  %v7334_v36 = vmul.f32 -1.442695, %v3863_v46  ;;  %6345 = vperm.xlu0 %8433, %v10436_v18   ;;  %v10457_v10 = vsel %vm3188_vm1, %v2943_v20, %v3320_v32  ;;  %v7332_v30 = vmul.f32 -1.442695, %v3855_v40 }
 0x2d7   : > { %v8596_v59 = vpop.eup %8595  ;;  %v2950_v50 = vpop.f32.mrb[231].mxu1  ;;  %6856 = vst.msk [vmem:[%s10312_s26 + $0x50] sm:$0xff] %vm6845_vm2, %v6663_v54  ;;  %8613 = vrcp.f32 %v5132_v21  ;;  %6350 = vperm.xlu1 %8432, %v10457_v10   ;;  %v10472_v32 = vadd.f32 %v10446_v8, %v2947_v7  ;;  %v2959_v23 = vadd.f32 %v10446_v8, %v8156_v37  ;;  %v3638_v7 = vpack.c.bf16 %v10457_v10, %v10436_v18 }
 0x2d8   : > { %v8598_v63 = vpop.eup %8597  ;;  %v5130_v49 = vadd.f32 1.0, %v8596_v59  ;;  %8615 = vpow2.f32 %v7329_v25  ;;  %v10464_v21 = vpop.permute.xlu0 %6045  ;;  %v3858_v59 = vadd.f32 %v10201_v24, %v3857_v9 }
 0x2d9   : > { %v8600_v45 = vpop.eup %8599  ;;  %v6661_v0 = vsel %vm3188_vm1, %v10024_v16, %v8598_v63  ;;  %v3866_v16 = vadd.f32 %v8252_v5, %v10201_v24  ;;  %v8255_v35 = vpop.f32.mrb[120].mxu0  ;;  %v10483_v5 = vadd.f32 %v10446_v8, %v2950_v50  ;;  %v12777_v50 = vmax.f32 %v10408_v60, 0.0 }
 0x2da   : > { %v8602_v46 = vpop.eup %8601  ;;  %6854 = vst.msk [vmem:[%s10312_s26 + $0x40] sm:$0xff] %vm6845_vm2, %v6661_v0  ;;  %v6664_v20 = vsel %vm3188_vm1, %v10014_v62, %v8600_v45  ;;  %8617 = vrcp.f32 %v5130_v49  ;;  %v10475_v25 = vpop.permute.xlu1 %6050 }
 0x2db   : > { %12775 = vst [vmem:[#allocation28_spill] sm:$0xff] %v10475_v25  ;;  %6857 = vst.msk [vmem:[%s10312_s26 + $0x58] sm:$0xff] %vm6845_vm2, %v6664_v20  ;;  %v5135_v3 = vadd.f32 1.0, %v8602_v46  ;;  %8619 = vpow2.f32 %v7334_v36  ;;  %v8159_v54 = vpop.f32.mrb[232].mxu1  ;;  %v3870_v40 = vpop.f32.mrb[121].mxu0  ;;  %v3324_v46 = vmax.f32 %v2959_v23, 0.0 }
 0x2dc   : > { %v8604_v62 = vpop.eup %8603  ;;  %8621 = vpow2.f32 %v7332_v30  ;;  %v7335_v63 = vmul.f32 -1.442695, %v3866_v16  ;;  %v2963_v49 = vpop.f32.mrb[233].mxu1  ;;  %v7333_v36 = vmul.f32 -1.442695, %v3858_v59  ;;  %v12776_v30 = vmax.f32 %v10387_v28, 0.0 }
 0x2dd   : > { %v8256_v45 = vpop.f32.mrb[122].mxu0  ;;  %8623 = vrcp.f32 %v5135_v3  ;;  %v5133_v0 = vadd.f32 1.0, %v8604_v62  ;;  %v8160_v20 = vpop.f32.mrb[234].mxu1  ;;  %v3510_v3 = vsel %vm3188_vm1, %v10408_v60, %v12777_v50  ;;  %v3879_v60 = vadd.f32 %v8255_v35, %v10201_v24 }
 0x2de   : > { %v8606_v37 = vpop.eup %8605  ;;  %8625 = vpow2.f32 %v7335_v63  ;;  %v3509_v16 = vsel %vm3188_vm1, %v10387_v28, %v12776_v30  ;;  %v3873_v62 = vpop.f32.mrb[123].mxu0  ;;  %6340 = vperm.xlu1 %8432, %v3510_v3   ;;  %v10513_v18 = vadd.f32 %v10446_v8, %v8159_v54  ;;  %v3871_v10 = vadd.f32 %v10201_v24, %v3870_v40 }
 0x2df   : > { %v8608_v59 = vpop.eup %8607  ;;  %v6662_v63 = vsel %vm3188_vm1, %v10027_v58, %v8606_v37  ;;  %8627 = vrcp.f32 %v5133_v0  ;;  %6335 = vperm.xlu0 %8433, %v3509_v16   ;;  %v3637_v9 = vpack.c.bf16 %v3510_v3, %v3509_v16  ;;  %v2966_v28 = vpop.f32.mrb[235].mxu1  ;;  %v10507_v58 = vsel %vm3188_vm1, %v10449_v38, %v3323_v43 }
 0x2e0   : > { %v8610_v30 = vpop.eup %8609  ;;  %6855 = vst.msk [vmem:[%s10312_s26 + $0x48] sm:$0xff] %vm6845_vm2, %v6662_v63  ;;  %v5136_v25 = vadd.f32 1.0, %v8608_v59  ;;  %8629 = vpow2.f32 %v7333_v36  ;;  %v10518_v35 = vsel %vm3188_vm1, %v2959_v23, %v3324_v46  ;;  %v10520_v36 = vpop.permute.xlu0 %6035  ;;  %v7338_v43 = vmul.f32 -1.442695, %v3879_v60 }
 0x2e1   : > { %v8612_v0 = vpop.eup %8611  ;;  %v6667_v37 = vsel %vm3188_vm1, %v10038_v41, %v8610_v30  ;;  %8357 = vmatprep.mubr.bf16.mxu0 %v3637_v9  ;;  %v10528_v54 = vadd.f32 %v10446_v8, %v2963_v49  ;;  %v10530_v40 = vpop.permute.xlu1 %6040 }
 0x2e2   : > { %v8614_v38 = vpop.eup %8613  ;;  %6860 = vst.msk [vmem:[%s10312_s26 + $0x70] sm:$0xff] %vm6845_vm2, %v6667_v37  ;;  %v6665_v41 = vsel %vm3188_vm1, %v10051_v48, %v8612_v0  ;;  %8631 = vrcp.f32 %v5136_v25  ;;  %8358 = vmatmul.mubr.bf16.gmra.mrb[224].mxu0 %v3638_v7  ;;  %v8259_v23 = vpop.f32.mrb[124].mxu0  ;;  %v3327_v48 = vmax.f32 %v10513_v18, 0.0  ;;  %v7336_v25 = vmul.f32 -1.442695, %v3871_v10  ;;  %6370 = vperm.xlu1 %8432, %v10518_v35  }
 0x2e3   : > { %v8616_v46 = vpop.eup %8615  ;;  %6858 = vst.msk [vmem:[%s10312_s26 + $0x60] sm:$0xff] %vm6845_vm2, %v6665_v41  ;;  %v6668_v9 = vsel %vm3188_vm1, %v10041_v19, %v8614_v38  ;;  %6365 = vperm.xlu0 %8433, %v10507_v58   ;;  %v3882_v7 = vadd.f32 %v8256_v45, %v10201_v24  ;;  %v8163_v49 = vpop.f32.mrb[236].mxu1  ;;  %8633 = vpow2.f32 %v7338_v43  ;;  %v2975_v19 = vadd.f32 %v10446_v8, %v8160_v20 }
 0x2e4   : > { %v3886_v16 = vpop.f32.mrb[125].mxu0  ;;  %v8618_v50 = vpop.eup %8617  ;;  %6861 = vst.msk [vmem:[%s10312_s26 + $0x78] sm:$0xff] %vm6845_vm2, %v6668_v9  ;;  %v5134_v3 = vadd.f32 1.0, %v8616_v46  ;;  %8635 = vpow2.f32 %v7336_v25  ;;  %v3874_v37 = vadd.f32 %v10201_v24, %v3873_v62  ;;  %v10554_v20 = vadd.f32 %v10446_v8, %v2966_v28 }
 0x2e5   : > { %v2979_v63 = vpop.f32.mrb[237].mxu1  ;;  %v8260_v30 = vpop.f32.mrb[126].mxu0  ;;  %v6666_v0 = vsel %vm3188_vm1, %v10054_v2, %v8618_v50  ;;  %v7339_v45 = vmul.f32 -1.442695, %v3882_v7  ;;  %v3328_v43 = vmax.f32 %v2975_v19, 0.0  ;;  %v12778_v25 = vmax.f32 %v10472_v32, 0.0 }
 0x2e6   : > { %v8620_v60 = vpop.eup %8619  ;;  %v10549_v10 = vpop.f32.mrb[238].mxu1  ;;  %6859 = vst.msk [vmem:[%s10312_s26 + $0x68] sm:$0xff] %vm6845_vm2, %v6666_v0  ;;  %8637 = vrcp.f32 %v5134_v3  ;;  %v7337_v2 = vmul.f32 -1.442695, %v3874_v37  ;;  %v3326_v28 = vmax.f32 %v10554_v20, 0.0 }
 0x2e7   : > { %v8622_v38 = vpop.eup %8621  ;;  %v5139_v41 = vadd.f32 1.0, %v8620_v60  ;;  %v3889_v46 = vpop.f32.mrb[127].mxu0  ;;  %8639 = vpow2.f32 %v7339_v45  ;;  %v3513_v62 = vsel %vm3188_vm1, %v10472_v32, %v12778_v25  ;;  %v12779_v60 = vmax.f32 %v10483_v5, 0.0 }
 0x2e8   : > { %v8624_v9 = vpop.eup %8623  ;;  %v5137_v59 = vadd.f32 1.0, %v8622_v38  ;;  %v2982_v7 = vpop.f32.mrb[239].mxu1  ;;  %6355 = vperm.xlu0 %8433, %v3513_v62   ;;  %v3895_v25 = vadd.f32 %v8259_v23, %v10201_v24 }
 0x2e9   : > { %v8626_v50 = vpop.eup %8625  ;;  %v6671_v3 = vsel %vm3188_vm1, %v10060_v47, %v8624_v9  ;;  %8641 = vrcp.f32 %v5139_v41  ;;  %v3514_v0 = vsel %vm3188_vm1, %v10483_v5, %v12779_v60  ;;  %v3640_v47 = vpack.c.bf16 %v10518_v35, %v10507_v58  ;;  %v10574_v38 = vpop.permute.xlu0 %6065 }
 0x2ea   : > { %v8628_v45 = vpop.eup %8627  ;;  %6864 = vst.msk [vmem:[%s10312_s26 + $0x90] sm:$0xff] %vm6845_vm2, %v6671_v3  ;;  %8643 = vrcp.f32 %v5137_v59  ;;  %v5140_v32 = vadd.f32 1.0, %v8626_v50  ;;  %v3639_v37 = vpack.c.bf16 %v3514_v0, %v3513_v62  ;;  %6360 = vperm.xlu1 %8432, %v3514_v0   ;;  %v10579_v5 = vpop.permute.xlu1 %6070  ;;  %v10585_v59 = vsel %vm3188_vm1, %v10513_v18, %v3327_v48 }
 0x2eb   : > { %v8630_v41 = vpop.eup %8629  ;;  %v6669_v9 = vsel %vm3188_vm1, %v10072_v1, %v8628_v45  ;;  %8645 = vpow2.f32 %v7337_v2  ;;  %v8263_v62 = vpop.f32.mrb[128].mxu0  ;;  %v10590_v35 = vadd.f32 %v10446_v8, %v8163_v49  ;;  %v3887_v1 = vadd.f32 %v10201_v24, %v3886_v16 }
 0x2ec   : > { %6862 = vst.msk [vmem:[%s10312_s26 + $0x80] sm:$0xff] %vm6845_vm2, %v6669_v9  ;;  %8647 = vrcp.f32 %v5140_v32  ;;  %v5138_v58 = vadd.f32 1.0, %v8630_v41  ;;  %8361 = vmatprep.mubr.bf16.mxu0 %v3639_v37  ;;  %v10593_v2 = vpop.f32.mrb[240].mxu1  ;;  %v10595_v50 = vpop.f32.mrb[129].mxu0  ;;  %v7342_v18 = vmul.f32 -1.442695, %v3895_v25  ;;  %6385 = vperm.xlu0 %8433, %v10585_v59   ;;  %v10600_v48 = vsel %vm3188_vm1, %v2975_v19, %v3328_v43 }
 0x2ed   : > { %v8632_v23 = vpop.eup %8631  ;;  %8362 = vmatmul.mubr.bf16.gmra.mrb[228].mxu0 %v3640_v47  ;;  %v10603_v3 = vadd.f32 %v10446_v8, %v2979_v63  ;;  %v3898_v49 = vadd.f32 %v8260_v30, %v10201_v24  ;;  %v10606_v16 = vpop.f32.mrb[241].mxu1  ;;  %v3331_v45 = vmax.f32 %v10590_v35, 0.0  ;;  %v7340_v32 = vmul.f32 -1.442695, %v3887_v1 }
 0x2ee   : > { %v10608_v60 = vpop.f32.mrb[130].mxu0  ;;  %v6672_v0 = vsel %vm3188_vm1, %v10062_v55, %v8632_v23  ;;  %8649 = vrcp.f32 %v5138_v58  ;;  %6390 = vperm.xlu1 %8432, %v10600_v48   ;;  %v10615_v19 = vpop.f32.mrb[242].mxu1  ;;  %v2991_v37 = vadd.f32 %v10446_v8, %v10549_v10  ;;  %v3890_v9 = vadd.f32 %v10201_v24, %v3889_v46 }
 0x2ef   : > { %v8634_v63 = vpop.eup %8633  ;;  %6865 = vst.msk [vmem:[%s10312_s26 + $0x98] sm:$0xff] %vm6845_vm2, %v6672_v0  ;;  %8651 = vpow2.f32 %v7342_v18  ;;  %v7343_v43 = vmul.f32 -1.442695, %v3898_v49  ;;  %v10622_v47 = vpop.f32.mrb[131].mxu0  ;;  %v10626_v25 = vadd.f32 %v10446_v8, %v2982_v7  ;;  %v12780_v49 = vmax.f32 %v10528_v54, 0.0 }
 0x2f0   : > { %v8636_v55 = vpop.eup %8635  ;;  %v5143_v41 = vadd.f32 1.0, %v8634_v63  ;;  %8653 = vpow2.f32 %v7340_v32  ;;  %v10628_v58 = vpop.f32.mrb[243].mxu1  ;;  %v3332_v18 = vmax.f32 %v2991_v37, 0.0  ;;  %v7341_v32 = vmul.f32 -1.442695, %v3890_v9 }
 0x2f1   : > { %v8638_v1 = vpop.eup %8637  ;;  %v5141_v23 = vadd.f32 1.0, %v8636_v55  ;;  %8655 = vpow2.f32 %v7343_v43  ;;  %v3517_v10 = vsel %vm3188_vm1, %v10528_v54, %v12780_v49  ;;  %v10638_v7 = vpop.permute.xlu0 %6055  ;;  %v3330_v63 = vmax.f32 %v10626_v25, 0.0 }
 0x2f2   : > { %v8640_v0 = vpop.eup %8639  ;;  %v6670_v46 = vsel %vm3188_vm1, %v10075_v39, %v8638_v1  ;;  %8657 = vrcp.f32 %v5143_v41  ;;  %6375 = vperm.xlu0 %8433, %v3517_v10   ;;  %v10643_v30 = vpop.permute.xlu1 %6060  ;;  %v3518_v39 = vsel %vm3188_vm1, %v10554_v20, %v3326_v28  ;;  %v3642_v54 = vpack.c.bf16 %v10600_v48, %v10585_v59 }
 0x2f3   : > { %v8642_v43 = vpop.eup %8641  ;;  %6863 = vst.msk [vmem:[%s10312_s26 + $0x88] sm:$0xff] %vm6845_vm2, %v6670_v46  ;;  %8659 = vrcp.f32 %v5141_v23  ;;  %v5144_v55 = vadd.f32 1.0, %v8640_v0  ;;  %12781 = vst [vmem:[#allocation29_spill] sm:$0xff] %v10643_v30  ;;  %v10652_v41 = vpop.f32.mrb[132].mxu0  ;;  %v3641_v23 = vpack.c.bf16 %v3518_v39, %v3517_v10  ;;  %6380 = vperm.xlu1 %8432, %v3518_v39   ;;  %v3911_v49 = vadd.f32 %v8263_v62, %v10201_v24  ;;  %v12841_v30 = vld [vmem:[#allocation25_spill] sm:$0xff] }
 0x2f4   : > { %v8644_v9 = vpop.eup %8643  ;;  %v6675_v1 = vsel %vm3188_vm1, %v10080_v57, %v8642_v43  ;;  %8661 = vpow2.f32 %v7341_v32  ;;  %v10658_v0 = vpop.f32.mrb[244].mxu1  ;;  %v10670_v57 = vsel %vm3188_vm1, %v10590_v35, %v3331_v45  ;;  %v10674_v24 = vadd.f32 %v10446_v8, %v10593_v2  ;;  %v10686_v35 = vld [vmem:[%s12742_s5] ss:$0 sm:$0xff] }
 0x2f5   : > { %v10660_v46 = vpop.f32.mrb[133].mxu0  ;;  %v8646_v20 = vpop.eup %8645  ;;  %6868 = vst.msk [vmem:[%s10312_s26 + $0xb0] sm:$0xff] %vm6845_vm2, %v6675_v1  ;;  %v6673_v28 = vsel %vm3188_vm1, %v10092_v52, %v8644_v9  ;;  %8663 = vrcp.f32 %v5144_v55  ;;  %8365 = vmatprep.mubr.bf16.mxu0 %v3641_v23  ;;  %v7346_v52 = vmul.f32 -1.442695, %v3911_v49  ;;  %v3903_v2 = vadd.f32 %v10686_v35, %v10595_v50 }
 0x2f6   : > { %v10676_v59 = vpop.f32.mrb[245].mxu1  ;;  %v10678_v62 = vpop.f32.mrb[134].mxu0  ;;  %6866 = vst.msk [vmem:[%s10312_s26 + $0xa0] sm:$0xff] %vm6845_vm2, %v6673_v28  ;;  %v5142_v10 = vadd.f32 1.0, %v8646_v20  ;;  %6405 = vperm.xlu0 %8433, %v10670_v57   ;;  %v10692_v45 = vsel %vm3188_vm1, %v2991_v37, %v3332_v18  ;;  %8366 = vmatmul.mubr.bf16.gmra.mrb[232].mxu0 %v3642_v54  ;;  %v3335_v55 = vmax.f32 %v10674_v24, 0.0  ;;  %v10702_v39 = vadd.f32 %v10446_v8, %v10606_v16 }
 0x2f7   : > { %v8648_v48 = vpop.eup %8647  ;;  %v10694_v32 = vpop.f32.mrb[246].mxu1  ;;  %v3914_v50 = vadd.f32 %v10686_v35, %v10608_v60  ;;  %v7344_v18 = vmul.f32 -1.442695, %v3903_v2  ;;  %6410 = vperm.xlu1 %8432, %v10692_v45   ;;  %v3906_v16 = vadd.f32 %v10686_v35, %v10622_v47 }
 0x2f8   : > { %v6676_v43 = vsel %vm3188_vm1, %v10082_v61, %v8648_v48  ;;  %v10706_v9 = vpop.f32.mrb[135].mxu0  ;;  %v8650_v37 = vpop.eup %8649  ;;  %8665 = vrcp.f32 %v5142_v10  ;;  %v3007_v61 = vadd.f32 %v10446_v8, %v10615_v19  ;;  %v3333_v23 = vmax.f32 %v10702_v39, 0.0 }
 0x2f9   : > { %6869 = vst.msk [vmem:[%s10312_s26 + $0xb8] sm:$0xff] %vm6845_vm2, %v6676_v43  ;;  %v10715_v54 = vpop.f32.mrb[247].mxu1  ;;  %v8652_v1 = vpop.eup %8651  ;;  %v6674_v60 = vsel %vm3188_vm1, %v10095_v56, %v8650_v37  ;;  %8667 = vpow2.f32 %v7346_v52  ;;  %v7347_v49 = vmul.f32 -1.442695, %v3914_v50  ;;  %v7345_v47 = vmul.f32 -1.442695, %v3906_v16 }
 0x2fa   : > { %v8654_v20 = vpop.eup %8653  ;;  %6867 = vst.msk [vmem:[%s10312_s26 + $0xa8] sm:$0xff] %vm6845_vm2, %v6674_v60  ;;  %v5147_v28 = vadd.f32 1.0, %v8652_v1  ;;  %v10723_v48 = vpop.permute.xlu0 %6085  ;;  %8669 = vpow2.f32 %v7344_v18  ;;  %v3336_v19 = vmax.f32 %v3007_v61, 0.0  ;;  %v10729_v56 = vadd.f32 %v10446_v8, %v10628_v58 }
 0x2fb   : > { %12782 = vst [vmem:[#allocation30_spill] sm:$0xff] %v10723_v48  ;;  %v8656_v10 = vpop.eup %8655  ;;  %v5145_v2 = vadd.f32 1.0, %v8654_v20  ;;  %v10725_v43 = vpop.permute.xlu1 %6090  ;;  %8671 = vpow2.f32 %v7347_v49  ;;  %v12784_v52 = vmax.f32 %v10603_v3, 0.0  ;;  %v3522_v58 = vsel %vm3188_vm1, %v10626_v25, %v3330_v63 }
 0x2fc   : > { %12783 = vst [vmem:[#allocation31_spill] sm:$0xff] %v10725_v43  ;;  %v10736_v37 = vpop.f32.mrb[136].mxu0  ;;  %v8658_v18 = vpop.eup %8657  ;;  %8673 = vrcp.f32 %v5147_v28  ;;  %v5148_v16 = vadd.f32 1.0, %v8656_v10  ;;  %v3644_v1 = vpack.c.bf16 %v10692_v45, %v10670_v57  ;;  %v3334_v28 = vmax.f32 %v10729_v56, 0.0  ;;  %6400 = vperm.xlu1 %8432, %v3522_v58  }
 0x2fd   : > { %v3521_v50 = vsel %vm3188_vm1, %v10603_v3, %v12784_v52  ;;  %v10745_v60 = vpop.f32.mrb[248].mxu1  ;;  %v10747_v49 = vpop.f32.mrb[137].mxu0  ;;  %v6679_v20 = vsel %vm3188_vm1, %v10100_v12, %v8658_v18  ;;  %8675 = vrcp.f32 %v5145_v2  ;;  %v3927_v12 = vadd.f32 %v10686_v35, %v10652_v41 }
 0x2fe   : > { %6395 = vperm.xlu0 %8433, %v3521_v50   ;;  %v8660_v3 = vpop.eup %8659  ;;  %v3643_v10 = vpack.c.bf16 %v3522_v58, %v3521_v50  ;;  %v10753_v52 = vpop.f32.mrb[249].mxu1  ;;  %6872 = vst.msk [vmem:[%s10312_s26 + $0xd0] sm:$0xff] %vm6845_vm2, %v6679_v20  ;;  %8677 = vrcp.f32 %v5148_v16  ;;  %v10767_v45 = vsel %vm3188_vm1, %v10674_v24, %v3335_v55  ;;  %v3919_v41 = vadd.f32 %v10686_v35, %v10660_v46 }
 0x2ff   : > { %v10755_v25 = vpop.f32.mrb[138].mxu0  ;;  %v8662_v63 = vpop.eup %8661  ;;  %v6677_v57 = vsel %vm3188_vm1, %v10112_v6, %v8660_v3  ;;  %8679 = vpow2.f32 %v7345_v47  ;;  %v3020_v6 = vadd.f32 %v10446_v8, %v10658_v0  ;;  %v7350_v55 = vmul.f32 -1.442695, %v3927_v12 }
 0x300   : > { %v10769_v2 = vpop.f32.mrb[250].mxu1  ;;  %v8664_v50 = vpop.eup %8663  ;;  %6870 = vst.msk [vmem:[%s10312_s26 + $0xc0] sm:$0xff] %vm6845_vm2, %v6677_v57  ;;  %v5146_v18 = vadd.f32 1.0, %v8662_v63  ;;  %8369 = vmatprep.mubr.bf16.mxu0 %v3643_v10  ;;  %v10785_v47 = vsel %vm3188_vm1, %v3007_v61, %v3336_v19  ;;  %v10789_v0 = vadd.f32 %v10446_v8, %v10676_v59  ;;  %v7348_v3 = vmul.f32 -1.442695, %v3919_v41 }
 0x301   : > { %v10777_v16 = vpop.f32.mrb[139].mxu0  ;;  %v6680_v24 = vsel %vm3188_vm1, %v10102_v44, %v8664_v50  ;;  %8370 = vmatmul.mubr.bf16.gmra.mrb[236].mxu0 %v3644_v1  ;;  %v10791_v58 = vpop.f32.mrb[251].mxu1  ;;  %v3339_v46 = vmax.f32 %v3020_v6, 0.0  ;;  %6430 = vperm.xlu1 %8432, %v10785_v47   ;;  %v3930_v44 = vadd.f32 %v10686_v35, %v10678_v62  ;;  %v3023_v19 = vadd.f32 %v10446_v8, %v10694_v32 }
 0x302   : > { %6425 = vperm.xlu0 %8433, %v10767_v45   ;;  %6873 = vst.msk [vmem:[%s10312_s26 + $0xd8] sm:$0xff] %vm6845_vm2, %v6680_v24  ;;  %8681 = vrcp.f32 %v5146_v18  ;;  %v8666_v1 = vpop.eup %8665  ;;  %v10798_v61 = vpop.permute.xlu0 %6075  ;;  %v3337_v59 = vmax.f32 %v10789_v0, 0.0  ;;  %v3922_v20 = vadd.f32 %v10686_v35, %v10706_v9  ;;  %v10812_v12 = vadd.f32 %v10446_v8, %v10715_v54 }
 0x303   : > { %12785 = vst [vmem:[#allocation32_spill] sm:$0xff] %v10798_v61  ;;  %8683 = vpow2.f32 %v7350_v55  ;;  %v8668_v10 = vpop.eup %8667  ;;  %v6678_v63 = vsel %vm3188_vm1, %v10115_v26, %v8666_v1  ;;  %v10808_v57 = vpop.permute.xlu1 %6080  ;;  %v7351_v62 = vmul.f32 -1.442695, %v3930_v44  ;;  %v3340_v9 = vmax.f32 %v3023_v19, 0.0 }
 0x304   : > { %12786 = vst [vmem:[#allocation33_spill] sm:$0xff] %v10808_v57  ;;  %8685 = vpow2.f32 %v7348_v3  ;;  %v10814_v50 = vpop.f32.mrb[140].mxu0  ;;  %v8670_v18 = vpop.eup %8669  ;;  %6871 = vst.msk [vmem:[%s10312_s26 + $0xc8] sm:$0xff] %vm6845_vm2, %v6678_v63  ;;  %v5151_v32 = vadd.f32 1.0, %v8668_v10  ;;  %v7349_v41 = vmul.f32 -1.442695, %v3922_v20  ;;  %v3525_v26 = vsel %vm3188_vm1, %v10702_v39, %v3333_v23 }
 0x305   : > { %v10823_v24 = vpop.f32.mrb[252].mxu1  ;;  %v10825_v55 = vpop.f32.mrb[141].mxu0  ;;  %v5149_v3 = vadd.f32 1.0, %v8670_v18  ;;  %8687 = vpow2.f32 %v7351_v62  ;;  %v3526_v1 = vsel %vm3188_vm1, %v10729_v56, %v3334_v28  ;;  %v3646_v62 = vpack.c.bf16 %v10785_v47, %v10767_v45  ;;  %v12823_v57 = vld [vmem:[#allocation17_spill] sm:$0xff] }
 0x306   : > { %v8672_v54 = vpop.eup %8671  ;;  %6415 = vperm.xlu0 %8433, %v3525_v26   ;;  %v10831_v20 = vpop.f32.mrb[253].mxu1  ;;  %8689 = vrcp.f32 %v5151_v32  ;;  %v3645_v63 = vpack.c.bf16 %v3526_v1, %v3525_v26  ;;  %6420 = vperm.xlu1 %8432, %v3526_v1   ;;  %v3943_v28 = vadd.f32 %v10686_v35, %v10736_v37  ;;  %v10846_v32 = vsel %vm3188_vm1, %v3020_v6, %v3339_v46 }
 0x307   : > { %v10833_v10 = vpop.f32.mrb[142].mxu0  ;;  %v8674_v39 = vpop.eup %8673  ;;  %v5152_v23 = vadd.f32 1.0, %v8672_v54  ;;  %8691 = vrcp.f32 %v5149_v3  ;;  %v3935_v37 = vadd.f32 %v10686_v35, %v10747_v49 }
 0x308   : > { %v10837_v18 = vpop.f32.mrb[254].mxu1  ;;  %v8676_v44 = vpop.eup %8675  ;;  %v6683_v56 = vsel %vm3188_vm1, %v10120_v11, %v8674_v39  ;;  %8373 = vmatprep.mubr.bf16.mxu0 %v3645_v63  ;;  %v3036_v11 = vadd.f32 %v10446_v8, %v10745_v60  ;;  %v10869_v60 = vsel %vm3188_vm1, %v3023_v19, %v3340_v9  ;;  %v3946_v19 = vadd.f32 %v10686_v35, %v10755_v25 }
 0x309   : > { %v10848_v26 = vpop.f32.mrb[143].mxu0  ;;  %v8678_v54 = vpop.eup %8677  ;;  %6876 = vst.msk [vmem:[%s10312_s26 + $0xf0] sm:$0xff] %vm6845_vm2, %v6683_v56  ;;  %v6681_v45 = vsel %vm3188_vm1, %v10132_v27, %v8676_v44  ;;  %8693 = vrcp.f32 %v5152_v23  ;;  %8374 = vmatmul.mubr.bf16.gmra.mrb[240].mxu0 %v3646_v62  ;;  %v7354_v27 = vmul.f32 -1.442695, %v3943_v28  ;;  %v7352_v1 = vmul.f32 -1.442695, %v3935_v37 }
 0x30a   : > { %v10859_v6 = vpop.f32.mrb[255].mxu1  ;;  %v8680_v47 = vpop.eup %8679  ;;  %6874 = vst.msk [vmem:[%s10312_s26 + $0xe0] sm:$0xff] %vm6845_vm2, %v6681_v45  ;;  %v6684_v46 = vsel %vm3188_vm1, %v10122_v31, %v8678_v54  ;;  %8695 = vpow2.f32 %v7349_v41  ;;  %6445 = vperm.xlu0 %8433, %v10846_v32   ;;  %v3343_v44 = vmax.f32 %v3036_v11, 0.0  ;;  %6450 = vperm.xlu1 %8432, %v10869_v60   ;;  %v10878_v31 = vadd.f32 %v10446_v8, %v10753_v52 }
 0x30b   : > { %6877 = vst.msk [vmem:[%s10312_s26 + $0xf8] sm:$0xff] %vm6845_vm2, %v6684_v46  ;;  %v5150_v49 = vadd.f32 1.0, %v8680_v47  ;;  %v10873_v3 = vpop.permute.xlu0 %6105  ;;  %v10880_v39 = vpop.permute.xlu1 %6110  ;;  %8697 = vpow2.f32 %v7354_v27  ;;  %v3039_v9 = vadd.f32 %v10446_v8, %v10769_v2  ;;  %v3938_v23 = vadd.f32 %v10686_v35, %v10777_v16 }
 0x30c   : > { %12787 = vst [vmem:[#allocation34_spill] sm:$0xff] %v10873_v3  ;;  %v8682_v41 = vpop.eup %8681  ;;  %12788 = vst [vmem:[#allocation35_spill] sm:$0xff] %v10880_v39  ;;  %v10888_v63 = vpop.f32.mrb[144].mxu0  ;;  %v10896_v28 = vadd.f32 %v10446_v8, %v10791_v58  ;;  %v7355_v45 = vmul.f32 -1.442695, %v3946_v19  ;;  %v12789_v19 = vmax.f32 %v10812_v12, 0.0  ;;  %v10931_v56 = vsel %vm3188_vm1, %v3036_v11, %v3343_v44 }
 0x30d   : > { %v8684_v62 = vpop.eup %8683  ;;  %v6682_v52 = vsel %vm3188_vm1, %v10135_v42, %v8682_v41  ;;  %8699 = vrcp.f32 %v5150_v49  ;;  %v10898_v25 = vpop.f32.mrb[0].mxu1  ;;  %v3344_v37 = vmax.f32 %v3039_v9, 0.0  ;;  %v7353_v27 = vmul.f32 -1.442695, %v3938_v23  ;;  %v12808_v39 = vld [vmem:[#allocation10_spill] sm:$0xff] }
 0x30e   : > { %v10900_v2 = vpop.f32.mrb[145].mxu0  ;;  %v8686_v54 = vpop.eup %8685  ;;  %6875 = vst.msk [vmem:[%s10312_s26 + $0xe8] sm:$0xff] %vm6845_vm2, %v6682_v52  ;;  %v5155_v16 = vadd.f32 1.0, %v8684_v62  ;;  %8701 = vpow2.f32 %v7352_v1  ;;  %v3529_v49 = vsel %vm3188_vm1, %v10789_v0, %v3337_v59  ;;  %v3530_v23 = vsel %vm3188_vm1, %v10812_v12, %v12789_v19 }
 0x30f   : > { %v10904_v47 = vpop.f32.mrb[1].mxu1  ;;  %v10906_v42 = vpop.f32.mrb[146].mxu0  ;;  %v5153_v46 = vadd.f32 1.0, %v8686_v54  ;;  %6435 = vperm.xlu0 %8433, %v3529_v49   ;;  %v3648_v52 = vpack.c.bf16 %v10869_v60, %v10846_v32  ;;  %v3959_v0 = vadd.f32 %v10686_v35, %v10814_v50  ;;  %6440 = vperm.xlu1 %8432, %v3530_v23   ;;  %v10938_v50 = vadd.f32 %v10446_v8, %v10823_v24 }
 0x310   : > { %v10914_v41 = vpop.f32.mrb[2].mxu1  ;;  %v10916_v62 = vpop.f32.mrb[147].mxu0  ;;  %8703 = vrcp.f32 %v5155_v16  ;;  %v3647_v16 = vpack.c.bf16 %v3530_v23, %v3529_v49  ;;  %v3951_v44 = vadd.f32 %v10686_v35, %v10825_v55  ;;  %v10962_v55 = vadd.f32 %v10446_v8, %v10831_v20 }
 0x311   : > { %v8688_v1 = vpop.eup %8687  ;;  %v10927_v59 = vpop.f32.mrb[3].mxu1  ;;  %8705 = vrcp.f32 %v5153_v46  ;;  %v7358_v60 = vmul.f32 -1.442695, %v3959_v0  ;;  %v3055_v23 = vadd.f32 %v10446_v8, %v10837_v18  ;;  %v10982_v0 = vadd.f32 %v10446_v8, %v10859_v6 }
 0x312   : > { %v8690_v54 = vpop.eup %8689  ;;  %v5156_v58 = vadd.f32 1.0, %v8688_v1  ;;  %8707 = vpow2.f32 %v7355_v45  ;;  %8377 = vmatprep.mubr.bf16.mxu0 %v3647_v16  ;;  %v10956_v49 = vpop.permute.xlu0 %6095 }
 0x313   : > { %v8692_v12 = vpop.eup %8691  ;;  %v6687_v32 = vsel %vm3188_vm1, %v10140_v14, %v8690_v54  ;;  %v10949_v14 = vsel %vm3188_vm1, %v3039_v9, %v3344_v37  ;;  %12790 = vst [vmem:[#allocation36_spill] sm:$0xff] %v10956_v49  ;;  %8378 = vmatmul.mubr.bf16.gmra.mrb[244].mxu0 %v3648_v52  ;;  %6465 = vperm.xlu0 %8433, %v10931_v56   ;;  %v10964_v9 = vpop.f32.mrb[148].mxu0 }
 0x314   : > { %v8694_v46 = vpop.eup %8693  ;;  %6880 = vst.msk [vmem:[%s10312_s26 + $0x110] sm:$0xff] %vm6845_vm2, %v6687_v32  ;;  %v6685_v11 = vsel %vm3188_vm1, %v10152_v51, %v8692_v12  ;;  %8709 = vrcp.f32 %v5156_v58  ;;  %v3347_v51 = vmax.f32 %v10938_v50, 0.0  ;;  %v10968_v58 = vpop.permute.xlu1 %6100  ;;  %6470 = vperm.xlu1 %8432, %v10949_v14   ;;  %v3954_v52 = vadd.f32 %v10686_v35, %v10848_v26 }
 0x315   : > { %v8696_v45 = vpop.eup %8695  ;;  %6878 = vst.msk [vmem:[%s10312_s26 + $0x100] sm:$0xff] %vm6845_vm2, %v6685_v11  ;;  %v6688_v24 = vsel %vm3188_vm1, %v10142_v53, %v8694_v46  ;;  %8711 = vpow2.f32 %v7353_v27  ;;  %12791 = vst [vmem:[#allocation37_spill] sm:$0xff] %v10968_v58  ;;  %v7356_v53 = vmul.f32 -1.442695, %v3951_v44  ;;  %v3962_v27 = vadd.f32 %v10686_v35, %v10833_v10  ;;  %v10973_v1 = vpop.f32.mrb[4].mxu1  ;;  %v12793_v11 = vld [vmem:[#allocation3_spill] sm:$0xff] }
 0x316   : > { %6881 = vst.msk [vmem:[%s10312_s26 + $0x118] sm:$0xff] %vm6845_vm2, %v6688_v24  ;;  %v5154_v37 = vadd.f32 1.0, %v8696_v45  ;;  %8713 = vpow2.f32 %v7358_v60  ;;  %v8698_v19 = vpop.eup %8697  ;;  %v10984_v54 = vpop.f32.mrb[149].mxu0  ;;  %v12792_v60 = vmax.f32 %v10878_v31, 0.0  ;;  %v3348_v45 = vmax.f32 %v3055_v23, 0.0 }
 0x317   : > { %v10986_v16 = vpop.f32.mrb[5].mxu1  ;;  %v8700_v10 = vpop.eup %8699  ;;  %v5159_v12 = vadd.f32 1.0, %v8698_v19  ;;  %v7359_v32 = vmul.f32 -1.442695, %v3962_v27  ;;  %v7357_v24 = vmul.f32 -1.442695, %v3954_v52 }
 0x318   : > { %8715 = vrcp.f32 %v5154_v37  ;;  %v3533_v18 = vsel %vm3188_vm1, %v10878_v31, %v12792_v60  ;;  %v10993_v26 = vpop.f32.mrb[150].mxu0  ;;  %v10995_v46 = vpop.f32.mrb[6].mxu1  ;;  %v6686_v44 = vsel %vm3188_vm1, %v12793_v11, %v8700_v10  ;;  %v12794_v19 = vmax.f32 %v10896_v28, 0.0 }
 0x319   : > { %v8702_v6 = vpop.eup %8701  ;;  %8717 = vpow2.f32 %v7356_v53  ;;  %6455 = vperm.xlu0 %8433, %v3533_v18   ;;  %v11000_v37 = vpop.f32.mrb[151].mxu0  ;;  %6879 = vst.msk [vmem:[%s10312_s26 + $0x108] sm:$0xff] %vm6845_vm2, %v6686_v44  ;;  %v3650_v11 = vpack.c.bf16 %v10949_v14, %v10931_v56  ;;  %v12795_v44 = vld [vmem:[#allocation2_spill] sm:$0xff] }
 0x31a   : > { %8719 = vrcp.f32 %v5159_v12  ;;  %v5157_v27 = vadd.f32 1.0, %v8702_v6  ;;  %v3534_v60 = vsel %vm3188_vm1, %v10896_v28, %v12794_v19  ;;  %v11010_v10 = vpop.f32.mrb[7].mxu1  ;;  %v8704_v53 = vpop.eup %8703  ;;  %v3975_v12 = vadd.f32 %v10686_v35, %v10888_v63  ;;  %v12796_v63 = vld [vmem:[#allocation5_spill] sm:$0xff] }
 0x31b   : > { %8721 = vpow2.f32 %v7359_v32  ;;  %v3649_v52 = vpack.c.bf16 %v3534_v60, %v3533_v18  ;;  %6460 = vperm.xlu1 %8432, %v3534_v60   ;;  %v8706_v6 = vpop.eup %8705  ;;  %v6691_v31 = vsel %vm3188_vm1, %v12795_v44, %v8704_v53  ;;  %v11022_v28 = vsel %vm3188_vm1, %v10938_v50, %v3347_v51  ;;  %v11033_v18 = vpop.permute.xlu0 %6125 }
 0x31c   : > { %8723 = vrcp.f32 %v5157_v27  ;;  %v11026_v32 = vadd.f32 %v10446_v8, %v10898_v25  ;;  %v8708_v56 = vpop.eup %8707  ;;  %6884 = vst.msk [vmem:[%s10312_s26 + $0x130] sm:$0xff] %vm6845_vm2, %v6691_v31  ;;  %v6689_v14 = vsel %vm3188_vm1, %v12796_v63, %v8706_v6  ;;  %12797 = vst [vmem:[#allocation3_spill] sm:$0xff] %v11033_v18  ;;  %v7362_v27 = vmul.f32 -1.442695, %v3975_v12  ;;  %v11038_v51 = vpop.f32.mrb[152].mxu0  ;;  %v12799_v12 = vld [vmem:[#allocation4_spill] sm:$0xff] }
 0x31d   : > { %8725 = vpow2.f32 %v7357_v24  ;;  %8381 = vmatprep.mubr.bf16.mxu0 %v3649_v52  ;;  %6485 = vperm.xlu0 %8433, %v11022_v28   ;;  %v3967_v50 = vadd.f32 %v10686_v35, %v10900_v2  ;;  %6882 = vst.msk [vmem:[%s10312_s26 + $0x120] sm:$0xff] %vm6845_vm2, %v6689_v14  ;;  %v11042_v31 = vpop.permute.xlu1 %6130  ;;  %v5160_v19 = vadd.f32 1.0, %v8708_v56  ;;  %v11047_v24 = vsel %vm3188_vm1, %v3055_v23, %v3348_v45  ;;  %v11053_v2 = vpop.f32.mrb[8].mxu1 }
 0x31e   : > { %v8710_v25 = vpop.eup %8709  ;;  %12798 = vst [vmem:[#allocation2_spill] sm:$0xff] %v11042_v31  ;;  %8382 = vmatmul.mubr.bf16.gmra.mrb[248].mxu0 %v3650_v11  ;;  %v3351_v60 = vmax.f32 %v11026_v32, 0.0  ;;  %v11051_v53 = vadd.f32 %v10446_v8, %v10904_v47  ;;  %8727 = vpow2.f32 %v7362_v27  ;;  %v3978_v11 = vadd.f32 %v10686_v35, %v10906_v42  ;;  %v11061_v23 = vpop.f32.mrb[153].mxu0 }
 0x31f   : > { %v8712_v52 = vpop.eup %8711  ;;  %v6692_v6 = vsel %vm3188_vm1, %v12799_v12, %v8710_v25  ;;  %v7360_v44 = vmul.f32 -1.442695, %v3967_v50  ;;  %6490 = vperm.xlu1 %8432, %v11047_v24   ;;  %v11063_v45 = vpop.f32.mrb[9].mxu1  ;;  %8729 = vrcp.f32 %v5160_v19  ;;  %v3071_v14 = vadd.f32 %v10446_v8, %v10914_v41  ;;  %v11081_v8 = vld [vmem:[%s12740_s3] ss:$0 sm:$0xff] }
 0x320   : > { %v8714_v47 = vpop.eup %8713  ;;  %6885 = vst.msk [vmem:[%s10312_s26 + $0x138] sm:$0xff] %vm6845_vm2, %v6692_v6  ;;  %v5158_v56 = vadd.f32 1.0, %v8712_v52  ;;  %v11070_v27 = vpop.f32.mrb[154].mxu0  ;;  %v7363_v42 = vmul.f32 -1.442695, %v3978_v11  ;;  %v3970_v12 = vadd.f32 %v10686_v35, %v10916_v62  ;;  %v11085_v41 = vadd.f32 %v11081_v8, %v10927_v59 }
 0x321   : > { %v11072_v50 = vpop.f32.mrb[10].mxu1  ;;  %v5163_v25 = vadd.f32 1.0, %v8714_v47  ;;  %8731 = vpow2.f32 %v7360_v44  ;;  %v11076_v20 = vpop.f32.mrb[155].mxu0  ;;  %v3352_v52 = vmax.f32 %v3071_v14, 0.0  ;;  %v12800_v6 = vmax.f32 %v10962_v55, 0.0  ;;  %v12801_v47 = vld [vmem:[#allocation6_spill] sm:$0xff] }
 0x322   : > { %v8716_v19 = vpop.eup %8715  ;;  %8733 = vrcp.f32 %v5158_v56  ;;  %v11092_v44 = vpop.f32.mrb[11].mxu1  ;;  %v7361_v63 = vmul.f32 -1.442695, %v3970_v12  ;;  %v12802_v31 = vmax.f32 %v10982_v0, 0.0 }
 0x323   : > { %v3537_v62 = vsel %vm3188_vm1, %v10962_v55, %v12800_v6  ;;  %v8718_v11 = vpop.eup %8717  ;;  %v6690_v56 = vsel %vm3188_vm1, %v12801_v47, %v8716_v19  ;;  %8735 = vrcp.f32 %v5163_v25  ;;  %v12803_v25 = vld [vmem:[#allocation7_spill] sm:$0xff]  ;;  %v11108_v47 = vpop.permute.xlu0 %6115  ;;  %v12807_v6 = vld [vmem:[#allocation8_spill] sm:$0xff] }
 0x324   : > { %6475 = vperm.xlu0 %8433, %v3537_v62   ;;  %v3538_v59 = vsel %vm3188_vm1, %v10982_v0, %v12802_v31  ;;  %v8720_v18 = vpop.eup %8719  ;;  %6883 = vst.msk [vmem:[%s10312_s26 + $0x128] sm:$0xff] %vm6845_vm2, %v6690_v56  ;;  %v5161_v55 = vadd.f32 1.0, %v8718_v11  ;;  %8737 = vpow2.f32 %v7363_v42  ;;  %12804 = vst [vmem:[#allocation5_spill] sm:$0xff] %v11108_v47  ;;  %v3652_v0 = vpack.c.bf16 %v11047_v24, %v11022_v28  ;;  %v11114_v11 = vpop.f32.mrb[156].mxu0 }
 0x325   : > { %v3651_v58 = vpack.c.bf16 %v3538_v59, %v3537_v62  ;;  %6480 = vperm.xlu1 %8432, %v3538_v59   ;;  %v8722_v19 = vpop.eup %8721  ;;  %v6695_v12 = vsel %vm3188_vm1, %v12803_v25, %v8720_v18  ;;  %8739 = vpow2.f32 %v7361_v63  ;;  %v3991_v31 = vadd.f32 %v10686_v35, %v10964_v9  ;;  %v11118_v62 = vpop.permute.xlu1 %6120  ;;  %v12806_v63 = vld [vmem:[#allocation9_spill] sm:$0xff] }
 0x326   : > { %v8724_v42 = vpop.eup %8723  ;;  %6888 = vst.msk [vmem:[%s10312_s26 + $0x150] sm:$0xff] %vm6845_vm2, %v6695_v12  ;;  %12805 = vst [vmem:[#allocation4_spill] sm:$0xff] %v11118_v62  ;;  %8741 = vrcp.f32 %v5161_v55  ;;  %v5164_v56 = vadd.f32 1.0, %v8722_v19  ;;  %v11123_v18 = vsel %vm3188_vm1, %v11026_v32, %v3351_v60  ;;  %v11127_v28 = vadd.f32 %v11081_v8, %v10973_v1  ;;  %v11129_v9 = vpop.f32.mrb[12].mxu1 }
 0x327   : > { %8385 = vmatprep.mubr.bf16.mxu0 %v3651_v58  ;;  %v8726_v24 = vpop.eup %8725  ;;  %v6693_v59 = vsel %vm3188_vm1, %v12806_v63, %v8724_v42  ;;  %v7366_v55 = vmul.f32 -1.442695, %v3991_v31  ;;  %v3983_v58 = vadd.f32 %v10686_v35, %v10984_v54  ;;  %v11139_v32 = vsel %vm3188_vm1, %v3071_v14, %v3352_v52  ;;  %v11141_v1 = vpop.f32.mrb[157].mxu0 }
 0x328   : > { %8386 = vmatmul.mubr.bf16.gmra.mrb[252].mxu0 %v3652_v0  ;;  %6505 = vperm.xlu0 %8433, %v11123_v18   ;;  %v11143_v60 = vpop.f32.mrb[13].mxu1  ;;  %6886 = vst.msk [vmem:[%s10312_s26 + $0x140] sm:$0xff] %vm6845_vm2, %v6693_v59  ;;  %8743 = vrcp.f32 %v5164_v56  ;;  %v5162_v19 = vadd.f32 1.0, %v8726_v24  ;;  %v3355_v25 = vmax.f32 %v11127_v28, 0.0  ;;  %v11151_v54 = vpop.f32.mrb[158].mxu0  ;;  %v11157_v31 = vadd.f32 %v11081_v8, %v10986_v16 }
 0x329   : > { %6510 = vperm.xlu1 %8432, %v11139_v32   ;;  %v11153_v0 = vpop.f32.mrb[14].mxu1  ;;  %v8728_v14 = vpop.eup %8727  ;;  %8745 = vpow2.f32 %v7366_v55  ;;  %v7364_v52 = vmul.f32 -1.442695, %v3983_v58  ;;  %v3994_v42 = vadd.f32 %v10686_v35, %v10993_v26  ;;  %v3087_v59 = vadd.f32 %v11081_v8, %v10995_v46 }
 0x32a   : > { %v11161_v56 = vpop.f32.mrb[159].mxu0  ;;  %v8730_v24 = vpop.eup %8729  ;;  %8747 = vrcp.f32 %v5162_v19  ;;  %v5167_v63 = vadd.f32 1.0, %v8728_v14  ;;  %v3986_v55 = vadd.f32 %v10686_v35, %v11000_v37  ;;  %v3116_v43 = vadd.f32 %v11081_v8, %v11129_v9 }
 0x32b   : > { %v11167_v58 = vpop.f32.mrb[15].mxu1  ;;  %v8732_v12 = vpop.eup %8731  ;;  %v6696_v16 = vsel %vm3188_vm1, %v12807_v6, %v8730_v24  ;;  %8749 = vpow2.f32 %v7364_v52  ;;  %v7367_v62 = vmul.f32 -1.442695, %v3994_v42  ;;  %v3356_v14 = vmax.f32 %v3087_v59, 0.0 }
 0x32c   : > { %v8734_v19 = vpop.eup %8733  ;;  %6889 = vst.msk [vmem:[%s10312_s26 + $0x158] sm:$0xff] %vm6845_vm2, %v6696_v16  ;;  %8751 = vrcp.f32 %v5167_v63  ;;  %v5165_v46 = vadd.f32 1.0, %v8732_v12  ;;  %v7365_v47 = vmul.f32 -1.442695, %v3986_v55  ;;  %v11178_v3 = vpop.permute.xlu0 %6145  ;;  %v11182_v6 = vadd.f32 %v11081_v8, %v11010_v10  ;;  %v12812_v63 = vld [vmem:[#allocation11_spill] sm:$0xff] }
 0x32d   : > { %v8736_v37 = vpop.eup %8735  ;;  %v6694_v49 = vsel %vm3188_vm1, %v12808_v39, %v8734_v19  ;;  %12809 = vst [vmem:[#allocation6_spill] sm:$0xff] %v11178_v3  ;;  %8753 = vpow2.f32 %v7367_v62  ;;  %v12810_v52 = vmax.f32 %v11051_v53, 0.0  ;;  %v11189_v42 = vpop.f32.mrb[160].mxu0  ;;  %v12813_v10 = vmax.f32 %v11085_v41, 0.0 }
 0x32e   : > { %v8738_v24 = vpop.eup %8737  ;;  %6887 = vst.msk [vmem:[%s10312_s26 + $0x148] sm:$0xff] %vm6845_vm2, %v6694_v49  ;;  %v11193_v39 = vpop.permute.xlu1 %6150  ;;  %v6699_v62 = vsel %vm3188_vm1, %v12812_v63, %v8736_v37  ;;  %8755 = vrcp.f32 %v5165_v46  ;;  %v4026_v9 = vadd.f32 %v10686_v35, %v11151_v54  ;;  %v12827_v54 = vld [vmem:[#allocation18_spill] sm:$0xff] }
 0x32f   : > { %v3541_v12 = vsel %vm3188_vm1, %v11051_v53, %v12810_v52  ;;  %12811 = vst [vmem:[#allocation7_spill] sm:$0xff] %v11193_v39  ;;  %v3542_v55 = vsel %vm3188_vm1, %v11085_v41, %v12813_v10  ;;  %v4007_v53 = vadd.f32 %v10686_v35, %v11038_v51  ;;  %v11205_v16 = vpop.f32.mrb[16].mxu1  ;;  %v8740_v49 = vpop.eup %8739  ;;  %6892 = vst.msk [vmem:[%s10312_s26 + $0x170] sm:$0xff] %vm6845_vm2, %v6699_v62  ;;  %v5168_v19 = vadd.f32 1.0, %v8738_v24  ;;  %v12814_v62 = vld [vmem:[#allocation13_spill] sm:$0xff] }
 0x330   : > { %6495 = vperm.xlu0 %8433, %v3541_v12   ;;  %8757 = vpow2.f32 %v7365_v47  ;;  %v3653_v46 = vpack.c.bf16 %v3542_v55, %v3541_v12  ;;  %6500 = vperm.xlu1 %8432, %v3542_v55   ;;  %v11210_v52 = vpop.f32.mrb[161].mxu0  ;;  %v11212_v63 = vpop.f32.mrb[17].mxu1  ;;  %v5166_v10 = vadd.f32 1.0, %v8740_v49  ;;  %v11217_v51 = vsel %vm3188_vm1, %v11127_v28, %v3355_v25 }
 0x331   : > { %v8742_v41 = vpop.eup %8741  ;;  %v7370_v26 = vmul.f32 -1.442695, %v4007_v53  ;;  %v11221_v47 = vadd.f32 %v11081_v8, %v11053_v2  ;;  %v11223_v24 = vpop.f32.mrb[162].mxu0  ;;  %8759 = vrcp.f32 %v5168_v19  ;;  %v3999_v53 = vadd.f32 %v10686_v35, %v11061_v23 }
 0x332   : > { %v11225_v12 = vpop.f32.mrb[18].mxu1  ;;  %v6697_v55 = vsel %vm3188_vm1, %v12814_v62, %v8742_v41  ;;  %8389 = vmatprep.mubr.bf16.mxu0 %v3653_v46  ;;  %v11234_v28 = vsel %vm3188_vm1, %v3087_v59, %v3356_v14  ;;  %v11236_v25 = vpop.f32.mrb[163].mxu0  ;;  %8761 = vrcp.f32 %v5166_v10  ;;  %v12815_v49 = vpack.c.bf16 %v11139_v32, %v11123_v18  ;;  %v12816_v41 = vld [vmem:[#allocation12_spill] sm:$0xff] }
 0x333   : > { %v8744_v2 = vpop.eup %8743  ;;  %6890 = vst.msk [vmem:[%s10312_s26 + $0x160] sm:$0xff] %vm6845_vm2, %v6697_v55  ;;  %v3359_v19 = vmax.f32 %v11221_v47, 0.0  ;;  %v11249_v59 = vadd.f32 %v11081_v8, %v11063_v45  ;;  %v11251_v14 = vpop.f32.mrb[19].mxu1  ;;  %8763 = vpow2.f32 %v7370_v26  ;;  %v7368_v18 = vmul.f32 -1.442695, %v3999_v53 }
 0x334   : > { %8390 = vmatmul.mubr.bf16.gmra.mrb[0].mxu0 %v12815_v49  ;;  %6525 = vperm.xlu0 %8433, %v11217_v51   ;;  %v8746_v46 = vpop.eup %8745  ;;  %v6700_v10 = vsel %vm3188_vm1, %v12816_v41, %v8744_v2  ;;  %v4010_v32 = vadd.f32 %v10686_v35, %v11070_v27  ;;  %v3103_v49 = vadd.f32 %v11081_v8, %v11072_v50  ;;  %v11266_v53 = vpop.permute.xlu0 %6135  ;;  %v12818_v41 = vld [vmem:[#allocation14_spill] sm:$0xff] }
 0x335   : > { %6530 = vperm.xlu1 %8432, %v11234_v28   ;;  %v8748_v62 = vpop.eup %8747  ;;  %6893 = vst.msk [vmem:[%s10312_s26 + $0x178] sm:$0xff] %vm6845_vm2, %v6700_v10  ;;  %v5171_v45 = vadd.f32 1.0, %v8746_v46  ;;  %v4002_v2 = vadd.f32 %v10686_v35, %v11076_v20  ;;  %12817 = vst [vmem:[#allocation9_spill] sm:$0xff] %v11266_v53  ;;  %8765 = vpow2.f32 %v7368_v18  ;;  %v11273_v46 = vadd.f32 %v11081_v8, %v11092_v44  ;;  %v11275_v10 = vpop.f32.mrb[164].mxu0 }
 0x336   : > { %v8750_v26 = vpop.eup %8749  ;;  %v6698_v23 = vsel %vm3188_vm1, %v12818_v41, %v8748_v62  ;;  %v7371_v27 = vmul.f32 -1.442695, %v4010_v32  ;;  %v11279_v20 = vpop.permute.xlu1 %6140  ;;  %v3360_v37 = vmax.f32 %v3103_v49, 0.0  ;;  %v12820_v32 = vld [vmem:[#allocation15_spill] sm:$0xff]  ;;  %v12821_v41 = vmax.f32 %v11157_v31, 0.0 }
 0x337   : > { %v8752_v55 = vpop.eup %8751  ;;  %6891 = vst.msk [vmem:[%s10312_s26 + $0x168] sm:$0xff] %vm6845_vm2, %v6698_v23  ;;  %12819 = vst [vmem:[#allocation8_spill] sm:$0xff] %v11279_v20  ;;  %8767 = vrcp.f32 %v5171_v45  ;;  %v5169_v50 = vadd.f32 1.0, %v8750_v26  ;;  %v7369_v39 = vmul.f32 -1.442695, %v4002_v2  ;;  %v11281_v53 = vpop.f32.mrb[20].mxu1 }
 0x338   : > { %v8754_v18 = vpop.eup %8753  ;;  %v6703_v44 = vsel %vm3188_vm1, %v12820_v32, %v8752_v55  ;;  %8769 = vpow2.f32 %v7371_v27  ;;  %v3358_v62 = vmax.f32 %v11273_v46, 0.0  ;;  %v3545_v23 = vsel %vm3188_vm1, %v11157_v31, %v12821_v41  ;;  %v11292_v45 = vpop.f32.mrb[165].mxu0 }
 0x339   : > { %v11294_v26 = vpop.f32.mrb[21].mxu1  ;;  %v8756_v2 = vpop.eup %8755  ;;  %6896 = vst.msk [vmem:[%s10312_s26 + $0x190] sm:$0xff] %vm6845_vm2, %v6703_v44  ;;  %8771 = vrcp.f32 %v5169_v50  ;;  %v5172_v20 = vadd.f32 1.0, %v8754_v18  ;;  %6515 = vperm.xlu0 %8433, %v3545_v23   ;;  %v12822_v55 = vmax.f32 %v11182_v6, 0.0  ;;  %v4023_v31 = vadd.f32 %v10686_v35, %v11114_v11 }
 0x33a   : > { %v11305_v32 = vpop.f32.mrb[166].mxu0  ;;  %v11307_v41 = vpop.f32.mrb[22].mxu1  ;;  %v6701_v50 = vsel %vm3188_vm1, %v12823_v57, %v8756_v2  ;;  %8773 = vpow2.f32 %v7369_v39  ;;  %v11315_v44 = vsel %vm3188_vm1, %v11221_v47, %v3359_v19  ;;  %v4015_v47 = vadd.f32 %v10686_v35, %v11141_v1 }
 0x33b   : > { %v3546_v27 = vsel %vm3188_vm1, %v11182_v6, %v12822_v55  ;;  %v8758_v3 = vpop.eup %8757  ;;  %v11317_v6 = vpop.f32.mrb[167].mxu0  ;;  %6894 = vst.msk [vmem:[%s10312_s26 + $0x180] sm:$0xff] %vm6845_vm2, %v6701_v50  ;;  %8775 = vrcp.f32 %v5172_v20  ;;  %v7374_v55 = vmul.f32 -1.442695, %v4023_v31  ;;  %v11331_v19 = vsel %vm3188_vm1, %v3103_v49, %v3360_v37 }
 0x33c   : > { %v3655_v18 = vpack.c.bf16 %v3546_v27, %v3545_v23  ;;  %6520 = vperm.xlu1 %8432, %v3546_v27   ;;  %v5170_v11 = vadd.f32 1.0, %v8758_v3  ;;  %v11323_v61 = vpop.f32.mrb[23].mxu1  ;;  %v8760_v57 = vpop.eup %8759  ;;  %v11335_v3 = vadd.f32 %v11081_v8, %v11143_v60  ;;  %v12825_v23 = vld [vmem:[#allocation16_spill] sm:$0xff]  ;;  %v12826_v1 = vpack.c.bf16 %v11234_v28, %v11217_v51  ;;  %v11400_v51 = vld [vmem:[%s12742_s5] ss:$0 sm:$0xff] }
 0x33d   : > { %v11325_v39 = vpop.permute.xlu0 %6165  ;;  %v8762_v20 = vpop.eup %8761  ;;  %v6704_v2 = vsel %vm3188_vm1, %v12825_v23, %v8760_v57  ;;  %6545 = vperm.xlu0 %8433, %v11315_v44   ;;  %v3363_v37 = vmax.f32 %v3116_v43, 0.0  ;;  %v3658_v60 = vpack.c.bf16 %v11331_v19, %v11315_v44  ;;  %v7372_v31 = vmul.f32 -1.442695, %v4015_v47 }
 0x33e   : > { %12824 = vst [vmem:[#allocation10_spill] sm:$0xff] %v11325_v39  ;;  %8393 = vmatprep.mubr.bf16.mxu0 %v3655_v18  ;;  %8777 = vrcp.f32 %v5170_v11  ;;  %v8764_v49 = vpop.eup %8763  ;;  %6897 = vst.msk [vmem:[%s10312_s26 + $0x198] sm:$0xff] %vm6845_vm2, %v6704_v2  ;;  %v6702_v27 = vsel %vm3188_vm1, %v12827_v54, %v8762_v20  ;;  %v11355_v28 = vpop.f32.mrb[168].mxu0  ;;  %v7375_v44 = vmul.f32 -1.442695, %v4026_v9  ;;  %v3119_v11 = vadd.f32 %v11081_v8, %v11153_v0 }
 0x33f   : > { %8394 = vmatmul.mubr.bf16.gmra.mrb[4].mxu0 %v12826_v1  ;;  %8779 = vpow2.f32 %v7374_v55  ;;  %v11357_v50 = vpop.permute.xlu1 %6170  ;;  %6895 = vst.msk [vmem:[%s10312_s26 + $0x188] sm:$0xff] %vm6845_vm2, %v6702_v27  ;;  %v5175_v18 = vadd.f32 1.0, %v8764_v49  ;;  %v4018_v57 = vadd.f32 %v10686_v35, %v11161_v56  ;;  %v11365_v55 = vpop.f32.mrb[24].mxu1  ;;  %v12829_v20 = vmax.f32 %v11249_v59, 0.0 }
 0x340   : > { %6550 = vperm.xlu1 %8432, %v11331_v19   ;;  %12828 = vst [vmem:[#allocation11_spill] sm:$0xff] %v11357_v50  ;;  %v8766_v47 = vpop.eup %8765  ;;  %8781 = vpow2.f32 %v7372_v31  ;;  %v11369_v19 = vadd.f32 %v11081_v8, %v11167_v58  ;;  %v3550_v0 = vsel %vm3188_vm1, %v11273_v46, %v3358_v62  ;;  %v11379_v23 = vpop.f32.mrb[169].mxu0  ;;  %v3364_v58 = vmax.f32 %v3119_v11, 0.0  ;;  %v12831_v31 = vld [vmem:[#allocation19_spill] sm:$0xff] }
 0x341   : > { %v3549_v9 = vsel %vm3188_vm1, %v11249_v59, %v12829_v20  ;;  %v11381_v35 = vpop.f32.mrb[25].mxu1  ;;  %v8768_v56 = vpop.eup %8767  ;;  %8783 = vrcp.f32 %v5175_v18  ;;  %v5173_v2 = vadd.f32 1.0, %v8766_v47  ;;  %v7373_v1 = vmul.f32 -1.442695, %v4018_v57 }
 0x342   : > { %6535 = vperm.xlu0 %8433, %v3549_v9   ;;  %v11383_v49 = vpop.f32.mrb[170].mxu0  ;;  %v11385_v54 = vpop.f32.mrb[26].mxu1  ;;  %v6707_v46 = vsel %vm3188_vm1, %v12831_v31, %v8768_v56  ;;  %8785 = vpow2.f32 %v7375_v44  ;;  %v3657_v18 = vpack.c.bf16 %v3550_v0, %v3549_v9  ;;  %v4039_v44 = vadd.f32 %v11400_v51, %v11189_v42  ;;  %v12832_v31 = vld [vmem:[#allocation21_spill] sm:$0xff] }
 0x343   : > { %v8770_v59 = vpop.eup %8769  ;;  %v11387_v27 = vpop.permute.xlu0 %6155  ;;  %6900 = vst.msk [vmem:[%s10312_s26 + $0x1b0] sm:$0xff] %vm6845_vm2, %v6707_v46  ;;  %8787 = vrcp.f32 %v5173_v2  ;;  %v11406_v9 = vsel %vm3188_vm1, %v3116_v43, %v3363_v37  ;;  %v4031_v46 = vadd.f32 %v11400_v51, %v11210_v52  ;;  %v12839_v50 = vmax.f32 %v11369_v19, 0.0 }
 0x344   : > { %12830 = vst [vmem:[#allocation13_spill] sm:$0xff] %v11387_v27  ;;  %6540 = vperm.xlu1 %8432, %v3550_v0   ;;  %v11393_v47 = vpop.f32.mrb[171].mxu0  ;;  %v8772_v57 = vpop.eup %8771  ;;  %v5176_v20 = vadd.f32 1.0, %v8770_v59  ;;  %8789 = vpow2.f32 %v7373_v1  ;;  %8397 = vmatprep.mubr.bf16.mxu0 %v3657_v18  ;;  %v3132_v59 = vadd.f32 %v11081_v8, %v11205_v16  ;;  %v7378_v37 = vmul.f32 -1.442695, %v4039_v44  ;;  %v12834_v16 = vld [vmem:[#allocation20_spill] sm:$0xff] }
 0x345   : > { %v11408_v0 = vpop.f32.mrb[27].mxu1  ;;  %v8774_v56 = vpop.eup %8773  ;;  %v6705_v2 = vsel %vm3188_vm1, %v12832_v31, %v8772_v57  ;;  %v11424_v1 = vsel %vm3188_vm1, %v3119_v11, %v3364_v58  ;;  %v7376_v57 = vmul.f32 -1.442695, %v4031_v46  ;;  %v11438_v11 = vadd.f32 %v11081_v8, %v11212_v63 }
 0x346   : > { %v8776_v42 = vpop.eup %8775  ;;  %v11417_v62 = vpop.permute.xlu1 %6160  ;;  %6898 = vst.msk [vmem:[%s10312_s26 + $0x1a0] sm:$0xff] %vm6845_vm2, %v6705_v2  ;;  %8791 = vrcp.f32 %v5176_v20  ;;  %v5174_v43 = vadd.f32 1.0, %v8774_v56  ;;  %6565 = vperm.xlu0 %8433, %v11406_v9   ;;  %v3367_v18 = vmax.f32 %v3132_v59, 0.0  ;;  %v3660_v31 = vpack.c.bf16 %v11424_v1, %v11406_v9 }
 0x347   : > { %12833 = vst [vmem:[#allocation12_spill] sm:$0xff] %v11417_v62  ;;  %8398 = vmatmul.mubr.bf16.gmra.mrb[8].mxu0 %v3658_v60  ;;  %v6708_v52 = vsel %vm3188_vm1, %v12834_v16, %v8776_v42  ;;  %v11432_v20 = vpop.f32.mrb[172].mxu0  ;;  %v4042_v58 = vadd.f32 %v11400_v51, %v11223_v24  ;;  %v3135_v44 = vadd.f32 %v11081_v8, %v11225_v12  ;;  %v11444_v9 = vpop.f32.mrb[28].mxu1  ;;  %v12836_v42 = vld [vmem:[#allocation22_spill] sm:$0xff] }
 0x348   : > { %6570 = vperm.xlu1 %8432, %v11424_v1   ;;  %v8778_v60 = vpop.eup %8777  ;;  %6901 = vst.msk [vmem:[%s10312_s26 + $0x1b8] sm:$0xff] %vm6845_vm2, %v6708_v52  ;;  %8793 = vrcp.f32 %v5174_v43  ;;  %v11446_v56 = vpop.f32.mrb[173].mxu0  ;;  %v4034_v63 = vadd.f32 %v11400_v51, %v11236_v25  ;;  %v11457_v24 = vadd.f32 %v11081_v8, %v11251_v14  ;;  %v12837_v14 = vmax.f32 %v11335_v3, 0.0 }
 0x349   : > { %v8780_v2 = vpop.eup %8779  ;;  %v11448_v46 = vpop.permute.xlu0 %6185  ;;  %v6706_v43 = vsel %vm3188_vm1, %v12836_v42, %v8778_v60  ;;  %8795 = vpow2.f32 %v7378_v37  ;;  %v7379_v52 = vmul.f32 -1.442695, %v4042_v58  ;;  %v3368_v42 = vmax.f32 %v3135_v44, 0.0 }
 0x34a   : > { %12835 = vst [vmem:[#allocation14_spill] sm:$0xff] %v11448_v46  ;;  %v11459_v12 = vpop.f32.mrb[29].mxu1  ;;  %6899 = vst.msk [vmem:[%s10312_s26 + $0x1a8] sm:$0xff] %vm6845_vm2, %v6706_v43  ;;  %v5179_v1 = vadd.f32 1.0, %v8780_v2  ;;  %8797 = vpow2.f32 %v7376_v57  ;;  %v11464_v46 = vpop.f32.mrb[174].mxu0  ;;  %v3553_v43 = vsel %vm3188_vm1, %v11335_v3, %v12837_v14  ;;  %v4055_v62 = vadd.f32 %v11400_v51, %v11275_v10  ;;  %v12840_v14 = vld [vmem:[#allocation23_spill] sm:$0xff] }
 0x34b   : > { %v11466_v60 = vpop.f32.mrb[30].mxu1  ;;  %v8782_v37 = vpop.eup %8781  ;;  %v7377_v25 = vmul.f32 -1.442695, %v4034_v63  ;;  %6555 = vperm.xlu0 %8433, %v3553_v43   ;;  %v3554_v63 = vsel %vm3188_vm1, %v11369_v19, %v12839_v50  ;;  %v3148_v19 = vadd.f32 %v11081_v8, %v11281_v53 }
 0x34c   : > { %v11474_v2 = vpop.f32.mrb[175].mxu0  ;;  %v8784_v57 = vpop.eup %8783  ;;  %8799 = vrcp.f32 %v5179_v1  ;;  %v5177_v16 = vadd.f32 1.0, %v8782_v37  ;;  %v3659_v1 = vpack.c.bf16 %v3554_v63, %v3553_v43  ;;  %6560 = vperm.xlu1 %8432, %v3554_v63   ;;  %v11492_v37 = vsel %vm3188_vm1, %v3132_v59, %v3367_v18 }
 0x34d   : > { %v11476_v58 = vpop.permute.xlu1 %6190  ;;  %v11485_v27 = vpop.f32.mrb[31].mxu1  ;;  %v6711_v39 = vsel %vm3188_vm1, %v12840_v14, %v8784_v57  ;;  %8801 = vpow2.f32 %v7379_v52  ;;  %v7382_v50 = vmul.f32 -1.442695, %v4055_v62  ;;  %v4047_v59 = vadd.f32 %v11400_v51, %v11292_v45 }
 0x34e   : > { %12838 = vst [vmem:[#allocation15_spill] sm:$0xff] %v11476_v58  ;;  %v8786_v3 = vpop.eup %8785  ;;  %6904 = vst.msk [vmem:[%s10312_s26 + $0x1d0] sm:$0xff] %vm6845_vm2, %v6711_v39  ;;  %8803 = vrcp.f32 %v5177_v16  ;;  %8401 = vmatprep.mubr.bf16.mxu0 %v3659_v1  ;;  %v11505_v18 = vsel %vm3188_vm1, %v3135_v44, %v3368_v42  ;;  %v11507_v39 = vpop.f32.mrb[176].mxu0  ;;  %v12842_v44 = vld [vmem:[#allocation24_spill] sm:$0xff]  ;;  %v4058_v63 = vadd.f32 %v11400_v51, %v11305_v32 }
 0x34f   : > { %v8788_v58 = vpop.eup %8787  ;;  %v5180_v10 = vadd.f32 1.0, %v8786_v3  ;;  %8805 = vpow2.f32 %v7377_v25  ;;  %v11509_v16 = vpop.permute.xlu0 %6175  ;;  %8402 = vmatmul.mubr.bf16.gmra.mrb[12].mxu0 %v3660_v31  ;;  %6585 = vperm.xlu0 %8433, %v11492_v37   ;;  %v3662_v45 = vpack.c.bf16 %v11505_v18, %v11492_v37  ;;  %v7380_v43 = vmul.f32 -1.442695, %v4047_v59  ;;  %v12843_v37 = vld [vmem:[#allocation26_spill] sm:$0xff] }
 0x350   : > { %v8790_v48 = vpop.eup %8789  ;;  %v6709_v52 = vsel %vm3188_vm1, %v12841_v30, %v8788_v58  ;;  %v3371_v30 = vmax.f32 %v3148_v19, 0.0  ;;  %v11516_v25 = vpop.f32.mrb[177].mxu0  ;;  %6590 = vperm.xlu1 %8432, %v11505_v18   ;;  %v3151_v3 = vadd.f32 %v11081_v8, %v11307_v41  ;;  %v4050_v14 = vadd.f32 %v11400_v51, %v11317_v6 }
 0x351   : > { %v8792_v62 = vpop.eup %8791  ;;  %6902 = vst.msk [vmem:[%s10312_s26 + $0x1c0] sm:$0xff] %vm6845_vm2, %v6709_v52  ;;  %8807 = vrcp.f32 %v5180_v10  ;;  %v5178_v53 = vadd.f32 1.0, %v8790_v48  ;;  %v11524_v48 = vadd.f32 %v11081_v8, %v11294_v26  ;;  %v11526_v31 = vpop.f32.mrb[178].mxu0  ;;  %v11546_v52 = vadd.f32 %v11081_v8, %v11323_v61 }
 0x352   : > { %v6712_v42 = vsel %vm3188_vm1, %v12842_v44, %v8792_v62  ;;  %8809 = vpow2.f32 %v7382_v50  ;;  %v8794_v57 = vpop.eup %8793  ;;  %v11528_v58 = vpop.permute.xlu1 %6180  ;;  %v7383_v59 = vmul.f32 -1.442695, %v4058_v63  ;;  %v3372_v6 = vmax.f32 %v3151_v3, 0.0 }
 0x353   : > { %6905 = vst.msk [vmem:[%s10312_s26 + $0x1d8] sm:$0xff] %vm6845_vm2, %v6712_v42  ;;  %8811 = vrcp.f32 %v5178_v53  ;;  %v11538_v26 = vpop.f32.mrb[179].mxu0  ;;  %v8796_v1 = vpop.eup %8795  ;;  %v6710_v10 = vsel %vm3188_vm1, %v12843_v37, %v8794_v57  ;;  %v3369_v50 = vmax.f32 %v11524_v48, 0.0  ;;  %v7381_v18 = vmul.f32 -1.442695, %v4050_v14 }
 0x354   : > { %8813 = vpow2.f32 %v7380_v43  ;;  %v8798_v32 = vpop.eup %8797  ;;  %6903 = vst.msk [vmem:[%s10312_s26 + $0x1c8] sm:$0xff] %vm6845_vm2, %v6710_v10  ;;  %v5183_v41 = vadd.f32 1.0, %v8796_v1  ;;  %v3370_v53 = vmax.f32 %v11546_v52, 0.0  ;;  %v12844_v44 = vmax.f32 %v11438_v11, 0.0  ;;  %v11561_v63 = vpop.permute.xlu0 %6205 }
 0x355   : > { %v5181_v62 = vadd.f32 1.0, %v8798_v32  ;;  %v12845_v43 = vmax.f32 %v11457_v24, 0.0  ;;  %v4071_v1 = vadd.f32 %v11400_v51, %v11355_v28  ;;  %v11574_v10 = vadd.f32 %v11081_v8, %v11365_v55 }
 0x356   : > { %v3557_v42 = vsel %vm3188_vm1, %v11438_v11, %v12844_v44  ;;  %v8800_v57 = vpop.eup %8799  ;;  %8815 = vrcp.f32 %v5183_v41  ;;  %v11567_v11 = vsel %vm3188_vm1, %v3148_v19, %v3371_v30  ;;  %v4063_v32 = vadd.f32 %v11400_v51, %v11379_v23  ;;  %v11578_v41 = vpop.f32.mrb[180].mxu0 }
 0x357   : > { %v3558_v61 = vsel %vm3188_vm1, %v11457_v24, %v12845_v43  ;;  %6575 = vperm.xlu0 %8433, %v3557_v42   ;;  %v8802_v37 = vpop.eup %8801  ;;  %v6715_v24 = vsel %vm3188_vm1, %v10347_v33, %v8800_v57  ;;  %8817 = vrcp.f32 %v5181_v62  ;;  %v11580_v44 = vpop.permute.xlu1 %6210  ;;  %v7386_v33 = vmul.f32 -1.442695, %v4071_v1 }
 0x358   : > { %v3661_v14 = vpack.c.bf16 %v3558_v61, %v3557_v42  ;;  %6580 = vperm.xlu1 %8432, %v3558_v61   ;;  %v8804_v28 = vpop.eup %8803  ;;  %6908 = vst.msk [vmem:[%s10312_s26 + $0x1f0] sm:$0xff] %vm6845_vm2, %v6715_v24  ;;  %v5184_v19 = vadd.f32 1.0, %v8802_v37  ;;  %8819 = vpow2.f32 %v7383_v59  ;;  %v11586_v30 = vsel %vm3188_vm1, %v3151_v3, %v3372_v6  ;;  %v11588_v55 = vpop.f32.mrb[181].mxu0 }
 0x359   : > { %v8806_v62 = vpop.eup %8805  ;;  %v6713_v23 = vsel %vm3188_vm1, %v10371_v17, %v8804_v28  ;;  %8821 = vpow2.f32 %v7381_v18  ;;  %v3375_v42 = vmax.f32 %v11574_v10, 0.0  ;;  %v7384_v43 = vmul.f32 -1.442695, %v4063_v32  ;;  %v11594_v61 = vpop.f32.mrb[182].mxu0 }
 0x35a   : > { %8405 = vmatprep.mubr.bf16.mxu0 %v3661_v14  ;;  %6906 = vst.msk [vmem:[%s10312_s26 + $0x1e0] sm:$0xff] %vm6845_vm2, %v6713_v23  ;;  %8823 = vrcp.f32 %v5184_v19  ;;  %v5182_v3 = vadd.f32 1.0, %v8806_v62  ;;  %v3664_v6 = vpack.c.bf16 %v11586_v30, %v11567_v11  ;;  %v11604_v17 = vadd.f32 %v11081_v8, %v11381_v35  ;;  %v11615_v37 = vpop.permute.xlu0 %6195 }
 0x35b   : > { %8406 = vmatmul.mubr.bf16.gmra.mrb[16].mxu0 %v3662_v45  ;;  %v8808_v59 = vpop.eup %8807  ;;  %6605 = vperm.xlu0 %8433, %v11567_v11   ;;  %v11606_v45 = vpop.f32.mrb[183].mxu0  ;;  %8825 = vpow2.f32 %v7386_v33  ;;  %v4074_v14 = vadd.f32 %v11400_v51, %v11383_v49  ;;  %v3167_v1 = vadd.f32 %v11081_v8, %v11385_v54  ;;  %v11631_v62 = vadd.f32 %v11081_v8, %v11408_v0 }
 0x35c   : > { %6610 = vperm.xlu1 %8432, %v11586_v30   ;;  %v8810_v18 = vpop.eup %8809  ;;  %v6716_v57 = vsel %vm3188_vm1, %v10351_v15, %v8808_v59  ;;  %8827 = vrcp.f32 %v5182_v3  ;;  %v3373_v24 = vmax.f32 %v11604_v17, 0.0  ;;  %v4066_v15 = vadd.f32 %v11400_v51, %v11393_v47  ;;  %v11625_v19 = vpop.permute.xlu1 %6200 }
 0x35d   : > { %v8812_v11 = vpop.eup %8811  ;;  %6909 = vst.msk [vmem:[%s10312_s26 + $0x1f8] sm:$0xff] %vm6845_vm2, %v6716_v57  ;;  %v5187_v35 = vadd.f32 1.0, %v8810_v18  ;;  %8829 = vpow2.f32 %v7384_v43  ;;  %v7387_v28 = vmul.f32 -1.442695, %v4074_v14  ;;  %v3376_v54 = vmax.f32 %v3167_v1, 0.0  ;;  %v11645_v43 = vpop.f32.mrb[184].mxu0 }
 0x35e   : > { %v8814_v32 = vpop.eup %8813  ;;  %v6714_v49 = vsel %vm3188_vm1, %v10379_v13, %v8812_v11  ;;  %v7385_v30 = vmul.f32 -1.442695, %v4066_v15  ;;  %v3561_v13 = vsel %vm3188_vm1, %v11524_v48, %v3369_v50  ;;  %v3562_v47 = vsel %vm3188_vm1, %v11546_v52, %v3370_v53  ;;  %v11653_v50 = vpop.f32.mrb[185].mxu0 }
 0x35f   : > { %6907 = vst.msk [vmem:[%s10312_s26 + $0x1e8] sm:$0xff] %vm6845_vm2, %v6714_v49  ;;  %8831 = vrcp.f32 %v5187_v35  ;;  %v5185_v33 = vadd.f32 1.0, %v8814_v32  ;;  %v4087_v23 = vadd.f32 %v11400_v51, %v11432_v20  ;;  %v3374_v59 = vmax.f32 %v11631_v62, 0.0  ;;  %6595 = vperm.xlu0 %8433, %v3561_v13   ;;  %v11662_v57 = vpop.f32.mrb[186].mxu0  ;;  %v11664_v11 = vpop.permute.xlu0 %6225 }
 0x360   : > { %8833 = vpow2.f32 %v7387_v28  ;;  %v8816_v0 = vpop.eup %8815  ;;  %v3663_v3 = vpack.c.bf16 %v3562_v47, %v3561_v13  ;;  %6600 = vperm.xlu1 %8432, %v3562_v47   ;;  %v11651_v48 = vsel %vm3188_vm1, %v11574_v10, %v3375_v42  ;;  %v11660_v18 = vadd.f32 %v11081_v8, %v11444_v9  ;;  %v11679_v35 = vpop.f32.mrb[187].mxu0 }
 0x361   : > { %8835 = vrcp.f32 %v5185_v33  ;;  %v8818_v52 = vpop.eup %8817  ;;  %v6719_v20 = vsel %vm3188_vm1, %v10403_v29, %v8816_v0  ;;  %v7390_v53 = vmul.f32 -1.442695, %v4087_v23  ;;  %v4079_v29 = vadd.f32 %v11400_v51, %v11446_v56 }
 0x362   : > { %8837 = vpow2.f32 %v7385_v30  ;;  %v8820_v14 = vpop.eup %8819  ;;  %6912 = vst.msk [vmem:[%s10312_s26 + $0x210] sm:$0xff] %vm6845_vm2, %v6719_v20  ;;  %v6717_v10 = vsel %vm3188_vm1, %v10430_v22, %v8818_v52  ;;  %8409 = vmatprep.mubr.bf16.mxu0 %v3663_v3  ;;  %v11675_v42 = vsel %vm3188_vm1, %v3167_v1, %v3376_v54  ;;  %v3172_v9 = vadd.f32 %v11081_v8, %v11459_v12  ;;  %v11686_v1 = vpop.permute.xlu1 %6230  ;;  %v12846_v30 = vld [vmem:[#allocation27_spill] sm:$0xff] }
 0x363   : > { %v8822_v15 = vpop.eup %8821  ;;  %6910 = vst.msk [vmem:[%s10312_s26 + $0x200] sm:$0xff] %vm6845_vm2, %v6717_v10  ;;  %v5188_v32 = vadd.f32 1.0, %v8820_v14  ;;  %8410 = vmatmul.mubr.bf16.gmra.mrb[20].mxu0 %v3664_v6  ;;  %8839 = vpow2.f32 %v7390_v53  ;;  %v3379_v22 = vmax.f32 %v11660_v18, 0.0  ;;  %v3666_v56 = vpack.c.bf16 %v11675_v42, %v11651_v48  ;;  %6625 = vperm.xlu0 %8433, %v11651_v48   ;;  %v11706_v10 = vpop.permute.xlu0 %6215 }
 0x364   : > { %v8824_v49 = vpop.eup %8823  ;;  %v5186_v28 = vadd.f32 1.0, %v8822_v15  ;;  %v7388_v12 = vmul.f32 -1.442695, %v4079_v29  ;;  %6630 = vperm.xlu1 %8432, %v11675_v42   ;;  %v3377_v54 = vmax.f32 %v3172_v9, 0.0  ;;  %v4090_v6 = vadd.f32 %v11400_v51, %v11464_v46 }
 0x365   : > { %v8826_v33 = vpop.eup %8825  ;;  %v6720_v13 = vsel %vm3188_vm1, %v12846_v30, %v8824_v49  ;;  %8841 = vrcp.f32 %v5188_v32  ;;  %v3183_v47 = vadd.f32 %v11081_v8, %v11466_v60  ;;  %v4082_v23 = vadd.f32 %v11400_v51, %v11474_v2 }
 0x366   : > { %v8828_v0 = vpop.eup %8827  ;;  %6913 = vst.msk [vmem:[%s10312_s26 + $0x218] sm:$0xff] %vm6845_vm2, %v6720_v13  ;;  %8843 = vrcp.f32 %v5186_v28  ;;  %v5191_v3 = vadd.f32 1.0, %v8826_v33  ;;  %v7391_v48 = vmul.f32 -1.442695, %v4090_v6  ;;  %v3175_v46 = vadd.f32 %v11081_v8, %v11485_v27  ;;  %v11715_v27 = vpop.f32.mrb[188].mxu0 }
 0x367   : > { %v8830_v52 = vpop.eup %8829  ;;  %v6718_v20 = vsel %vm3188_vm1, %v10438_v34, %v8828_v0  ;;  %8845 = vpow2.f32 %v7388_v12  ;;  %v3380_v53 = vmax.f32 %v3183_v47, 0.0  ;;  %v7389_v60 = vmul.f32 -1.442695, %v4082_v23  ;;  %v11731_v49 = vpop.permute.xlu1 %6220 }
 0x368   : > { %6911 = vst.msk [vmem:[%s10312_s26 + $0x208] sm:$0xff] %vm6845_vm2, %v6718_v20  ;;  %8847 = vrcp.f32 %v5191_v3  ;;  %v5189_v2 = vadd.f32 1.0, %v8830_v52  ;;  %v3378_v29 = vmax.f32 %v3175_v46, 0.0  ;;  %v3565_v8 = vsel %vm3188_vm1, %v11604_v17, %v3373_v24  ;;  %v11729_v17 = vpop.f32.mrb[189].mxu0  ;;  %v11761_v3 = vpop.permute.xlu0 %6245 }
 0x369   : > { %v8832_v14 = vpop.eup %8831  ;;  %8849 = vpow2.f32 %v7391_v48  ;;  %v11722_v15 = vsel %vm3188_vm1, %v3183_v47, %v3380_v53  ;;  %6615 = vperm.xlu0 %8433, %v3565_v8   ;;  %v3566_v32 = vsel %vm3188_vm1, %v11631_v62, %v3374_v59  ;;  %v4103_v12 = vadd.f32 %v11400_v51, %v11507_v39  ;;  %v11737_v6 = vpop.f32.mrb[190].mxu0 }
 0x36a   : > { %v8834_v34 = vpop.eup %8833  ;;  %v6723_v42 = vsel %vm3188_vm1, %v10464_v21, %v8832_v14  ;;  %8851 = vrcp.f32 %v5189_v2  ;;  %v3665_v28 = vpack.c.bf16 %v3566_v32, %v3565_v8  ;;  %6620 = vperm.xlu1 %8432, %v3566_v32   ;;  %v3569_v59 = vsel %vm3188_vm1, %v3172_v9, %v3377_v54  ;;  %v11746_v13 = vpop.f32.mrb[191].mxu0 }
 0x36b   : > { %v8836_v24 = vpop.eup %8835  ;;  %6916 = vst.msk [vmem:[%s10312_s26 + $0x230] sm:$0xff] %vm6845_vm2, %v6723_v42  ;;  %v5192_v21 = vadd.f32 1.0, %v8834_v34  ;;  %8853 = vpow2.f32 %v7389_v60  ;;  %v4095_v30 = vadd.f32 %v11400_v51, %v11516_v25  ;;  %v7394_v47 = vmul.f32 -1.442695, %v4103_v12  ;;  %v11766_v53 = vpop.f32.mrb[192].mxu0 }
 0x36c   : > { %v8838_v33 = vpop.eup %8837  ;;  %v6721_v62 = vsel %vm3188_vm1, %v10520_v36, %v8836_v24  ;;  %8413 = vmatprep.mubr.bf16.mxu0 %v3665_v28  ;;  %v4106_v23 = vadd.f32 %v11400_v51, %v11526_v31  ;;  %v3570_v9 = vsel %vm3188_vm1, %v3175_v46, %v3378_v29  ;;  %v4098_v25 = vadd.f32 %v11400_v51, %v11538_v26  ;;  %v11775_v29 = vpop.f32.mrb[193].mxu0 }
 0x36d   : > { %6914 = vst.msk [vmem:[%s10312_s26 + $0x220] sm:$0xff] %vm6845_vm2, %v6721_v62  ;;  %8855 = vrcp.f32 %v5192_v21  ;;  %v5190_v39 = vadd.f32 1.0, %v8838_v33  ;;  %v8840_v0 = vpop.eup %8839  ;;  %8414 = vmatmul.mubr.bf16.gmra.mrb[24].mxu0 %v3666_v56  ;;  %6635 = vperm.xlu0 %8433, %v3569_v59   ;;  %v7392_v36 = vmul.f32 -1.442695, %v4095_v30  ;;  %v3571_v54 = vsel %vm3188_vm1, %v11660_v18, %v3379_v22  ;;  %v11768_v18 = vpop.permute.xlu1 %6250  ;;  %v12847_v22 = vld [vmem:[#allocation28_spill] sm:$0xff] }
 0x36e   : > { %v5195_v31 = vadd.f32 1.0, %v8840_v0  ;;  %v7395_v48 = vmul.f32 -1.442695, %v4106_v23  ;;  %6640 = vperm.xlu1 %8432, %v3570_v9   ;;  %v3668_v56 = vpack.c.bf16 %v11722_v15, %v3571_v54  ;;  %v7393_v46 = vmul.f32 -1.442695, %v4098_v25  ;;  %v11784_v32 = vpop.f32.mrb[194].mxu0 }
 0x36f   : > { %8857 = vrcp.f32 %v5190_v39  ;;  %v8842_v52 = vpop.eup %8841  ;;  %v3667_v20 = vpack.c.bf16 %v3570_v9, %v3569_v59  ;;  %v4119_v26 = vadd.f32 %v11400_v51, %v11578_v41  ;;  %v4111_v2 = vadd.f32 %v11400_v51, %v11588_v55  ;;  %v11791_v21 = vpop.f32.mrb[195].mxu0 }
 0x370   : > { %8859 = vpow2.f32 %v7394_v47  ;;  %v8844_v60 = vpop.eup %8843  ;;  %v6724_v14 = vsel %vm3188_vm1, %v12847_v22, %v8842_v52  ;;  %v4122_v42 = vadd.f32 %v11400_v51, %v11594_v61  ;;  %v4135_v33 = vadd.f32 %v11400_v51, %v11645_v43  ;;  %v11798_v59 = vpop.permute.xlu0 %6235 }
 0x371   : > { %8861 = vrcp.f32 %v5195_v31  ;;  %v8846_v8 = vpop.eup %8845  ;;  %6917 = vst.msk [vmem:[%s10312_s26 + $0x238] sm:$0xff] %vm6845_vm2, %v6724_v14  ;;  %v6722_v41 = vsel %vm3188_vm1, %v10530_v40, %v8844_v60  ;;  %6645 = vperm.xlu0 %8433, %v3571_v54   ;;  %8417 = vmatprep.mubr.bf16.mxu0 %v3667_v20  ;;  %v7398_v34 = vmul.f32 -1.442695, %v4119_v26  ;;  %v4114_v40 = vadd.f32 %v11400_v51, %v11606_v45  ;;  %v11807_v47 = vpop.permute.xlu1 %6240  ;;  %v12848_v31 = vld [vmem:[#allocation29_spill] sm:$0xff]  ;;  %v12849_v14 = vld [vmem:[#allocation30_spill] sm:$0xff] }
 0x372   : > { %8863 = vpow2.f32 %v7392_v36  ;;  %v8848_v55 = vpop.eup %8847  ;;  %6915 = vst.msk [vmem:[%s10312_s26 + $0x228] sm:$0xff] %vm6845_vm2, %v6722_v41  ;;  %v5193_v24 = vadd.f32 1.0, %v8846_v8  ;;  %6650 = vperm.xlu1 %8432, %v11722_v15   ;;  %v7396_v12 = vmul.f32 -1.442695, %v4111_v2  ;;  %v4127_v39 = vadd.f32 %v11400_v51, %v11653_v50  ;;  %v11814_v9 = vpop.f32.mrb[196].mxu0 }
 0x373   : > { %8865 = vpow2.f32 %v7395_v48  ;;  %v8850_v28 = vpop.eup %8849  ;;  %v6727_v61 = vsel %vm3188_vm1, %v10574_v38, %v8848_v55  ;;  %v7399_v38 = vmul.f32 -1.442695, %v4122_v42  ;;  %v7397_v0 = vmul.f32 -1.442695, %v4114_v40  ;;  %v11818_v50 = vpop.f32.mrb[197].mxu0 }
 0x374   : > { %8867 = vpow2.f32 %v7393_v46  ;;  %v8852_v62 = vpop.eup %8851  ;;  %6920 = vst.msk [vmem:[%s10312_s26 + $0x250] sm:$0xff] %vm6845_vm2, %v6727_v61  ;;  %v5196_v45 = vadd.f32 1.0, %v8850_v28  ;;  %v11825_v52 = vpop.f32.mrb[198].mxu0  ;;  %v4151_v40 = vadd.f32 %v11400_v51, %v11715_v27 }
 0x375   : > { %8869 = vrcp.f32 %v5193_v24  ;;  %v8854_v15 = vpop.eup %8853  ;;  %v6725_v30 = vsel %vm3188_vm1, %v10638_v7, %v8852_v62  ;;  %8418 = vmatmul.mubr.bf16.gmra.mrb[28].mxu0 %v3668_v56  ;;  %v7402_v7 = vmul.f32 -1.442695, %v4135_v33  ;;  %v7400_v56 = vmul.f32 -1.442695, %v4127_v39  ;;  %v11827_v20 = vpop.permute.xlu0 %6265 }
 0x376   : > { %8871 = vpow2.f32 %v7398_v34  ;;  %6918 = vst.msk [vmem:[%s10312_s26 + $0x240] sm:$0xff] %vm6845_vm2, %v6725_v30  ;;  %v5194_v23 = vadd.f32 1.0, %v8854_v15  ;;  %v11831_v60 = vpop.f32.mrb[199].mxu0  ;;  %v11838_v41 = vpop.permute.xlu1 %6270 }
 0x377   : > { %v8856_v43 = vpop.eup %8855  ;;  %8873 = vrcp.f32 %v5196_v45  ;;  %v11847_v45 = vpop.f32.mrb[200].mxu0 }
 0x378   : > { %v6728_v36 = vsel %vm3188_vm1, %v10579_v5, %v8856_v43  ;;  %8875 = vpow2.f32 %v7396_v12  ;;  %v4138_v5 = vadd.f32 %v11400_v51, %v11662_v57  ;;  %v4130_v57 = vadd.f32 %v11400_v51, %v11679_v35  ;;  %v12850_v35 = vld [vmem:[#allocation32_spill] sm:$0xff]  ;;  %v12851_v43 = vld [vmem:[#allocation31_spill] sm:$0xff] }
 0x379   : > { %v8858_v25 = vpop.eup %8857  ;;  %6921 = vst.msk [vmem:[%s10312_s26 + $0x258] sm:$0xff] %vm6845_vm2, %v6728_v36  ;;  %8877 = vrcp.f32 %v5194_v23  ;;  %v11849_v30 = vpop.permute.xlu0 %6255  ;;  %v4143_v36 = vadd.f32 %v11400_v51, %v11729_v17  ;;  %v4154_v17 = vadd.f32 %v11400_v51, %v11737_v6 }
 0x37a   : > { %v8860_v54 = vpop.eup %8859  ;;  %v6726_v48 = vsel %vm3188_vm1, %v12848_v31, %v8858_v25  ;;  %8879 = vpow2.f32 %v7399_v38  ;;  %v7403_v24 = vmul.f32 -1.442695, %v4138_v5  ;;  %v7401_v62 = vmul.f32 -1.442695, %v4130_v57  ;;  %v11853_v38 = vpop.f32.mrb[201].mxu0  ;;  %v12852_v5 = vld [vmem:[#allocation33_spill] sm:$0xff] }
 0x37b   : > { %v8862_v46 = vpop.eup %8861  ;;  %6919 = vst.msk [vmem:[%s10312_s26 + $0x248] sm:$0xff] %vm6845_vm2, %v6726_v48  ;;  %v5199_v26 = vadd.f32 1.0, %v8860_v54  ;;  %8881 = vpow2.f32 %v7397_v0  ;;  %v7406_v0 = vmul.f32 -1.442695, %v4151_v40  ;;  %v11862_v54 = vpop.permute.xlu1 %6260  ;;  %v12853_v40 = vld [vmem:[#allocation34_spill] sm:$0xff] }
 0x37c   : > { %v8864_v22 = vpop.eup %8863  ;;  %v6731_v2 = vsel %vm3188_vm1, %v12849_v14, %v8862_v46  ;;  %8883 = vpow2.f32 %v7402_v7  ;;  %v11860_v7 = vpop.f32.mrb[202].mxu0  ;;  %v4146_v14 = vadd.f32 %v11400_v51, %v11746_v13  ;;  %v7407_v13 = vmul.f32 -1.442695, %v4154_v17 }
 0x37d   : > { %v8866_v8 = vpop.eup %8865  ;;  %6924 = vst.msk [vmem:[%s10312_s26 + $0x270] sm:$0xff] %vm6845_vm2, %v6731_v2  ;;  %8885 = vrcp.f32 %v5199_v26  ;;  %v5197_v34 = vadd.f32 1.0, %v8864_v22  ;;  %v11866_v48 = vpop.f32.mrb[203].mxu0 }
 0x37e   : > { %v8868_v42 = vpop.eup %8867  ;;  %v5200_v55 = vadd.f32 1.0, %v8866_v8  ;;  %8887 = vpow2.f32 %v7400_v56  ;;  %v7404_v8 = vmul.f32 -1.442695, %v4143_v36 }
 0x37f   : > { %v8870_v28 = vpop.eup %8869  ;;  %8889 = vrcp.f32 %v5197_v34  ;;  %v5198_v61 = vadd.f32 1.0, %v8868_v42  ;;  %v4167_v34 = vadd.f32 %v11400_v51, %v11766_v53  ;;  %v11888_v53 = vpop.permute.xlu1 %6290 }
 0x380   : > { %v8872_v12 = vpop.eup %8871  ;;  %v6729_v33 = vsel %vm3188_vm1, %v12850_v35, %v8870_v28  ;;  %8891 = vrcp.f32 %v5200_v55  ;;  %v11879_v55 = vpop.permute.xlu0 %6285 }
 0x381   : > { %v8874_v15 = vpop.eup %8873  ;;  %6922 = vst.msk [vmem:[%s10312_s26 + $0x260] sm:$0xff] %vm6845_vm2, %v6729_v33  ;;  %8893 = vrcp.f32 %v5198_v61  ;;  %v5203_v27 = vadd.f32 1.0, %v8872_v12  ;;  %v4159_v61 = vadd.f32 %v11400_v51, %v11775_v29  ;;  %v11886_v12 = vpop.f32.mrb[204].mxu0  ;;  %v7410_v29 = vmul.f32 -1.442695, %v4167_v34  ;;  %v12857_v34 = vld [vmem:[#allocation3_spill] sm:$0xff] }
 0x382   : > { %v8876_v39 = vpop.eup %8875  ;;  %v6732_v23 = vsel %vm3188_vm1, %v12851_v43, %v8874_v15  ;;  %8895 = vpow2.f32 %v7403_v24  ;;  %v11892_v15 = vpop.f32.mrb[205].mxu0 }
 0x383   : > { %v8878_v25 = vpop.eup %8877  ;;  %6925 = vst.msk [vmem:[%s10312_s26 + $0x278] sm:$0xff] %vm6845_vm2, %v6732_v23  ;;  %8897 = vrcp.f32 %v5203_v27  ;;  %v5201_v31 = vadd.f32 1.0, %v8876_v39  ;;  %v12854_v39 = vld [vmem:[#allocation36_spill] sm:$0xff]  ;;  %v4170_v23 = vadd.f32 %v11400_v51, %v11784_v32  ;;  %v7408_v32 = vmul.f32 -1.442695, %v4159_v61 }
 0x384   : > { %v8880_v56 = vpop.eup %8879  ;;  %v6730_v46 = vsel %vm3188_vm1, %v12852_v5, %v8878_v25  ;;  %8899 = vpow2.f32 %v7401_v62  ;;  %v7405_v62 = vmul.f32 -1.442695, %v4146_v14  ;;  %v12855_v25 = vld [vmem:[#allocation35_spill] sm:$0xff]  ;;  %v11915_v14 = vpop.permute.xlu0 %6275 }
 0x385   : > { %v8882_v26 = vpop.eup %8881  ;;  %6923 = vst.msk [vmem:[%s10312_s26 + $0x268] sm:$0xff] %vm6845_vm2, %v6730_v46  ;;  %8901 = vrcp.f32 %v5201_v31  ;;  %v5204_v22 = vadd.f32 1.0, %v8880_v56  ;;  %v12856_v46 = vld [vmem:[#allocation37_spill] sm:$0xff] }
 0x386   : > { %v8884_v2 = vpop.eup %8883  ;;  %v5202_v57 = vadd.f32 1.0, %v8882_v26  ;;  %8903 = vpow2.f32 %v7406_v0  ;;  %v11899_v0 = vpop.f32.mrb[206].mxu0  ;;  %v4162_v26 = vadd.f32 %v11400_v51, %v11791_v21  ;;  %v4175_v21 = vadd.f32 %v11400_v51, %v11818_v50 }
 0x387   : > { %v8886_v42 = vpop.eup %8885  ;;  %8905 = vrcp.f32 %v5204_v22  ;;  %v5207_v6 = vadd.f32 1.0, %v8884_v2  ;;  %v11906_v56 = vpop.f32.mrb[207].mxu0 }
 0x388   : > { %v8888_v24 = vpop.eup %8887  ;;  %v6735_v28 = vsel %vm3188_vm1, %v12853_v40, %v8886_v42  ;;  %8907 = vrcp.f32 %v5202_v57  ;;  %v4183_v57 = vadd.f32 %v11400_v51, %v11814_v9  ;;  %v11926_v40 = vpop.permute.xlu1 %6280  ;;  %v12858_v9 = vld [vmem:[#allocation5_spill] sm:$0xff] }
 0x389   : > { %v8890_v35 = vpop.eup %8889  ;;  %6928 = vst.msk [vmem:[%s10312_s26 + $0x290] sm:$0xff] %vm6845_vm2, %v6735_v28  ;;  %8909 = vrcp.f32 %v5207_v6  ;;  %v5205_v33 = vadd.f32 1.0, %v8888_v24  ;;  %v7411_v6 = vmul.f32 -1.442695, %v4170_v23 }
 0x38a   : > { %v8892_v27 = vpop.eup %8891  ;;  %v6733_v43 = vsel %vm3188_vm1, %v12854_v39, %v8890_v35  ;;  %8911 = vpow2.f32 %v7404_v8  ;;  %v7409_v35 = vmul.f32 -1.442695, %v4162_v26  ;;  %v11937_v39 = vpop.f32.mrb[208].mxu0  ;;  %v12861_v26 = vld [vmem:[#allocation6_spill] sm:$0xff] }
 0x38b   : > { %v8894_v36 = vpop.eup %8893  ;;  %6926 = vst.msk [vmem:[%s10312_s26 + $0x280] sm:$0xff] %vm6845_vm2, %v6733_v43  ;;  %v6736_v31 = vsel %vm3188_vm1, %v12855_v25, %v8892_v27  ;;  %8913 = vrcp.f32 %v5205_v33  ;;  %v4186_v33 = vadd.f32 %v11400_v51, %v11825_v52  ;;  %v7414_v27 = vmul.f32 -1.442695, %v4183_v57  ;;  %v11942_v25 = vpop.f32.mrb[209].mxu0 }
 0x38c   : > { %v8896_v5 = vpop.eup %8895  ;;  %6929 = vst.msk [vmem:[%s10312_s26 + $0x298] sm:$0xff] %vm6845_vm2, %v6736_v31  ;;  %v6734_v17 = vsel %vm3188_vm1, %v12856_v46, %v8894_v36  ;;  %8915 = vpow2.f32 %v7407_v13  ;;  %v7412_v36 = vmul.f32 -1.442695, %v4175_v21  ;;  %v11944_v31 = vpop.permute.xlu0 %6305  ;;  %v4178_v57 = vadd.f32 %v11400_v51, %v11831_v60 }
 0x38d   : > { %v8898_v22 = vpop.eup %8897  ;;  %6927 = vst.msk [vmem:[%s10312_s26 + $0x288] sm:$0xff] %vm6845_vm2, %v6734_v17  ;;  %v5208_v2 = vadd.f32 1.0, %v8896_v5  ;;  %8917 = vpow2.f32 %v7405_v62  ;;  %v12860_v5 = vld [vmem:[#allocation4_spill] sm:$0xff]  ;;  %v11951_v17 = vpop.f32.mrb[210].mxu0 }
 0x38e   : > { %v8900_v8 = vpop.eup %8899  ;;  %v6739_v42 = vsel %vm3188_vm1, %v12857_v34, %v8898_v22  ;;  %8919 = vpow2.f32 %v7410_v29  ;;  %v12859_v29 = vld [vmem:[#allocation2_spill] sm:$0xff] }
 0x38f   : > { %v8902_v24 = vpop.eup %8901  ;;  %6932 = vst.msk [vmem:[%s10312_s26 + $0x2b0] sm:$0xff] %vm6845_vm2, %v6739_v42  ;;  %8921 = vrcp.f32 %v5208_v2  ;;  %v5206_v28 = vadd.f32 1.0, %v8900_v8  ;;  %v7415_v2 = vmul.f32 -1.442695, %v4186_v33  ;;  %v11960_v8 = vpop.f32.mrb[211].mxu0 }
 0x390   : > { %v8904_v13 = vpop.eup %8903  ;;  %v6737_v61 = vsel %vm3188_vm1, %v12858_v9, %v8902_v24  ;;  %8923 = vpow2.f32 %v7408_v32  ;;  %v11962_v42 = vpop.permute.xlu1 %6310  ;;  %v12862_v24 = vld [vmem:[#allocation9_spill] sm:$0xff]  ;;  %v7413_v33 = vmul.f32 -1.442695, %v4178_v57 }
 0x391   : > { %v8906_v62 = vpop.eup %8905  ;;  %6930 = vst.msk [vmem:[%s10312_s26 + $0x2a0] sm:$0xff] %vm6845_vm2, %v6737_v61  ;;  %8925 = vrcp.f32 %v5206_v28  ;;  %v5211_v50 = vadd.f32 1.0, %v8904_v13  ;;  %v4199_v13 = vadd.f32 %v11400_v51, %v11847_v45  ;;  %v12863_v45 = vld [vmem:[#allocation7_spill] sm:$0xff] }
 0x392   : > { %v8908_v43 = vpop.eup %8907  ;;  %v6740_v23 = vsel %vm3188_vm1, %v12859_v29, %v8906_v62  ;;  %8927 = vpow2.f32 %v7411_v6  ;;  %v4191_v62 = vadd.f32 %v11400_v51, %v11853_v38 }
 0x393   : > { %v8910_v52 = vpop.eup %8909  ;;  %6933 = vst.msk [vmem:[%s10312_s26 + $0x2b8] sm:$0xff] %vm6845_vm2, %v6740_v23  ;;  %v6738_v46 = vsel %vm3188_vm1, %v12860_v5, %v8908_v43  ;;  %8929 = vrcp.f32 %v5211_v50 }
 0x394   : > { %v8912_v32 = vpop.eup %8911  ;;  %6931 = vst.msk [vmem:[%s10312_s26 + $0x2a8] sm:$0xff] %vm6845_vm2, %v6738_v46  ;;  %v6743_v22 = vsel %vm3188_vm1, %v12861_v26, %v8910_v52  ;;  %8931 = vpow2.f32 %v7409_v35  ;;  %v11980_v5 = vpop.permute.xlu1 %6300  ;;  %v12864_v46 = vld [vmem:[#allocation8_spill] sm:$0xff]  ;;  %v7416_v26 = vmul.f32 -1.442695, %v4191_v62 }
 0x395   : > { %v8914_v34 = vpop.eup %8913  ;;  %6936 = vst.msk [vmem:[%s10312_s26 + $0x2d0] sm:$0xff] %vm6845_vm2, %v6743_v22  ;;  %v5209_v6 = vadd.f32 1.0, %v8912_v32  ;;  %8933 = vpow2.f32 %v7414_v27  ;;  %v11975_v27 = vpop.permute.xlu0 %6295  ;;  %v11990_v22 = vld [vmem:[%s12742_s5] ss:$0 sm:$0xff] }
 0x396   : > { %v8916_v21 = vpop.eup %8915  ;;  %v6741_v28 = vsel %vm3188_vm1, %v12862_v24, %v8914_v34  ;;  %8935 = vpow2.f32 %v7412_v36  ;;  %v7418_v36 = vmul.f32 -1.442695, %v4199_v13  ;;  %v12865_v24 = vld [vmem:[#allocation10_spill] sm:$0xff]  ;;  %v4194_v13 = vadd.f32 %v11990_v22, %v11866_v48 }
 0x397   : > { %v8918_v9 = vpop.eup %8917  ;;  %6934 = vst.msk [vmem:[%s10312_s26 + $0x2c0] sm:$0xff] %vm6845_vm2, %v6741_v28  ;;  %8937 = vrcp.f32 %v5209_v6  ;;  %v5212_v60 = vadd.f32 1.0, %v8916_v21  ;;  %v11996_v6 = vpop.f32.mrb[212].mxu0  ;;  %v4207_v48 = vadd.f32 %v11990_v22, %v11892_v15 }
 0x398   : > { %v8920_v61 = vpop.eup %8919  ;;  %v5210_v35 = vadd.f32 1.0, %v8918_v9  ;;  %8939 = vpow2.f32 %v7415_v2  ;;  %v4202_v2 = vadd.f32 %v11990_v22, %v11860_v7  ;;  %v12003_v9 = vpop.f32.mrb[213].mxu0 }
 0x399   : > { %v8922_v50 = vpop.eup %8921  ;;  %8941 = vrcp.f32 %v5212_v60  ;;  %v5215_v43 = vadd.f32 1.0, %v8920_v61  ;;  %v12005_v7 = vpop.permute.xlu0 %6325 }
 0x39a   : > { %v8924_v29 = vpop.eup %8923  ;;  %v6744_v23 = vsel %vm3188_vm1, %v12863_v45, %v8922_v50  ;;  %8943 = vrcp.f32 %v5210_v35  ;;  %v4215_v35 = vadd.f32 %v11990_v22, %v11886_v12 }
 0x39b   : > { %v8926_v52 = vpop.eup %8925  ;;  %6937 = vst.msk [vmem:[%s10312_s26 + $0x2d8] sm:$0xff] %vm6845_vm2, %v6744_v23  ;;  %8945 = vrcp.f32 %v5215_v43  ;;  %v5213_v51 = vadd.f32 1.0, %v8924_v29  ;;  %v7419_v43 = vmul.f32 -1.442695, %v4202_v2  ;;  %v12017_v23 = vpop.permute.xlu1 %6330 }
 0x39c   : > { %v8928_v38 = vpop.eup %8927  ;;  %v6742_v32 = vsel %vm3188_vm1, %v12864_v46, %v8926_v52  ;;  %8947 = vpow2.f32 %v7413_v33  ;;  %v12011_v33 = vpop.f32.mrb[214].mxu0  ;;  %v4218_v46 = vadd.f32 %v11990_v22, %v11899_v0 }
 0x39d   : > { %v8930_v57 = vpop.eup %8929  ;;  %6935 = vst.msk [vmem:[%s10312_s26 + $0x2c8] sm:$0xff] %vm6845_vm2, %v6742_v32  ;;  %8949 = vrcp.f32 %v5213_v51  ;;  %v5216_v34 = vadd.f32 1.0, %v8928_v38  ;;  %v12015_v29 = vpop.f32.mrb[215].mxu0  ;;  %v12866_v51 = vld [vmem:[#allocation13_spill] sm:$0xff]  ;;  %v7417_v38 = vmul.f32 -1.442695, %v4194_v13 }
 0x39e   : > { %v8932_v21 = vpop.eup %8931  ;;  %v6747_v28 = vsel %vm3188_vm1, %v12865_v24, %v8930_v57  ;;  %8951 = vpow2.f32 %v7418_v36  ;;  %v12867_v57 = vld [vmem:[#allocation11_spill] sm:$0xff]  ;;  %v4210_v24 = vadd.f32 %v11990_v22, %v11906_v56  ;;  %v12031_v0 = vpop.permute.xlu0 %6315  ;;  %v12868_v13 = vld [vmem:[#allocation12_spill] sm:$0xff]  ;;  %v4231_v56 = vadd.f32 %v11990_v22, %v11937_v39 }
 0x39f   : > { %v8934_v60 = vpop.eup %8933  ;;  %6940 = vst.msk [vmem:[%s10312_s26 + $0x2f0] sm:$0xff] %vm6845_vm2, %v6747_v28  ;;  %8953 = vrcp.f32 %v5216_v34  ;;  %v5214_v61 = vadd.f32 1.0, %v8932_v21  ;;  %v7420_v21 = vmul.f32 -1.442695, %v4207_v48  ;;  %v12045_v48 = vpop.permute.xlu1 %6320  ;;  %v4234_v39 = vadd.f32 %v11990_v22, %v11951_v17 }
 0x3a0   : > { %v8936_v62 = vpop.eup %8935  ;;  %v5219_v50 = vadd.f32 1.0, %v8934_v60  ;;  %8955 = vpow2.f32 %v7416_v26  ;;  %v7422_v26 = vmul.f32 -1.442695, %v4215_v35  ;;  %v12869_v35 = vld [vmem:[#allocation14_spill] sm:$0xff]  ;;  %v4226_v17 = vadd.f32 %v11990_v22, %v11960_v8 }
 0x3a1   : > { %v8938_v45 = vpop.eup %8937  ;;  %8957 = vrcp.f32 %v5214_v61  ;;  %v5217_v36 = vadd.f32 1.0, %v8936_v62 }
 0x3a2   : > { %v8940_v52 = vpop.eup %8939  ;;  %v6745_v12 = vsel %vm3188_vm1, %v12866_v51, %v8938_v45  ;;  %8959 = vrcp.f32 %v5219_v50  ;;  %v7423_v50 = vmul.f32 -1.442695, %v4218_v46 }
 0x3a3   : > { %v8942_v32 = vpop.eup %8941  ;;  %6938 = vst.msk [vmem:[%s10312_s26 + $0x2e0] sm:$0xff] %vm6845_vm2, %v6745_v12  ;;  %8961 = vrcp.f32 %v5217_v36  ;;  %v5220_v15 = vadd.f32 1.0, %v8940_v52  ;;  %v4223_v36 = vadd.f32 %v11990_v22, %v11942_v25  ;;  %v12051_v52 = vpop.f32.mrb[216].mxu0 }
 0x3a4   : > { %v8944_v2 = vpop.eup %8943  ;;  %v6748_v34 = vsel %vm3188_vm1, %v12867_v57, %v8942_v32  ;;  %8963 = vpow2.f32 %v7419_v43  ;;  %v12058_v46 = vpop.f32.mrb[217].mxu0  ;;  %v7426_v57 = vmul.f32 -1.442695, %v4231_v56 }
 0x3a5   : > { %v8946_v28 = vpop.eup %8945  ;;  %6941 = vst.msk [vmem:[%s10312_s26 + $0x2f8] sm:$0xff] %vm6845_vm2, %v6748_v34  ;;  %v6746_v60 = vsel %vm3188_vm1, %v12868_v13, %v8944_v2  ;;  %8965 = vrcp.f32 %v5220_v15  ;;  %v12062_v15 = vpop.f32.mrb[218].mxu0  ;;  %v12870_v2 = vld [vmem:[#allocation15_spill] sm:$0xff]  ;;  %v7424_v13 = vmul.f32 -1.442695, %v4223_v36 }
 0x3a6   : > { %v8948_v61 = vpop.eup %8947  ;;  %6939 = vst.msk [vmem:[%s10312_s26 + $0x2e8] sm:$0xff] %vm6845_vm2, %v6746_v60  ;;  %v6751_v62 = vsel %vm3188_vm1, %v12869_v35, %v8946_v28  ;;  %8967 = vpow2.f32 %v7417_v38  ;;  %v7421_v38 = vmul.f32 -1.442695, %v4210_v24  ;;  %v12069_v34 = vpop.f32.mrb[219].mxu0  ;;  %v7427_v35 = vmul.f32 -1.442695, %v4234_v39 }
 0x3a7   : > { %v8950_v43 = vpop.eup %8949  ;;  %6944 = vst.msk [vmem:[%s10312_s26 + $0x310] sm:$0xff] %vm6845_vm2, %v6751_v62  ;;  %v5218_v45 = vadd.f32 1.0, %v8948_v61  ;;  %8969 = vpow2.f32 %v7422_v26  ;;  %v12071_v24 = vpop.permute.xlu0 %6345 }
 0x3a8   : > { %v8952_v51 = vpop.eup %8951  ;;  %v6749_v12 = vsel %vm3188_vm1, %v11509_v16, %v8950_v43  ;;  %8971 = vpow2.f32 %v7420_v21  ;;  %v12078_v62 = vpop.permute.xlu1 %6350  ;;  %v7425_v43 = vmul.f32 -1.442695, %v4226_v17 }
 0x3a9   : > { %v8954_v32 = vpop.eup %8953  ;;  %6942 = vst.msk [vmem:[%s10312_s26 + $0x300] sm:$0xff] %vm6845_vm2, %v6749_v12  ;;  %8973 = vrcp.f32 %v5218_v45  ;;  %v5223_v25 = vadd.f32 1.0, %v8952_v51  ;;  %v4247_v45 = vadd.f32 %v11990_v22, %v11996_v6 }
 0x3aa   : > { %v8956_v26 = vpop.eup %8955  ;;  %v6752_v16 = vsel %vm3188_vm1, %v12870_v2, %v8954_v32  ;;  %8975 = vpow2.f32 %v7423_v50  ;;  %v12103_v32 = vpop.f32.mrb[220].mxu0 }
 0x3ab   : > { %v8958_v21 = vpop.eup %8957  ;;  %6945 = vst.msk [vmem:[%s10312_s26 + $0x318] sm:$0xff] %vm6845_vm2, %v6752_v16  ;;  %8977 = vrcp.f32 %v5223_v25  ;;  %v5221_v28 = vadd.f32 1.0, %v8956_v26  ;;  %v12099_v39 = vpop.permute.xlu0 %6335  ;;  %v7430_v2 = vmul.f32 -1.442695, %v4247_v45 }
 0x3ac   : > { %v8960_v60 = vpop.eup %8959  ;;  %v6750_v61 = vsel %vm3188_vm1, %v11528_v58, %v8958_v21  ;;  %8979 = vpow2.f32 %v7421_v38  ;;  %v4239_v38 = vadd.f32 %v11990_v22, %v12003_v9  ;;  %v12107_v16 = vpop.f32.mrb[221].mxu0 }
 0x3ad   : > { %v8962_v8 = vpop.eup %8961  ;;  %6943 = vst.msk [vmem:[%s10312_s26 + $0x308] sm:$0xff] %vm6845_vm2, %v6750_v61  ;;  %v6755_v50 = vsel %vm3188_vm1, %v11561_v63, %v8960_v60  ;;  %8981 = vrcp.f32 %v5221_v28  ;;  %v12111_v21 = vpop.f32.mrb[222].mxu0 }
 0x3ae   : > { %v8964_v56 = vpop.eup %8963  ;;  %6948 = vst.msk [vmem:[%s10312_s26 + $0x330] sm:$0xff] %vm6845_vm2, %v6755_v50  ;;  %v6753_v58 = vsel %vm3188_vm1, %v11615_v37, %v8962_v8  ;;  %8983 = vpow2.f32 %v7426_v57  ;;  %v12109_v57 = vpop.permute.xlu1 %6340  ;;  %v7428_v60 = vmul.f32 -1.442695, %v4239_v38  ;;  %v4255_v38 = vadd.f32 %v11990_v22, %v12058_v46 }
 0x3af   : > { %v8966_v36 = vpop.eup %8965  ;;  %6946 = vst.msk [vmem:[%s10312_s26 + $0x320] sm:$0xff] %vm6845_vm2, %v6753_v58  ;;  %v5224_v51 = vadd.f32 1.0, %v8964_v56  ;;  %8985 = vpow2.f32 %v7424_v13  ;;  %v12116_v61 = vpop.f32.mrb[223].mxu0  ;;  %v4258_v46 = vadd.f32 %v11990_v22, %v12069_v34 }
 0x3b0   : > { %v8968_v63 = vpop.eup %8967  ;;  %v6756_v12 = vsel %vm3188_vm1, %v11580_v44, %v8966_v36  ;;  %8987 = vpow2.f32 %v7427_v35  ;;  %v4250_v44 = vadd.f32 %v11990_v22, %v12011_v33 }
 0x3b1   : > { %v8970_v37 = vpop.eup %8969  ;;  %6949 = vst.msk [vmem:[%s10312_s26 + $0x338] sm:$0xff] %vm6845_vm2, %v6756_v12  ;;  %8989 = vrcp.f32 %v5224_v51  ;;  %v5222_v6 = vadd.f32 1.0, %v8968_v63 }
 0x3b2   : > { %v8972_v25 = vpop.eup %8971  ;;  %v5227_v26 = vadd.f32 1.0, %v8970_v37  ;;  %8991 = vpow2.f32 %v7425_v43  ;;  %v7431_v56 = vmul.f32 -1.442695, %v4250_v44  ;;  %v12125_v43 = vpop.permute.xlu0 %6365 }
 0x3b3   : > { %v8974_v9 = vpop.eup %8973  ;;  %8993 = vrcp.f32 %v5222_v6  ;;  %v5225_v17 = vadd.f32 1.0, %v8972_v25  ;;  %v12134_v12 = vpop.permute.xlu1 %6370 }
 0x3b4   : > { %v8976_v28 = vpop.eup %8975  ;;  %v6754_v13 = vsel %vm3188_vm1, %v11625_v19, %v8974_v9  ;;  %8995 = vrcp.f32 %v5227_v26  ;;  %v4242_v19 = vadd.f32 %v11990_v22, %v12015_v29 }
 0x3b5   : > { %v8978_v33 = vpop.eup %8977  ;;  %6947 = vst.msk [vmem:[%s10312_s26 + $0x328] sm:$0xff] %vm6845_vm2, %v6754_v13  ;;  %8997 = vrcp.f32 %v5225_v17  ;;  %v5228_v35 = vadd.f32 1.0, %v8976_v28 }
 0x3b6   : > { %v8980_v8 = vpop.eup %8979  ;;  %v6759_v50 = vsel %vm3188_vm1, %v11664_v11, %v8978_v33  ;;  %8999 = vpow2.f32 %v7430_v2  ;;  %v4263_v11 = vadd.f32 %v11990_v22, %v12051_v52  ;;  %v7429_v25 = vmul.f32 -1.442695, %v4242_v19  ;;  %v8359_v2 = vpop.f32.mrb[224].mxu0 }
 0x3b7   : > { %v8982_v58 = vpop.eup %8981  ;;  %6952 = vst.msk [vmem:[%s10312_s26 + $0x350] sm:$0xff] %vm6845_vm2, %v6759_v50  ;;  %9001 = vrcp.f32 %v5228_v35  ;;  %v5226_v45 = vadd.f32 1.0, %v8980_v8  ;;  %v12147_v28 = vpop.f32.mrb[225].mxu0  ;;  %v7432_v33 = vmul.f32 -1.442695, %v4255_v38  ;;  %v4279_v50 = vadd.f32 %v11990_v22, %v12103_v32 }
 0x3b8   : > { %v8984_v36 = vpop.eup %8983  ;;  %v6757_v51 = vsel %vm3188_vm1, %v11706_v10, %v8982_v58  ;;  %9003 = vpow2.f32 %v7428_v60  ;;  %v4266_v10 = vadd.f32 %v11990_v22, %v12062_v15  ;;  %v7434_v17 = vmul.f32 -1.442695, %v4263_v11  ;;  %v12149_v60 = vpop.permute.xlu0 %6355 }
 0x3b9   : > { %v8986_v63 = vpop.eup %8985  ;;  %6950 = vst.msk [vmem:[%s10312_s26 + $0x340] sm:$0xff] %vm6845_vm2, %v6757_v51  ;;  %9005 = vrcp.f32 %v5226_v45  ;;  %v5231_v29 = vadd.f32 1.0, %v8984_v36  ;;  %v12153_v35 = vpop.f32.mrb[226].mxu0  ;;  %v7433_v32 = vmul.f32 -1.442695, %v4258_v46  ;;  %v4271_v51 = vadd.f32 %v11990_v22, %v12107_v16 }
 0x3ba   : > { %v8988_v37 = vpop.eup %8987  ;;  %v5229_v6 = vadd.f32 1.0, %v8986_v63  ;;  %9007 = vpow2.f32 %v7431_v56  ;;  %v7435_v34 = vmul.f32 -1.442695, %v4266_v10  ;;  %v12160_v56 = vpop.f32.mrb[227].mxu0 }
 0x3bb   : > { %v8990_v26 = vpop.eup %8989  ;;  %9009 = vrcp.f32 %v5231_v29  ;;  %v5232_v52 = vadd.f32 1.0, %v8988_v37  ;;  %v12162_v58 = vpop.permute.xlu1 %6360  ;;  %v4274_v37 = vadd.f32 %v11990_v22, %v12116_v61 }
 0x3bc   : > { %v8992_v44 = vpop.eup %8991  ;;  %v6760_v9 = vsel %vm3188_vm1, %v11686_v1, %v8990_v26  ;;  %9011 = vrcp.f32 %v5229_v6  ;;  %v12185_v6 = vpop.permute.xlu0 %6385  ;;  %v4295_v26 = vadd.f32 %v11990_v22, %v8359_v2 }
 0x3bd   : > { %v8994_v13 = vpop.eup %8993  ;;  %6953 = vst.msk [vmem:[%s10312_s26 + $0x358] sm:$0xff] %vm6845_vm2, %v6760_v9  ;;  %9013 = vrcp.f32 %v5232_v52  ;;  %v5230_v15 = vadd.f32 1.0, %v8992_v44 }
 0x3be   : > { %v8996_v1 = vpop.eup %8995  ;;  %v6758_v8 = vsel %vm3188_vm1, %v11731_v49, %v8994_v13  ;;  %9015 = vpow2.f32 %v7429_v25  ;;  %v7437_v13 = vmul.f32 -1.442695, %v4274_v37 }
 0x3bf   : > { %v8998_v19 = vpop.eup %8997  ;;  %6951 = vst.msk [vmem:[%s10312_s26 + $0x348] sm:$0xff] %vm6845_vm2, %v6758_v8  ;;  %v6763_v45 = vsel %vm3188_vm1, %v11761_v3, %v8996_v1  ;;  %9017 = vrcp.f32 %v5230_v15  ;;  %v4282_v3 = vadd.f32 %v11990_v22, %v12111_v21  ;;  %v12193_v44 = vpop.permute.xlu1 %6390 }
 0x3c0   : > { %v9000_v36 = vpop.eup %8999  ;;  %6956 = vst.msk [vmem:[%s10312_s26 + $0x370] sm:$0xff] %vm6845_vm2, %v6763_v45  ;;  %v6761_v49 = vsel %vm3188_vm1, %v11798_v59, %v8998_v19  ;;  %9019 = vpow2.f32 %v7434_v17  ;;  %v7438_v59 = vmul.f32 -1.442695, %v4279_v50  ;;  %v8363_v17 = vpop.f32.mrb[228].mxu0  ;;  %v4287_v50 = vadd.f32 %v11990_v22, %v12147_v28 }
 0x3c1   : > { %v9002_v11 = vpop.eup %9001  ;;  %6954 = vst.msk [vmem:[%s10312_s26 + $0x360] sm:$0xff] %vm6845_vm2, %v6761_v49  ;;  %v5235_v63 = vadd.f32 1.0, %v9000_v36  ;;  %9021 = vpow2.f32 %v7432_v33  ;;  %v7439_v9 = vmul.f32 -1.442695, %v4282_v3  ;;  %v4302_v15 = vpop.f32.mrb[229].mxu0 }
 0x3c2   : > { %v9004_v29 = vpop.eup %9003  ;;  %v6764_v38 = vsel %vm3188_vm1, %v11768_v18, %v9002_v11  ;;  %9023 = vpow2.f32 %v7435_v34  ;;  %v7436_v18 = vmul.f32 -1.442695, %v4271_v51  ;;  %v8364_v1 = vpop.f32.mrb[230].mxu0  ;;  %v7442_v34 = vmul.f32 -1.442695, %v4295_v26 }
 0x3c3   : > { %v9006_v16 = vpop.eup %9005  ;;  %6957 = vst.msk [vmem:[%s10312_s26 + $0x378] sm:$0xff] %vm6845_vm2, %v6764_v38  ;;  %9025 = vrcp.f32 %v5235_v63  ;;  %v5233_v25 = vadd.f32 1.0, %v9004_v29  ;;  %v4305_v19 = vpop.f32.mrb[231].mxu0  ;;  %v7440_v29 = vmul.f32 -1.442695, %v4287_v50  ;;  %v4290_v38 = vadd.f32 %v11990_v22, %v12160_v56 }
 0x3c4   : > { %v9008_v10 = vpop.eup %9007  ;;  %v6762_v21 = vsel %vm3188_vm1, %v11807_v47, %v9006_v16  ;;  %9027 = vpow2.f32 %v7433_v32  ;;  %v12212_v36 = vpop.permute.xlu0 %6375 }
 0x3c5   : > { %v9010_v52 = vpop.eup %9009  ;;  %6955 = vst.msk [vmem:[%s10312_s26 + $0x368] sm:$0xff] %vm6845_vm2, %v6762_v21  ;;  %9029 = vrcp.f32 %v5233_v25  ;;  %v5236_v61 = vadd.f32 1.0, %v9008_v10  ;;  %v12221_v11 = vpop.permute.xlu1 %6380 }
 0x3c6   : > { %v9012_v46 = vpop.eup %9011  ;;  %v6767_v47 = vsel %vm3188_vm1, %v11827_v20, %v9010_v52  ;;  %9031 = vpow2.f32 %v7438_v59  ;;  %v7441_v52 = vmul.f32 -1.442695, %v4290_v38 }
 0x3c7   : > { %v9014_v2 = vpop.eup %9013  ;;  %6960 = vst.msk [vmem:[%s10312_s26 + $0x390] sm:$0xff] %vm6845_vm2, %v6767_v47  ;;  %v6765_v33 = vsel %vm3188_vm1, %v11849_v30, %v9012_v46  ;;  %9033 = vrcp.f32 %v5236_v61 }
 0x3c8   : > { %v9016_v8 = vpop.eup %9015  ;;  %6958 = vst.msk [vmem:[%s10312_s26 + $0x380] sm:$0xff] %vm6845_vm2, %v6765_v33  ;;  %v6768_v20 = vsel %vm3188_vm1, %v11838_v41, %v9014_v2  ;;  %9035 = vpow2.f32 %v7436_v18  ;;  %v4298_v41 = vadd.f32 %v11990_v22, %v12153_v35  ;;  %v12230_v10 = vpop.permute.xlu0 %6405 }
 0x3c9   : > { %v9018_v45 = vpop.eup %9017  ;;  %6961 = vst.msk [vmem:[%s10312_s26 + $0x398] sm:$0xff] %vm6845_vm2, %v6768_v20  ;;  %v5234_v30 = vadd.f32 1.0, %v9016_v8  ;;  %9037 = vpow2.f32 %v7439_v9  ;;  %v8367_v18 = vpop.f32.mrb[232].mxu0 }
 0x3ca   : > { %v9020_v49 = vpop.eup %9019  ;;  %v6766_v32 = vsel %vm3188_vm1, %v11862_v54, %v9018_v45  ;;  %9039 = vpow2.f32 %v7437_v13  ;;  %v7443_v16 = vmul.f32 -1.442695, %v4298_v41  ;;  %v4318_v61 = vpop.f32.mrb[233].mxu0 }
 0x3cb   : > { %v9022_v51 = vpop.eup %9021  ;;  %6959 = vst.msk [vmem:[%s10312_s26 + $0x388] sm:$0xff] %vm6845_vm2, %v6766_v32  ;;  %9041 = vrcp.f32 %v5234_v30  ;;  %v5239_v28 = vadd.f32 1.0, %v9020_v49  ;;  %v12238_v46 = vpop.permute.xlu1 %6410  ;;  %v4306_v49 = vadd.f32 %v11990_v22, %v4305_v19 }
 0x3cc   : > { %v9024_v63 = vpop.eup %9023  ;;  %v5237_v3 = vadd.f32 1.0, %v9022_v51  ;;  %9043 = vpow2.f32 %v7442_v34  ;;  %v8368_v13 = vpop.f32.mrb[234].mxu0  ;;  %v4314_v34 = vadd.f32 %v11990_v22, %v8364_v1 }
 0x3cd   : > { %v9026_v54 = vpop.eup %9025  ;;  %9045 = vrcp.f32 %v5239_v28  ;;  %v5240_v59 = vadd.f32 1.0, %v9024_v63  ;;  %v4321_v8 = vpop.f32.mrb[235].mxu0  ;;  %v4327_v28 = vadd.f32 %v11990_v22, %v8367_v18 }
 0x3ce   : > { %v9028_v37 = vpop.eup %9027  ;;  %v6771_v35 = vsel %vm3188_vm1, %v11879_v55, %v9026_v54  ;;  %9047 = vrcp.f32 %v5237_v3  ;;  %v4311_v55 = vadd.f32 %v11990_v22, %v8363_v17 }
 0x3cf   : > { %v9030_v25 = vpop.eup %9029  ;;  %6964 = vst.msk [vmem:[%s10312_s26 + $0x3b0] sm:$0xff] %vm6845_vm2, %v6771_v35  ;;  %9049 = vrcp.f32 %v5240_v59  ;;  %v5238_v21 = vadd.f32 1.0, %v9028_v37  ;;  %v12256_v3 = vpop.permute.xlu1 %6400  ;;  %v4319_v59 = vadd.f32 %v11990_v22, %v4318_v61  ;;  %v7450_v18 = vmul.f32 -1.442695, %v4327_v28 }
 0x3d0   : > { %v9032_v56 = vpop.eup %9031  ;;  %v6769_v26 = vsel %vm3188_vm1, %v11915_v14, %v9030_v25  ;;  %9051 = vpow2.f32 %v7440_v29  ;;  %v4303_v14 = vadd.f32 %v11990_v22, %v4302_v15  ;;  %v7446_v30 = vmul.f32 -1.442695, %v4311_v55 }
 0x3d1   : > { %v9034_v9 = vpop.eup %9033  ;;  %6962 = vst.msk [vmem:[%s10312_s26 + $0x3a0] sm:$0xff] %vm6845_vm2, %v6769_v26  ;;  %9053 = vrcp.f32 %v5238_v21  ;;  %v5243_v47 = vadd.f32 1.0, %v9032_v56  ;;  %v7447_v29 = vmul.f32 -1.442695, %v4314_v34  ;;  %v4330_v56 = vadd.f32 %v11990_v22, %v8368_v13 }
 0x3d2   : > { %v9036_v2 = vpop.eup %9035  ;;  %v6772_v33 = vsel %vm3188_vm1, %v11888_v53, %v9034_v9  ;;  %9055 = vpow2.f32 %v7443_v16  ;;  %v12250_v53 = vpop.permute.xlu0 %6395  ;;  %v7444_v1 = vmul.f32 -1.442695, %v4303_v14  ;;  %v4322_v55 = vadd.f32 %v11990_v22, %v4321_v8 }
 0x3d3   : > { %v9038_v20 = vpop.eup %9037  ;;  %6965 = vst.msk [vmem:[%s10312_s26 + $0x3b8] sm:$0xff] %vm6845_vm2, %v6772_v33  ;;  %9057 = vrcp.f32 %v5243_v47  ;;  %v5241_v17 = vadd.f32 1.0, %v9036_v2  ;;  %v7448_v47 = vmul.f32 -1.442695, %v4319_v59  ;;  %v12284_v14 = vpop.permute.xlu1 %6430 }
 0x3d4   : > { %v9040_v50 = vpop.eup %9039  ;;  %v5244_v45 = vadd.f32 1.0, %v9038_v20  ;;  %9059 = vpow2.f32 %v7441_v52  ;;  %v8371_v37 = vpop.f32.mrb[236].mxu0 }
 0x3d5   : > { %v9042_v32 = vpop.eup %9041  ;;  %9061 = vrcp.f32 %v5241_v17  ;;  %v5242_v15 = vadd.f32 1.0, %v9040_v50  ;;  %v4334_v25 = vpop.f32.mrb[237].mxu0  ;;  %v4343_v13 = vadd.f32 %v11990_v22, %v8371_v37 }
 0x3d6   : > { %v9044_v41 = vpop.eup %9043  ;;  %v6770_v51 = vsel %vm3188_vm1, %v11926_v40, %v9042_v32  ;;  %9063 = vrcp.f32 %v5244_v45  ;;  %v7445_v40 = vmul.f32 -1.442695, %v4306_v49  ;;  %v12275_v52 = vpop.permute.xlu0 %6425  ;;  %v4335_v34 = vadd.f32 %v11990_v22, %v4334_v25 }
 0x3d7   : > { %v9046_v63 = vpop.eup %9045  ;;  %6963 = vst.msk [vmem:[%s10312_s26 + $0x3a8] sm:$0xff] %vm6845_vm2, %v6770_v51  ;;  %9065 = vrcp.f32 %v5242_v15  ;;  %v5247_v19 = vadd.f32 1.0, %v9044_v41  ;;  %v8372_v61 = vpop.f32.mrb[238].mxu0  ;;  %v7454_v15 = vmul.f32 -1.442695, %v4343_v13 }
 0x3d8   : > { %v9048_v38 = vpop.eup %9047  ;;  %v6775_v54 = vsel %vm3188_vm1, %v11944_v31, %v9046_v63  ;;  %9067 = vpow2.f32 %v7446_v30  ;;  %v4337_v2 = vpop.f32.mrb[239].mxu0  ;;  %v7449_v30 = vmul.f32 -1.442695, %v4322_v55  ;;  %v7452_v63 = vmul.f32 -1.442695, %v4335_v34 }
 0x3d9   : > { %v9050_v35 = vpop.eup %9049  ;;  %6968 = vst.msk [vmem:[%s10312_s26 + $0x3d0] sm:$0xff] %vm6845_vm2, %v6775_v54  ;;  %v6773_v16 = vsel %vm3188_vm1, %v11975_v27, %v9048_v38  ;;  %9069 = vrcp.f32 %v5247_v19  ;;  %v4346_v19 = vadd.f32 %v11990_v22, %v8372_v61  ;;  %v12310_v54 = vpop.permute.xlu1 %6420 }
 0x3da   : > { %v9052_v21 = vpop.eup %9051  ;;  %6966 = vst.msk [vmem:[%s10312_s26 + $0x3c0] sm:$0xff] %vm6845_vm2, %v6773_v16  ;;  %v6776_v31 = vsel %vm3188_vm1, %v11962_v42, %v9050_v35  ;;  %9071 = vpow2.f32 %v7444_v1  ;;  %v12297_v41 = vpop.permute.xlu0 %6415 }
 0x3db   : > { %v9054_v26 = vpop.eup %9053  ;;  %6969 = vst.msk [vmem:[%s10312_s26 + $0x3d8] sm:$0xff] %vm6845_vm2, %v6776_v31  ;;  %v5245_v27 = vadd.f32 1.0, %v9052_v21  ;;  %9073 = vpow2.f32 %v7447_v29 }
 0x3dc   : > { %v9056_v9 = vpop.eup %9055  ;;  %v6774_v42 = vsel %vm3188_vm1, %v11980_v5, %v9054_v26  ;;  %9075 = vpow2.f32 %v7445_v40  ;;  %v7451_v5 = vmul.f32 -1.442695, %v4330_v56  ;;  %v8375_v1 = vpop.f32.mrb[240].mxu0 }
 0x3dd   : > { %v9058_v33 = vpop.eup %9057  ;;  %6967 = vst.msk [vmem:[%s10312_s26 + $0x3c8] sm:$0xff] %vm6845_vm2, %v6774_v42  ;;  %9077 = vrcp.f32 %v5245_v27  ;;  %v5248_v20 = vadd.f32 1.0, %v9056_v9  ;;  %v4350_v29 = vpop.f32.mrb[241].mxu0  ;;  %v4359_v56 = vadd.f32 %v11990_v22, %v8375_v1 }
 0x3de   : > { %v9060_v8 = vpop.eup %9059  ;;  %v6779_v17 = vsel %vm3188_vm1, %v12005_v7, %v9058_v33  ;;  %9079 = vpow2.f32 %v7450_v18  ;;  %v8376_v40 = vpop.f32.mrb[242].mxu0  ;;  %v7455_v18 = vmul.f32 -1.442695, %v4346_v19 }
 0x3df   : > { %v9062_v50 = vpop.eup %9061  ;;  %6972 = vst.msk [vmem:[%s10312_s26 + $0x3f0] sm:$0xff] %vm6845_vm2, %v6779_v17  ;;  %9081 = vrcp.f32 %v5248_v20  ;;  %v5246_v45 = vadd.f32 1.0, %v9060_v8  ;;  %v4353_v25 = vpop.f32.mrb[243].mxu0  ;;  %v7458_v20 = vmul.f32 -1.442695, %v4359_v56  ;;  %v4351_v8 = vadd.f32 %v11990_v22, %v4350_v29 }
 0x3e0   : > { %v9064_v49 = vpop.eup %9063  ;;  %v6777_v32 = vsel %vm3188_vm1, %v12031_v0, %v9062_v50  ;;  %9083 = vpow2.f32 %v7448_v47  ;;  %v12321_v27 = vpop.permute.xlu0 %6445 }
 0x3e1   : > { %v9066_v7 = vpop.eup %9065  ;;  %6970 = vst.msk [vmem:[%s10312_s26 + $0x3e0] sm:$0xff] %vm6845_vm2, %v6777_v32  ;;  %v6780_v51 = vsel %vm3188_vm1, %v12017_v23, %v9064_v49  ;;  %9085 = vrcp.f32 %v5246_v45  ;;  %v12326_v47 = vpop.permute.xlu1 %6450  ;;  %v4362_v45 = vadd.f32 %v11990_v22, %v8376_v40 }
 0x3e2   : > { %v9068_v28 = vpop.eup %9067  ;;  %6973 = vst.msk [vmem:[%s10312_s26 + $0x3f8] sm:$0xff] %vm6845_vm2, %v6780_v51  ;;  %v6778_v0 = vsel %vm3188_vm1, %v12045_v48, %v9066_v7  ;;  %9087 = vpow2.f32 %v7451_v5  ;;  %v4338_v48 = vadd.f32 %v11990_v22, %v4337_v2 }
 0x3e3   : > { %v9070_v38 = vpop.eup %9069  ;;  %6971 = vst.msk [vmem:[%s10312_s26 + $0x3e8] sm:$0xff] %vm6845_vm2, %v6778_v0  ;;  %v5251_v23 = vadd.f32 1.0, %v9068_v28  ;;  %9089 = vpow2.f32 %v7449_v30  ;;  %v7456_v28 = vmul.f32 -1.442695, %v4351_v8  ;;  %v7459_v40 = vmul.f32 -1.442695, %v4362_v45 }
 0x3e4   : > { %v9072_v59 = vpop.eup %9071  ;;  %v6783_v37 = vsel %vm3188_vm1, %v12071_v24, %v9070_v38  ;;  %9091 = vpow2.f32 %v7454_v15  ;;  %v7453_v9 = vmul.f32 -1.442695, %v4338_v48  ;;  %v12340_v49 = vpop.permute.xlu0 %6435  ;;  %v4354_v15 = vadd.f32 %v11990_v22, %v4353_v25 }
 0x3e5   : > { %v9074_v35 = vpop.eup %9073  ;;  %6976 = vst.msk [vmem:[%s10312_s26 + $0x410] sm:$0xff] %vm6845_vm2, %v6783_v37  ;;  %9093 = vrcp.f32 %v5251_v23  ;;  %v5249_v16 = vadd.f32 1.0, %v9072_v59  ;;  %v12346_v19 = vpop.permute.xlu1 %6440 }
 0x3e6   : > { %v9076_v21 = vpop.eup %9075  ;;  %v5252_v31 = vadd.f32 1.0, %v9074_v35  ;;  %9095 = vpow2.f32 %v7452_v63  ;;  %v8379_v5 = vpop.f32.mrb[244].mxu0  ;;  %v7457_v35 = vmul.f32 -1.442695, %v4354_v15 }
 0x3e7   : > { %v9078_v26 = vpop.eup %9077  ;;  %9097 = vrcp.f32 %v5249_v16  ;;  %v5250_v24 = vadd.f32 1.0, %v9076_v21 }
 0x3e8   : > { %v9080_v55 = vpop.eup %9079  ;;  %v6781_v61 = vsel %vm3188_vm1, %v12099_v39, %v9078_v26  ;;  %9099 = vrcp.f32 %v5252_v31 }
 0x3e9   : > { %v9082_v42 = vpop.eup %9081  ;;  %6974 = vst.msk [vmem:[%s10312_s26 + $0x400] sm:$0xff] %vm6845_vm2, %v6781_v61  ;;  %9101 = vrcp.f32 %v5250_v24  ;;  %v5255_v13 = vadd.f32 1.0, %v9080_v55 }
 0x3ea   : > { %v9084_v2 = vpop.eup %9083  ;;  %v6784_v33 = vsel %vm3188_vm1, %v12078_v62, %v9082_v42  ;;  %9103 = vpow2.f32 %v7455_v18  ;;  %v4366_v62 = vpop.f32.mrb[245].mxu0 }
 0x3eb   : > { %v9086_v39 = vpop.eup %9085  ;;  %6977 = vst.msk [vmem:[%s10312_s26 + $0x418] sm:$0xff] %vm6845_vm2, %v6784_v33  ;;  %9105 = vrcp.f32 %v5255_v13  ;;  %v5253_v17 = vadd.f32 1.0, %v9084_v2  ;;  %v8380_v7 = vpop.f32.mrb[246].mxu0  ;;  %v4367_v59 = vadd.f32 %v11990_v22, %v4366_v62 }
 0x3ec   : > { %v9088_v34 = vpop.eup %9087  ;;  %v6782_v50 = vsel %vm3188_vm1, %v12109_v57, %v9086_v39  ;;  %9107 = vpow2.f32 %v7453_v9  ;;  %v4375_v57 = vadd.f32 %v11990_v22, %v8379_v5  ;;  %v4369_v0 = vpop.f32.mrb[247].mxu0 }
 0x3ed   : > { %v9090_v30 = vpop.eup %9089  ;;  %6975 = vst.msk [vmem:[%s10312_s26 + $0x408] sm:$0xff] %vm6845_vm2, %v6782_v50  ;;  %9109 = vrcp.f32 %v5253_v17  ;;  %v5256_v32 = vadd.f32 1.0, %v9088_v34  ;;  %v12358_v18 = vpop.permute.xlu0 %6465  ;;  %v7460_v24 = vmul.f32 -1.442695, %v4367_v59  ;;  %v4370_v55 = vadd.f32 %v11990_v22, %v4369_v0 }
 0x3ee   : > { %v9092_v51 = vpop.eup %9091  ;;  %v5254_v1 = vadd.f32 1.0, %v9090_v30  ;;  %9111 = vpow2.f32 %v7458_v20  ;;  %v7462_v21 = vmul.f32 -1.442695, %v4375_v57  ;;  %v12371_v42 = vpop.permute.xlu1 %6470 }
 0x3ef   : > { %v9094_v63 = vpop.eup %9093  ;;  %9113 = vrcp.f32 %v5256_v32  ;;  %v5259_v29 = vadd.f32 1.0, %v9092_v51 }
 0x3f0   : > { %v9096_v38 = vpop.eup %9095  ;;  %v6787_v23 = vsel %vm3188_vm1, %v12125_v43, %v9094_v63  ;;  %9115 = vrcp.f32 %v5254_v1  ;;  %v4378_v43 = vadd.f32 %v11990_v22, %v8380_v7 }
 0x3f1   : > { %v9098_v37 = vpop.eup %9097  ;;  %6980 = vst.msk [vmem:[%s10312_s26 + $0x430] sm:$0xff] %vm6845_vm2, %v6787_v23  ;;  %9117 = vrcp.f32 %v5259_v29  ;;  %v5257_v48 = vadd.f32 1.0, %v9096_v38  ;;  %v8383_v61 = vpop.f32.mrb[248].mxu0 }
 0x3f2   : > { %v9100_v16 = vpop.eup %9099  ;;  %v6785_v25 = vsel %vm3188_vm1, %v12149_v60, %v9098_v37  ;;  %9119 = vpow2.f32 %v7456_v28  ;;  %v4391_v13 = vadd.f32 %v11990_v22, %v8383_v61  ;;  %v4382_v2 = vpop.f32.mrb[249].mxu0  ;;  %v7463_v20 = vmul.f32 -1.442695, %v4378_v43 }
 0x3f3   : > { %v9102_v31 = vpop.eup %9101  ;;  %6978 = vst.msk [vmem:[%s10312_s26 + $0x420] sm:$0xff] %vm6845_vm2, %v6785_v25  ;;  %v6788_v56 = vsel %vm3188_vm1, %v12134_v12, %v9100_v16  ;;  %9121 = vrcp.f32 %v5257_v48  ;;  %v4383_v8 = vadd.f32 %v11990_v22, %v4382_v2  ;;  %v8384_v39 = vpop.f32.mrb[250].mxu0 }
 0x3f4   : > { %v9104_v26 = vpop.eup %9103  ;;  %6981 = vst.msk [vmem:[%s10312_s26 + $0x438] sm:$0xff] %vm6845_vm2, %v6788_v56  ;;  %v6786_v60 = vsel %vm3188_vm1, %v12162_v58, %v9102_v31  ;;  %9123 = vpow2.f32 %v7459_v40  ;;  %v4385_v34 = vpop.f32.mrb[251].mxu0  ;;  %v4394_v62 = vadd.f32 %v11990_v22, %v8384_v39  ;;  %v7466_v7 = vmul.f32 -1.442695, %v4391_v13 }
 0x3f5   : > { %v9106_v9 = vpop.eup %9105  ;;  %6979 = vst.msk [vmem:[%s10312_s26 + $0x428] sm:$0xff] %vm6845_vm2, %v6786_v60  ;;  %v5260_v12 = vadd.f32 1.0, %v9104_v26  ;;  %9125 = vpow2.f32 %v7457_v35  ;;  %v12386_v32 = vpop.permute.xlu0 %6455  ;;  %v7464_v1 = vmul.f32 -1.442695, %v4383_v8  ;;  %v4386_v38 = vadd.f32 %v11990_v22, %v4385_v34 }
 0x3f6   : > { %v9108_v33 = vpop.eup %9107  ;;  %v6791_v58 = vsel %vm3188_vm1, %v12185_v6, %v9106_v9  ;;  %9127 = vpow2.f32 %v7462_v21  ;;  %v7461_v6 = vmul.f32 -1.442695, %v4370_v55  ;;  %v12393_v57 = vpop.permute.xlu1 %6460 }
 0x3f7   : > { %v9110_v17 = vpop.eup %9109  ;;  %6984 = vst.msk [vmem:[%s10312_s26 + $0x450] sm:$0xff] %vm6845_vm2, %v6791_v58  ;;  %9129 = vrcp.f32 %v5260_v12  ;;  %v5258_v5 = vadd.f32 1.0, %v9108_v33  ;;  %v7465_v31 = vmul.f32 -1.442695, %v4386_v38 }
 0x3f8   : > { %v9112_v50 = vpop.eup %9111  ;;  %v6789_v45 = vsel %vm3188_vm1, %v12212_v36, %v9110_v17  ;;  %9131 = vpow2.f32 %v7460_v24 }
 0x3f9   : > { %v9114_v30 = vpop.eup %9113  ;;  %6982 = vst.msk [vmem:[%s10312_s26 + $0x440] sm:$0xff] %vm6845_vm2, %v6789_v45  ;;  %9133 = vrcp.f32 %v5258_v5  ;;  %v5263_v15 = vadd.f32 1.0, %v9112_v50  ;;  %v12417_v16 = vpop.permute.xlu0 %6485 }
 0x3fa   : > { %v9116_v51 = vpop.eup %9115  ;;  %v6792_v36 = vsel %vm3188_vm1, %v12193_v44, %v9114_v30  ;;  %9135 = vpow2.f32 %v7463_v20  ;;  %v7467_v44 = vmul.f32 -1.442695, %v4394_v62  ;;  %v12422_v24 = vpop.permute.xlu1 %6490 }
 0x3fb   : > { %v9118_v28 = vpop.eup %9117  ;;  %6985 = vst.msk [vmem:[%s10312_s26 + $0x458] sm:$0xff] %vm6845_vm2, %v6792_v36  ;;  %v6790_v0 = vsel %vm3188_vm1, %v12221_v11, %v9116_v51  ;;  %9137 = vrcp.f32 %v5263_v15  ;;  %v8387_v59 = vpop.f32.mrb[252].mxu0 }
 0x3fc   : > { %v9120_v63 = vpop.eup %9119  ;;  %6983 = vst.msk [vmem:[%s10312_s26 + $0x448] sm:$0xff] %vm6845_vm2, %v6790_v0  ;;  %v6795_v29 = vsel %vm3188_vm1, %v12230_v10, %v9118_v28  ;;  %9139 = vpow2.f32 %v7461_v6  ;;  %v12414_v10 = vld [vmem:[%s12742_s5] ss:$0 sm:$0xff]  ;;  %v4398_v22 = vpop.f32.mrb[253].mxu0 }
 0x3fd   : > { %v9122_v23 = vpop.eup %9121  ;;  %6988 = vst.msk [vmem:[%s10312_s26 + $0x470] sm:$0xff] %vm6845_vm2, %v6795_v29  ;;  %v5261_v40 = vadd.f32 1.0, %v9120_v63  ;;  %9141 = vpow2.f32 %v7466_v7  ;;  %v4407_v48 = vadd.f32 %v12414_v10, %v8387_v59  ;;  %v8388_v21 = vpop.f32.mrb[254].mxu0  ;;  %v4399_v56 = vadd.f32 %v12414_v10, %v4398_v22 }
 0x3fe   : > { %v9124_v11 = vpop.eup %9123  ;;  %v6793_v37 = vsel %vm3188_vm1, %v12250_v53, %v9122_v23  ;;  %9143 = vpow2.f32 %v7464_v1  ;;  %v4401_v26 = vpop.f32.mrb[255].mxu0  ;;  %v4410_v8 = vadd.f32 %v12414_v10, %v8388_v21 }
 0x3ff   : > { %v9126_v35 = vpop.eup %9125  ;;  %6986 = vst.msk [vmem:[%s10312_s26 + $0x460] sm:$0xff] %vm6845_vm2, %v6793_v37  ;;  %9145 = vrcp.f32 %v5261_v40  ;;  %v5264_v25 = vadd.f32 1.0, %v9124_v11  ;;  %v7470_v12 = vmul.f32 -1.442695, %v4407_v48  ;;  %v7468_v20 = vmul.f32 -1.442695, %v4399_v56  ;;  %v12433_v17 = vpop.permute.xlu0 %6475 }
 0x400   : > { %v9128_v43 = vpop.eup %9127  ;;  %v5262_v53 = vadd.f32 1.0, %v9126_v35  ;;  %9147 = vpow2.f32 %v7467_v44  ;;  %v4402_v50 = vadd.f32 %v12414_v10, %v4401_v26  ;;  %v12441_v45 = vpop.permute.xlu1 %6480  ;;  %v7471_v15 = vmul.f32 -1.442695, %v4410_v8 }
 0x401   : > { %v9130_v60 = vpop.eup %9129  ;;  %9149 = vrcp.f32 %v5264_v25  ;;  %v5267_v55 = vadd.f32 1.0, %v9128_v43 }
 0x402   : > { %v9132_v61 = vpop.eup %9131  ;;  %v6796_v9 = vsel %vm3188_vm1, %v12238_v46, %v9130_v60  ;;  %9151 = vrcp.f32 %v5262_v53  ;;  %v7469_v63 = vmul.f32 -1.442695, %v4402_v50 }
 0x403   : > { %v9134_v13 = vpop.eup %9133  ;;  %6989 = vst.msk [vmem:[%s10312_s26 + $0x478] sm:$0xff] %vm6845_vm2, %v6796_v9  ;;  %9153 = vrcp.f32 %v5267_v55  ;;  %v5265_v2 = vadd.f32 1.0, %v9132_v61  ;;  %v12450_v23 = vpop.permute.xlu0 %6505 }
 0x404   : > { %v9136_v33 = vpop.eup %9135  ;;  %v6794_v58 = vsel %vm3188_vm1, %v12256_v3, %v9134_v13  ;;  %9155 = vpow2.f32 %v7465_v31  ;;  %v12459_v21 = vpop.permute.xlu1 %6510 }
 0x405   : > { %v9138_v39 = vpop.eup %9137  ;;  %6987 = vst.msk [vmem:[%s10312_s26 + $0x468] sm:$0xff] %vm6845_vm2, %v6794_v58  ;;  %9157 = vrcp.f32 %v5265_v2  ;;  %v5268_v46 = vadd.f32 1.0, %v9136_v33 }
 0x406   : > { %v9140_v5 = vpop.eup %9139  ;;  %v6799_v34 = vsel %vm3188_vm1, %v12275_v52, %v9138_v39  ;;  %9159 = vpow2.f32 %v7470_v12 }
 0x407   : > { %v9142_v3 = vpop.eup %9141  ;;  %6992 = vst.msk [vmem:[%s10312_s26 + $0x490] sm:$0xff] %vm6845_vm2, %v6799_v34  ;;  %9161 = vrcp.f32 %v5268_v46  ;;  %v5266_v6 = vadd.f32 1.0, %v9140_v5  ;;  %v8391_v7 = vpop.f32.mrb[0].mxu0 }
 0x408   : > { %v9144_v62 = vpop.eup %9143  ;;  %v5271_v30 = vadd.f32 1.0, %v9142_v3  ;;  %9163 = vpow2.f32 %v7468_v20  ;;  %v4423_v52 = vadd.f32 %v12414_v10, %v8391_v7  ;;  %v4414_v1 = vpop.f32.mrb[1].mxu0 }
 0x409   : > { %v9146_v51 = vpop.eup %9145  ;;  %9165 = vrcp.f32 %v5266_v6  ;;  %v5269_v36 = vadd.f32 1.0, %v9144_v62  ;;  %v4415_v29 = vadd.f32 %v12414_v10, %v4414_v1  ;;  %v8392_v44 = vpop.f32.mrb[2].mxu0 }
 0x40a   : > { %v9148_v28 = vpop.eup %9147  ;;  %v6797_v0 = vsel %vm3188_vm1, %v12297_v41, %v9146_v51  ;;  %9167 = vrcp.f32 %v5271_v30  ;;  %v7474_v59 = vmul.f32 -1.442695, %v4423_v52  ;;  %v4426_v11 = vadd.f32 %v12414_v10, %v8392_v44  ;;  %v4417_v37 = vpop.f32.mrb[3].mxu0 }
 0x40b   : > { %v9150_v38 = vpop.eup %9149  ;;  %6990 = vst.msk [vmem:[%s10312_s26 + $0x480] sm:$0xff] %vm6845_vm2, %v6797_v0  ;;  %9169 = vrcp.f32 %v5269_v36  ;;  %v5272_v40 = vadd.f32 1.0, %v9148_v28  ;;  %v7472_v22 = vmul.f32 -1.442695, %v4415_v29  ;;  %v4418_v35 = vadd.f32 %v12414_v10, %v4417_v37  ;;  %v12476_v9 = vpop.permute.xlu0 %6495 }
 0x40c   : > { %v9152_v48 = vpop.eup %9151  ;;  %v6800_v41 = vsel %vm3188_vm1, %v12284_v14, %v9150_v38  ;;  %9171 = vpow2.f32 %v7471_v15  ;;  %v7475_v31 = vmul.f32 -1.442695, %v4426_v11  ;;  %v12483_v58 = vpop.permute.xlu1 %6500 }
 0x40d   : > { %v9154_v25 = vpop.eup %9153  ;;  %6993 = vst.msk [vmem:[%s10312_s26 + $0x498] sm:$0xff] %vm6845_vm2, %v6800_v41  ;;  %v6798_v43 = vsel %vm3188_vm1, %v12310_v54, %v9152_v48  ;;  %9173 = vrcp.f32 %v5272_v40  ;;  %v7473_v55 = vmul.f32 -1.442695, %v4418_v35 }
 0x40e   : > { %v9156_v53 = vpop.eup %9155  ;;  %6991 = vst.msk [vmem:[%s10312_s26 + $0x488] sm:$0xff] %vm6845_vm2, %v6798_v43  ;;  %v6803_v14 = vsel %vm3188_vm1, %v12321_v27, %v9154_v25  ;;  %9175 = vpow2.f32 %v7469_v63 }
 0x40f   : > { %v9158_v56 = vpop.eup %9157  ;;  %6996 = vst.msk [vmem:[%s10312_s26 + $0x4b0] sm:$0xff] %vm6845_vm2, %v6803_v14  ;;  %v5270_v26 = vadd.f32 1.0, %v9156_v53  ;;  %9177 = vpow2.f32 %v7474_v59  ;;  %v12504_v36 = vpop.permute.xlu0 %6525 }
 0x410   : > { %v9160_v60 = vpop.eup %9159  ;;  %v6801_v54 = vsel %vm3188_vm1, %v12340_v49, %v9158_v56  ;;  %9179 = vpow2.f32 %v7472_v22  ;;  %v12511_v63 = vpop.permute.xlu1 %6530 }
 0x411   : > { %v9162_v61 = vpop.eup %9161  ;;  %6994 = vst.msk [vmem:[%s10312_s26 + $0x4a0] sm:$0xff] %vm6845_vm2, %v6801_v54  ;;  %9181 = vrcp.f32 %v5270_v26  ;;  %v5275_v27 = vadd.f32 1.0, %v9160_v60 }
 0x412   : > { %v9164_v12 = vpop.eup %9163  ;;  %v6804_v13 = vsel %vm3188_vm1, %v12326_v47, %v9162_v61  ;;  %9183 = vpow2.f32 %v7475_v31  ;;  %v8395_v2 = vpop.f32.mrb[4].mxu0 }
 0x413   : > { %v9166_v33 = vpop.eup %9165  ;;  %6997 = vst.msk [vmem:[%s10312_s26 + $0x4b8] sm:$0xff] %vm6845_vm2, %v6804_v13  ;;  %9185 = vrcp.f32 %v5275_v27  ;;  %v5273_v49 = vadd.f32 1.0, %v9164_v12  ;;  %v4439_v20 = vadd.f32 %v12414_v10, %v8395_v2  ;;  %v4430_v8 = vpop.f32.mrb[5].mxu0 }
 0x414   : > { %v9168_v39 = vpop.eup %9167  ;;  %v6802_v46 = vsel %vm3188_vm1, %v12346_v19, %v9166_v33  ;;  %9187 = vpow2.f32 %v7473_v55  ;;  %v4431_v47 = vadd.f32 %v12414_v10, %v4430_v8  ;;  %v8396_v5 = vpop.f32.mrb[6].mxu0 }
 0x415   : > { %v9170_v34 = vpop.eup %9169  ;;  %6995 = vst.msk [vmem:[%s10312_s26 + $0x4a8] sm:$0xff] %vm6845_vm2, %v6802_v46  ;;  %v6807_v50 = vsel %vm3188_vm1, %v12358_v18, %v9168_v39  ;;  %9189 = vrcp.f32 %v5273_v49  ;;  %v7478_v3 = vmul.f32 -1.442695, %v4439_v20  ;;  %v4442_v6 = vadd.f32 %v12414_v10, %v8396_v5  ;;  %v4433_v62 = vpop.f32.mrb[7].mxu0 }
 0x416   : > { %v9172_v30 = vpop.eup %9171  ;;  %7000 = vst.msk [vmem:[%s10312_s26 + $0x4d0] sm:$0xff] %vm6845_vm2, %v6807_v50  ;;  %v6805_v19 = vsel %vm3188_vm1, %v12386_v32, %v9170_v34  ;;  %v7476_v15 = vmul.f32 -1.442695, %v4431_v47  ;;  %v4434_v7 = vadd.f32 %v12414_v10, %v4433_v62  ;;  %v12520_v43 = vpop.permute.xlu0 %6515 }
 0x417   : > { %v9174_v51 = vpop.eup %9173  ;;  %6998 = vst.msk [vmem:[%s10312_s26 + $0x4c0] sm:$0xff] %vm6845_vm2, %v6805_v19  ;;  %v5276_v18 = vadd.f32 1.0, %v9172_v30  ;;  %9191 = vpow2.f32 %v7478_v3  ;;  %v7479_v52 = vmul.f32 -1.442695, %v4442_v6  ;;  %v12529_v61 = vpop.permute.xlu1 %6520 }
 0x418   : > { %v9176_v1 = vpop.eup %9175  ;;  %v6808_v28 = vsel %vm3188_vm1, %v12371_v42, %v9174_v51  ;;  %9193 = vpow2.f32 %v7476_v15  ;;  %v7477_v38 = vmul.f32 -1.442695, %v4434_v7 }
 0x419   : > { %v9178_v0 = vpop.eup %9177  ;;  %7001 = vst.msk [vmem:[%s10312_s26 + $0x4d8] sm:$0xff] %vm6845_vm2, %v6808_v28  ;;  %9195 = vrcp.f32 %v5276_v18  ;;  %v5274_v32 = vadd.f32 1.0, %v9176_v1 }
 0x41a   : > { %v9180_v29 = vpop.eup %9179  ;;  %v5279_v44 = vadd.f32 1.0, %v9178_v0  ;;  %9197 = vpow2.f32 %v7479_v52  ;;  %v8399_v40 = vpop.f32.mrb[8].mxu0 }
 0x41b   : > { %v9182_v59 = vpop.eup %9181  ;;  %9199 = vrcp.f32 %v5274_v32  ;;  %v5277_v11 = vadd.f32 1.0, %v9180_v29  ;;  %v4455_v37 = vadd.f32 %v12414_v10, %v8399_v40  ;;  %v4446_v42 = vpop.f32.mrb[9].mxu0 }
 0x41c   : > { %v9184_v48 = vpop.eup %9183  ;;  %v6806_v41 = vsel %vm3188_vm1, %v12393_v57, %v9182_v59  ;;  %9201 = vrcp.f32 %v5279_v44  ;;  %v4447_v22 = vadd.f32 %v12414_v10, %v4446_v42  ;;  %v8400_v35 = vpop.f32.mrb[10].mxu0 }
 0x41d   : > { %v9186_v25 = vpop.eup %9185  ;;  %6999 = vst.msk [vmem:[%s10312_s26 + $0x4c8] sm:$0xff] %vm6845_vm2, %v6806_v41  ;;  %9203 = vrcp.f32 %v5277_v11  ;;  %v5280_v53 = vadd.f32 1.0, %v9184_v48  ;;  %v7482_v14 = vmul.f32 -1.442695, %v4455_v37  ;;  %v4458_v31 = vadd.f32 %v12414_v10, %v8400_v35  ;;  %v4449_v56 = vpop.f32.mrb[11].mxu0 }
 0x41e   : > { %v9188_v26 = vpop.eup %9187  ;;  %v6811_v57 = vsel %vm3188_vm1, %v12417_v16, %v9186_v25  ;;  %9205 = vpow2.f32 %v7477_v38  ;;  %v7480_v60 = vmul.f32 -1.442695, %v4447_v22  ;;  %v4450_v54 = vadd.f32 %v12414_v10, %v4449_v56  ;;  %v12538_v8 = vpop.permute.xlu0 %6545 }
 0x41f   : > { %v9190_v55 = vpop.eup %9189  ;;  %7004 = vst.msk [vmem:[%s10312_s26 + $0x4f0] sm:$0xff] %vm6845_vm2, %v6811_v57  ;;  %9207 = vrcp.f32 %v5280_v53  ;;  %v5278_v27 = vadd.f32 1.0, %v9188_v26  ;;  %v7483_v12 = vmul.f32 -1.442695, %v4458_v31  ;;  %v12543_v34 = vpop.permute.xlu1 %6550 }
 0x420   : > { %v6809_v13 = vsel %vm3188_vm1, %v12433_v17, %v9190_v55  ;;  %9209 = vpow2.f32 %v7482_v14  ;;  %v7481_v49 = vmul.f32 -1.442695, %v4450_v54 }
 0x421   : > { %v9192_v2 = vpop.eup %9191  ;;  %7002 = vst.msk [vmem:[%s10312_s26 + $0x4e0] sm:$0xff] %vm6845_vm2, %v6809_v13  ;;  %9211 = vrcp.f32 %v5278_v27 }
 0x422   : > { %v9194_v16 = vpop.eup %9193  ;;  %v5283_v33 = vadd.f32 1.0, %v9192_v2  ;;  %9213 = vpow2.f32 %v7480_v60  ;;  %v8403_v47 = vpop.f32.mrb[12].mxu0 }
 0x423   : > { %v9196_v20 = vpop.eup %9195  ;;  %v5281_v39 = vadd.f32 1.0, %v9194_v16  ;;  %9215 = vpow2.f32 %v7483_v12  ;;  %v4471_v3 = vadd.f32 %v12414_v10, %v8403_v47  ;;  %v4462_v6 = vpop.f32.mrb[13].mxu0 }
 0x424   : > { %v9198_v46 = vpop.eup %9197  ;;  %v6812_v17 = vsel %vm3188_vm1, %v12422_v24, %v9196_v20  ;;  %9217 = vrcp.f32 %v5283_v33  ;;  %v4463_v24 = vadd.f32 %v12414_v10, %v4462_v6  ;;  %v8404_v19 = vpop.f32.mrb[14].mxu0 }
 0x425   : > { %v9200_v5 = vpop.eup %9199  ;;  %7005 = vst.msk [vmem:[%s10312_s26 + $0x4f8] sm:$0xff] %vm6845_vm2, %v6812_v17  ;;  %9219 = vrcp.f32 %v5281_v39  ;;  %v5284_v50 = vadd.f32 1.0, %v9198_v46  ;;  %v7486_v51 = vmul.f32 -1.442695, %v4471_v3  ;;  %v4474_v18 = vadd.f32 %v12414_v10, %v8404_v19  ;;  %v4465_v52 = vpop.f32.mrb[15].mxu0 }
 0x426   : > { %v9202_v62 = vpop.eup %9201  ;;  %v6810_v30 = vsel %vm3188_vm1, %v12441_v45, %v9200_v5  ;;  %9221 = vpow2.f32 %v7481_v49  ;;  %v7484_v28 = vmul.f32 -1.442695, %v4463_v24  ;;  %v4466_v0 = vadd.f32 %v12414_v10, %v4465_v52  ;;  %v12564_v29 = vpop.permute.xlu0 %6535 }
 0x427   : > { %v9204_v15 = vpop.eup %9203  ;;  %7003 = vst.msk [vmem:[%s10312_s26 + $0x4e8] sm:$0xff] %vm6845_vm2, %v6810_v30  ;;  %v6815_v7 = vsel %vm3188_vm1, %v12450_v23, %v9202_v62  ;;  %9223 = vrcp.f32 %v5284_v50  ;;  %v7487_v44 = vmul.f32 -1.442695, %v4474_v18  ;;  %v12571_v11 = vpop.permute.xlu1 %6540 }
 0x428   : > { %v9206_v1 = vpop.eup %9205  ;;  %7008 = vst.msk [vmem:[%s10312_s26 + $0x510] sm:$0xff] %vm6845_vm2, %v6815_v7  ;;  %v6813_v45 = vsel %vm3188_vm1, %v12476_v9, %v9204_v15  ;;  %9225 = vpow2.f32 %v7486_v51  ;;  %v7485_v59 = vmul.f32 -1.442695, %v4466_v0 }
 0x429   : > { %v9208_v32 = vpop.eup %9207  ;;  %7006 = vst.msk [vmem:[%s10312_s26 + $0x500] sm:$0xff] %vm6845_vm2, %v6813_v45  ;;  %v5282_v23 = vadd.f32 1.0, %v9206_v1  ;;  %9227 = vpow2.f32 %v7484_v28 }
 0x42a   : > { %v9210_v38 = vpop.eup %9209  ;;  %v6816_v40 = vsel %vm3188_vm1, %v12459_v21, %v9208_v32  ;;  %v12581_v56 = vpop.permute.xlu0 %6565 }
 0x42b   : > { %v9212_v9 = vpop.eup %9211  ;;  %7009 = vst.msk [vmem:[%s10312_s26 + $0x518] sm:$0xff] %vm6845_vm2, %v6816_v40  ;;  %9229 = vrcp.f32 %v5282_v23  ;;  %v5287_v37 = vadd.f32 1.0, %v9210_v38  ;;  %v12593_v2 = vpop.permute.xlu1 %6570 }
 0x42c   : > { %v9214_v42 = vpop.eup %9213  ;;  %v6814_v48 = vsel %vm3188_vm1, %v12483_v58, %v9212_v9  ;;  %9231 = vpow2.f32 %v7487_v44 }
 0x42d   : > { %v9216_v41 = vpop.eup %9215  ;;  %7007 = vst.msk [vmem:[%s10312_s26 + $0x508] sm:$0xff] %vm6845_vm2, %v6814_v48  ;;  %9233 = vrcp.f32 %v5287_v37  ;;  %v5285_v21 = vadd.f32 1.0, %v9214_v42 }
 0x42e   : > { %v8407_v22 = vpop.f32.mrb[16].mxu0  ;;  %v9218_v35 = vpop.eup %9217  ;;  %v5288_v25 = vadd.f32 1.0, %v9216_v41  ;;  %9235 = vpow2.f32 %v7485_v59 }
 0x42f   : > { %v4487_v53 = vadd.f32 %v12414_v10, %v8407_v22  ;;  %v4478_v14 = vpop.f32.mrb[17].mxu0  ;;  %v9220_v31 = vpop.eup %9219  ;;  %v6819_v58 = vsel %vm3188_vm1, %v12504_v36, %v9218_v35  ;;  %9237 = vrcp.f32 %v5285_v21 }
 0x430   : > { %v4479_v26 = vadd.f32 %v12414_v10, %v4478_v14  ;;  %v8408_v57 = vpop.f32.mrb[18].mxu0  ;;  %v9222_v60 = vpop.eup %9221  ;;  %7012 = vst.msk [vmem:[%s10312_s26 + $0x530] sm:$0xff] %vm6845_vm2, %v6819_v58  ;;  %v6817_v54 = vsel %vm3188_vm1, %v12520_v43, %v9220_v31  ;;  %9239 = vrcp.f32 %v5288_v25 }
 0x431   : > { %v7490_v55 = vmul.f32 -1.442695, %v4487_v53  ;;  %v4490_v27 = vadd.f32 %v12414_v10, %v8408_v57  ;;  %v4481_v12 = vpop.f32.mrb[19].mxu0  ;;  %v9224_v13 = vpop.eup %9223  ;;  %7010 = vst.msk [vmem:[%s10312_s26 + $0x520] sm:$0xff] %vm6845_vm2, %v6817_v54  ;;  %v5286_v36 = vadd.f32 1.0, %v9222_v60 }
 0x432   : > { %v7488_v16 = vmul.f32 -1.442695, %v4479_v26  ;;  %v4482_v33 = vadd.f32 %v12414_v10, %v4481_v12  ;;  %v6820_v49 = vsel %vm3188_vm1, %v12511_v63, %v9224_v13  ;;  %v9226_v20 = vpop.eup %9225  ;;  %v6556_v5 = vpop.permute.xlu0 %6555 }
 0x433   : > { %9241 = vpow2.f32 %v7490_v55  ;;  %v7491_v43 = vmul.f32 -1.442695, %v4490_v27  ;;  %7013 = vst.msk [vmem:[%s10312_s26 + $0x538] sm:$0xff] %vm6845_vm2, %v6820_v49  ;;  %v9228_v39 = vpop.eup %9227  ;;  %v5291_v46 = vadd.f32 1.0, %v9226_v20  ;;  %v12606_v62 = vpop.permute.xlu1 %6560 }
 0x434   : > { %9243 = vrcp.f32 %v5286_v36  ;;  %v7489_v17 = vmul.f32 -1.442695, %v4482_v33  ;;  %v5289_v50 = vadd.f32 1.0, %v9228_v39 }
 0x435   : > { %9245 = vpow2.f32 %v7488_v16  ;;  %v9230_v47 = vpop.eup %9229 }
 0x436   : > { %9247 = vpow2.f32 %v7491_v43  ;;  %v9232_v3 = vpop.eup %9231  ;;  %v6818_v63 = vsel %vm3188_vm1, %v12529_v61, %v9230_v47  ;;  %v8411_v24 = vpop.f32.mrb[20].mxu0 }
 0x437   : > { %9249 = vrcp.f32 %v5291_v46  ;;  %v9234_v6 = vpop.eup %9233  ;;  %7011 = vst.msk [vmem:[%s10312_s26 + $0x528] sm:$0xff] %vm6845_vm2, %v6818_v63  ;;  %v5292_v30 = vadd.f32 1.0, %v9232_v3  ;;  %v4503_v7 = vadd.f32 %v12414_v10, %v8411_v24  ;;  %v4494_v51 = vpop.f32.mrb[21].mxu0 }
 0x438   : > { %9251 = vrcp.f32 %v5289_v50  ;;  %v9236_v19 = vpop.eup %9235  ;;  %v6823_v15 = vsel %vm3188_vm1, %v12538_v8, %v9234_v6  ;;  %v4495_v52 = vadd.f32 %v12414_v10, %v4494_v51  ;;  %v8412_v1 = vpop.f32.mrb[22].mxu0 }
 0x439   : > { %9253 = vpow2.f32 %v7489_v17  ;;  %v9238_v61 = vpop.eup %9237  ;;  %7016 = vst.msk [vmem:[%s10312_s26 + $0x550] sm:$0xff] %vm6845_vm2, %v6823_v15  ;;  %v5290_v18 = vadd.f32 1.0, %v9236_v19  ;;  %v7494_v8 = vmul.f32 -1.442695, %v4503_v7  ;;  %v4506_v0 = vadd.f32 %v12414_v10, %v8412_v1  ;;  %v4497_v32 = vpop.f32.mrb[23].mxu0 }
 0x43a   : > { %9255 = vrcp.f32 %v5292_v30  ;;  %v9240_v45 = vpop.eup %9239  ;;  %v6821_v28 = vsel %vm3188_vm1, %v12564_v29, %v9238_v61  ;;  %v12621_v23 = vpop.permute.xlu0 %6585  ;;  %v7492_v38 = vmul.f32 -1.442695, %v4495_v52  ;;  %v4498_v40 = vadd.f32 %v12414_v10, %v4497_v32 }
 0x43b   : > { %7014 = vst.msk [vmem:[%s10312_s26 + $0x540] sm:$0xff] %vm6845_vm2, %v6821_v28  ;;  %v6824_v44 = vsel %vm3188_vm1, %v12543_v34, %v9240_v45  ;;  %9257 = vrcp.f32 %v5290_v18  ;;  %v7495_v29 = vmul.f32 -1.442695, %v4506_v0  ;;  %v12631_v37 = vpop.permute.xlu1 %6590 }
 0x43c   : > { %7017 = vst.msk [vmem:[%s10312_s26 + $0x558] sm:$0xff] %vm6845_vm2, %v6824_v44  ;;  %9259 = vpow2.f32 %v7494_v8  ;;  %v7493_v48 = vmul.f32 -1.442695, %v4498_v40 }
 0x43d   : > { %v9242_v59 = vpop.eup %9241  ;;  %9261 = vpow2.f32 %v7492_v38 }
 0x43e   : > { %v9244_v9 = vpop.eup %9243  ;;  %v5295_v42 = vadd.f32 1.0, %v9242_v59  ;;  %9263 = vpow2.f32 %v7495_v29  ;;  %v6576_v14 = vpop.permute.xlu0 %6575 }
 0x43f   : > { %v9246_v41 = vpop.eup %9245  ;;  %v6822_v34 = vsel %vm3188_vm1, %v12571_v11, %v9244_v9  ;;  %v12646_v55 = vpop.permute.xlu1 %6580 }
 0x440   : > { %v9248_v21 = vpop.eup %9247  ;;  %7015 = vst.msk [vmem:[%s10312_s26 + $0x548] sm:$0xff] %vm6845_vm2, %v6822_v34  ;;  %9265 = vrcp.f32 %v5295_v42  ;;  %v5293_v22 = vadd.f32 1.0, %v9246_v41  ;;  %v8415_v58 = vpop.f32.mrb[24].mxu0 }
 0x441   : > { %v9250_v35 = vpop.eup %9249  ;;  %v5296_v25 = vadd.f32 1.0, %v9248_v21  ;;  %9267 = vpow2.f32 %v7493_v48  ;;  %v4519_v57 = vadd.f32 %v12414_v10, %v8415_v58  ;;  %v4510_v60 = vpop.f32.mrb[25].mxu0 }
 0x442   : > { %v9252_v53 = vpop.eup %9251  ;;  %v6827_v31 = vsel %vm3188_vm1, %v12581_v56, %v9250_v35  ;;  %9269 = vrcp.f32 %v5293_v22  ;;  %v4511_v56 = vadd.f32 %v12414_v10, %v4510_v60  ;;  %v8416_v12 = vpop.f32.mrb[26].mxu0 }
 0x443   : > { %v9254_v26 = vpop.eup %9253  ;;  %7020 = vst.msk [vmem:[%s10312_s26 + $0x570] sm:$0xff] %vm6845_vm2, %v6827_v31  ;;  %v6825_v11 = vsel %vm3188_vm1, %v6556_v5, %v9252_v53  ;;  %9271 = vrcp.f32 %v5296_v25  ;;  %v7498_v36 = vmul.f32 -1.442695, %v4519_v57  ;;  %v4522_v16 = vadd.f32 %v12414_v10, %v8416_v12  ;;  %v4513_v33 = vpop.f32.mrb[27].mxu0 }
 0x444   : > { %v9256_v54 = vpop.eup %9255  ;;  %7018 = vst.msk [vmem:[%s10312_s26 + $0x560] sm:$0xff] %vm6845_vm2, %v6825_v11  ;;  %v5294_v27 = vadd.f32 1.0, %v9254_v26  ;;  %v7496_v43 = vmul.f32 -1.442695, %v4511_v56  ;;  %v4514_v20 = vadd.f32 %v12414_v10, %v4513_v33  ;;  %v6611_v30 = vpop.permute.xlu1 %6610 }
 0x445   : > { %v6828_v13 = vsel %vm3188_vm1, %v12593_v2, %v9256_v54  ;;  %v9258_v49 = vpop.eup %9257  ;;  %v7499_v17 = vmul.f32 -1.442695, %v4522_v16  ;;  %v6606_v2 = vpop.permute.xlu0 %6605 }
 0x446   : > { %7021 = vst.msk [vmem:[%s10312_s26 + $0x578] sm:$0xff] %vm6845_vm2, %v6828_v13  ;;  %9273 = vrcp.f32 %v5294_v27  ;;  %v9260_v39 = vpop.eup %9259  ;;  %v6826_v46 = vsel %vm3188_vm1, %v12606_v62, %v9258_v49  ;;  %v7497_v63 = vmul.f32 -1.442695, %v4514_v20 }
 0x447   : > { %9275 = vpow2.f32 %v7498_v36  ;;  %v9262_v47 = vpop.eup %9261  ;;  %7019 = vst.msk [vmem:[%s10312_s26 + $0x568] sm:$0xff] %vm6845_vm2, %v6826_v46  ;;  %v5299_v5 = vadd.f32 1.0, %v9260_v39 }
 0x448   : > { %9277 = vpow2.f32 %v7496_v43  ;;  %v9264_v50 = vpop.eup %9263  ;;  %v5297_v3 = vadd.f32 1.0, %v9262_v47  ;;  %v8419_v19 = vpop.f32.mrb[28].mxu0 }
 0x449   : > { %9279 = vpow2.f32 %v7499_v17  ;;  %v5300_v24 = vadd.f32 1.0, %v9264_v50  ;;  %v4535_v7 = vadd.f32 %v12414_v10, %v8419_v19  ;;  %v4526_v51 = vpop.f32.mrb[29].mxu0  ;;  %v6601_v9 = vpop.permute.xlu1 %6600 }
 0x44a   : > { %v9266_v6 = vpop.eup %9265  ;;  %9281 = vrcp.f32 %v5299_v5  ;;  %v4527_v52 = vadd.f32 %v12414_v10, %v4526_v51  ;;  %v8420_v1 = vpop.f32.mrb[30].mxu0 }
 0x44b   : > { %v9268_v15 = vpop.eup %9267  ;;  %v6831_v62 = vsel %vm3188_vm1, %v12621_v23, %v9266_v6  ;;  %9283 = vrcp.f32 %v5297_v3  ;;  %v7502_v8 = vmul.f32 -1.442695, %v4535_v7  ;;  %v4538_v0 = vadd.f32 %v12414_v10, %v8420_v1  ;;  %v4529_v32 = vpop.f32.mrb[31].mxu0 }
 0x44c   : > { %v9270_v61 = vpop.eup %9269  ;;  %7024 = vst.msk [vmem:[%s10312_s26 + $0x590] sm:$0xff] %vm6845_vm2, %v6831_v62  ;;  %9285 = vrcp.f32 %v5300_v24  ;;  %v5298_v18 = vadd.f32 1.0, %v9268_v15  ;;  %v6596_v23 = vpop.permute.xlu0 %6595  ;;  %v7500_v38 = vmul.f32 -1.442695, %v4527_v52  ;;  %v4530_v40 = vadd.f32 %v12414_v10, %v4529_v32 }
 0x44d   : > { %v9272_v45 = vpop.eup %9271  ;;  %v6829_v28 = vsel %vm3188_vm1, %v6576_v14, %v9270_v61  ;;  %9287 = vpow2.f32 %v7497_v63  ;;  %v7503_v59 = vmul.f32 -1.442695, %v4538_v0  ;;  %v6631_v58 = vpop.permute.xlu1 %6630 }
 0x44e   : > { %7022 = vst.msk [vmem:[%s10312_s26 + $0x580] sm:$0xff] %vm6845_vm2, %v6829_v28  ;;  %v6832_v44 = vsel %vm3188_vm1, %v12631_v37, %v9272_v45  ;;  %9289 = vrcp.f32 %v5298_v18  ;;  %v7501_v42 = vmul.f32 -1.442695, %v4530_v40 }
 0x44f   : > { %7025 = vst.msk [vmem:[%s10312_s26 + $0x598] sm:$0xff] %vm6845_vm2, %v6832_v44  ;;  %9291 = vpow2.f32 %v7502_v8 }
 0x450   : > { %v9274_v29 = vpop.eup %9273  ;;  %9293 = vpow2.f32 %v7500_v38  ;;  %v6626_v35 = vpop.permute.xlu0 %6625 }
 0x451   : > { %v9276_v48 = vpop.eup %9275  ;;  %v6830_v41 = vsel %vm3188_vm1, %v12646_v55, %v9274_v29  ;;  %9295 = vpow2.f32 %v7503_v59  ;;  %v6621_v49 = vpop.permute.xlu1 %6620 }
 0x452   : > { %v9278_v37 = vpop.eup %9277  ;;  %7023 = vst.msk [vmem:[%s10312_s26 + $0x588] sm:$0xff] %vm6845_vm2, %v6830_v41  ;;  %v5303_v34 = vadd.f32 1.0, %v9276_v48  ;;  %9297 = vpow2.f32 %v7501_v42 }
 0x453   : > { %v9280_v10 = vpop.eup %9279  ;;  %v5301_v21 = vadd.f32 1.0, %v9278_v37 }
 0x454   : > { %v9282_v22 = vpop.eup %9281  ;;  %9299 = vrcp.f32 %v5303_v34  ;;  %v5304_v25 = vadd.f32 1.0, %v9280_v10  ;;  %v6616_v12 = vpop.permute.xlu0 %6615 }
 0x455   : > { %v9284_v53 = vpop.eup %9283  ;;  %v6835_v14 = vsel %vm3188_vm1, %v6606_v2, %v9282_v22  ;;  %9301 = vrcp.f32 %v5301_v21  ;;  %v6641_v3 = vpop.permute.xlu1 %6640 }
 0x456   : > { %v9286_v31 = vpop.eup %9285  ;;  %7028 = vst.msk [vmem:[%s10312_s26 + $0x5b0] sm:$0xff] %vm6845_vm2, %v6835_v14  ;;  %v6833_v26 = vsel %vm3188_vm1, %v6596_v23, %v9284_v53  ;;  %9303 = vrcp.f32 %v5304_v25 }
 0x457   : > { %v9288_v11 = vpop.eup %9287  ;;  %7026 = vst.msk [vmem:[%s10312_s26 + $0x5a0] sm:$0xff] %vm6845_vm2, %v6833_v26  ;;  %v6836_v57 = vsel %vm3188_vm1, %v6611_v30, %v9286_v31 }
 0x458   : > { %v9290_v60 = vpop.eup %9289  ;;  %7029 = vst.msk [vmem:[%s10312_s26 + $0x5b8] sm:$0xff] %vm6845_vm2, %v6836_v57  ;;  %v5302_v54 = vadd.f32 1.0, %v9288_v11  ;;  %v6636_v2 = vpop.permute.xlu0 %6635 }
 0x459   : > { %v9292_v55 = vpop.eup %9291  ;;  %v6834_v27 = vsel %vm3188_vm1, %v6601_v9, %v9290_v60  ;;  %v6651_v7 = vpop.permute.xlu1 %6650 }
 0x45a   : > { %v9294_v56 = vpop.eup %9293  ;;  %7027 = vst.msk [vmem:[%s10312_s26 + $0x5a8] sm:$0xff] %vm6845_vm2, %v6834_v27  ;;  %9305 = vrcp.f32 %v5302_v54  ;;  %v5307_v13 = vadd.f32 1.0, %v9292_v55 }
 0x45b   : > { %v9296_v36 = vpop.eup %9295  ;;  %v5305_v16 = vadd.f32 1.0, %v9294_v56 }
 0x45c   : > { %v9298_v33 = vpop.eup %9297  ;;  %9307 = vrcp.f32 %v5307_v13  ;;  %v5308_v43 = vadd.f32 1.0, %v9296_v36  ;;  %v6646_v24 = vpop.permute.xlu0 %6645 }
 0x45d   : > { %9309 = vrcp.f32 %v5305_v16  ;;  %v5306_v20 = vadd.f32 1.0, %v9298_v33 }
 0x45e   : > { %v9300_v39 = vpop.eup %9299  ;;  %9311 = vrcp.f32 %v5308_v43 }
 0x45f   : > { %v9302_v46 = vpop.eup %9301  ;;  %v6839_v17 = vsel %vm3188_vm1, %v6626_v35, %v9300_v39  ;;  %9313 = vrcp.f32 %v5306_v20 }
 0x460   : > { %v9304_v47 = vpop.eup %9303  ;;  %7032 = vst.msk [vmem:[%s10312_s26 + $0x5d0] sm:$0xff] %vm6845_vm2, %v6839_v17  ;;  %v6837_v5 = vsel %vm3188_vm1, %v6616_v12, %v9302_v46 }
 0x461   : > { %7030 = vst.msk [vmem:[%s10312_s26 + $0x5c0] sm:$0xff] %vm6845_vm2, %v6837_v5  ;;  %v6840_v50 = vsel %vm3188_vm1, %v6631_v58, %v9304_v47 }
 0x462   : > { %7033 = vst.msk [vmem:[%s10312_s26 + $0x5d8] sm:$0xff] %vm6845_vm2, %v6840_v50 }
 0x464   : > { %v9306_v63 = vpop.eup %9305 }
 0x465   : > { %v6838_v6 = vsel %vm3188_vm1, %v6621_v49, %v9306_v63 }
 0x466   : > { %v9308_v30 = vpop.eup %9307  ;;  %7031 = vst.msk [vmem:[%s10312_s26 + $0x5c8] sm:$0xff] %vm6845_vm2, %v6838_v6 }
 0x467   : > { %v9310_v19 = vpop.eup %9309  ;;  %v6843_v15 = vsel %vm3188_vm1, %v6646_v24, %v9308_v30 }
 0x468   : > { %v9312_v62 = vpop.eup %9311  ;;  %7036 = vst.msk [vmem:[%s10312_s26 + $0x5f0] sm:$0xff] %vm6845_vm2, %v6843_v15  ;;  %v6841_v51 = vsel %vm3188_vm1, %v6636_v2, %v9310_v19 }
 0x469   : > { %v9314_v61 = vpop.eup %9313  ;;  %7034 = vst.msk [vmem:[%s10312_s26 + $0x5e0] sm:$0xff] %vm6845_vm2, %v6841_v51  ;;  %v6844_v18 = vsel %vm3188_vm1, %v6651_v7, %v9312_v62 }
 0x46a   : > { %7037 = vst.msk [vmem:[%s10312_s26 + $0x5f8] sm:$0xff] %vm6845_vm2, %v6844_v18  ;;  %v6842_v52 = vsel %vm3188_vm1, %v6641_v3, %v9314_v61 }
 0x46b   : > { %7035 = vst.msk [vmem:[%s10312_s26 + $0x5e8] sm:$0xff] %vm6845_vm2, %v6842_v52 }
 0x46c PF: > { %s16_s21 = sadd.s32 1, %s9328_s21  }
 0x46d   : > { %p13_p4 = scmp.ge.s32.totalorder %s16_s21, 4  }
 0x46f   :  { %15 = sbr.rel (!%p13_p4) target bundleno = 1 (0x1), region = 74 }

</bundles_post_ra>
